<compile_context>
chip_gen: v7x
topology: tpu7x:2x2x1
jax: 0.10.0
libtpu: 0.0.40
codegen_flags: <defaults>
</compile_context>

<pallas_src>
import functools

import jax
import jax.numpy as jnp
from jax import lax
from jax.experimental import pallas as pl
from jax.experimental.pallas import tpu as pltpu


def _round_up(x, m):
    return ((x + m - 1) // m) * m


# ----------------------------------------------------------------------------
# Fused direct-conv Pallas kernel: out = act(conv(x, w) + bias)
# ----------------------------------------------------------------------------
def _conv_bias_act_kernel(x_ref, w_ref, b_ref, o_ref, acc_ref, *,
                          kh, kw, oh, ow, dil, nl, prelu_alpha):
    # x_ref : (1, HP, WP, Cin)       bf16  (conv-padded input, one batch elem)
    # w_ref : (kh, kw, Cin, Coutp)   bf16  (resident across the whole grid)
    # b_ref : (1, Coutp)             f32   (resident)
    # o_ref : (1, oh, ow, Coutp)     f32
    # acc   : (oh*ow, Coutp)         f32   VMEM scratch accumulator
    cin = x_ref.shape[-1]
    acc_ref[...] = jnp.zeros_like(acc_ref)
    for i in range(kh):
        for j in range(kw):
            patch = x_ref[0, i * dil:i * dil + oh, j * dil:j * dil + ow, :]
            acc_ref[...] += jnp.dot(patch.reshape(oh * ow, cin),
                                    w_ref[i, j],
                                    preferred_element_type=jnp.float32)
    r = acc_ref[...] + b_ref[...]
    if nl == 'relu':
        r = jnp.maximum(r, 0.0)
    elif nl == 'prelu':
        r = jnp.where(r >= 0.0, r, prelu_alpha * r)
    o_ref[...] = r.reshape(1, oh, ow, r.shape[-1]).astype(o_ref.dtype)


def _conv_bias_act(x_nhwc, w_hwio, bias, *, dilation, nl, prelu_alpha):
    """x: (N, HP, WP, Cin) already conv-padded; w: (KH, KW, Cin, Cout)."""
    n, hp, wp, cin = x_nhwc.shape
    kh, kw, _, cout = w_hwio.shape
    oh = hp - dilation * (kh - 1)
    ow = wp - dilation * (kw - 1)

    # Layout padding (zero-padded, sliced off after the kernel):
    #   * output width  -> multiple of 8   (sublane-clean reshapes)
    #   * out channels  -> multiple of 128 (lane-dense, unmasked stores)
    ow_p = _round_up(ow, 8)
    coutp = _round_up(max(cout, 128), 128)
    wp_p = ow_p + dilation * (kw - 1)
    if wp_p != wp:
        x_nhwc = jnp.pad(x_nhwc, ((0, 0), (0, 0), (0, wp_p - wp), (0, 0)))
    if coutp != cout:
        w_hwio = jnp.pad(w_hwio, ((0, 0), (0, 0), (0, 0), (0, coutp - cout)))
        bias = jnp.pad(bias, ((0, coutp - cout),))

    x_bf16 = x_nhwc.astype(jnp.bfloat16)
    w_bf16 = w_hwio.astype(jnp.bfloat16)
    b_f32 = bias.astype(jnp.float32).reshape(1, coutp)

    kernel = functools.partial(_conv_bias_act_kernel, kh=kh, kw=kw, oh=oh,
                               ow=ow_p, dil=dilation, nl=nl,
                               prelu_alpha=prelu_alpha)

    out = pl.pallas_call(
        kernel,
        out_shape=jax.ShapeDtypeStruct((n, oh, ow_p, coutp), jnp.float32),
        grid_spec=pltpu.PrefetchScalarGridSpec(
            num_scalar_prefetch=0,
            grid=(n,),
            in_specs=[
                pl.BlockSpec((1, hp, wp_p, cin), lambda b: (b, 0, 0, 0)),
                pl.BlockSpec((kh, kw, cin, coutp), lambda b: (0, 0, 0, 0)),
                pl.BlockSpec((1, coutp), lambda b: (0, 0)),
            ],
            out_specs=pl.BlockSpec((1, oh, ow_p, coutp),
                                   lambda b: (b, 0, 0, 0)),
            scratch_shapes=[pltpu.VMEM((oh * ow_p, coutp), jnp.float32)],
        ),
        compiler_params=pltpu.CompilerParams(
            dimension_semantics=("parallel",),
            vmem_limit_bytes=32 * 1024 * 1024,
        ),
    )(x_bf16, w_bf16, b_f32)

    return out[:, :, :ow, :cout]


# ----------------------------------------------------------------------------
# Module wrapper matching the PyTorch Conv2d(+BN+NL) forward (NCHW in/out).
# ----------------------------------------------------------------------------
def conv2d_forward(params, x_nchw, *, stride=1, NL='relu', same_padding=False,
                   bn=False, dilation=1, prelu_alpha=0.25):
    w = params['w']                              # (Cout, Cin, KH, KW)
    b = params['b']                              # (Cout,)
    if bn:
        # TODO(synk): BatchNorm is folded with running statistics (inference
        # mode); PyTorch training-mode batch statistics are not reproduced.
        gamma, beta, mean, var = params['bn']
        scale = gamma * lax.rsqrt(var + 1e-3)
        w = w * scale[:, None, None, None]
        b = (b - mean) * scale + beta

    ksize = w.shape[-1]
    pad = dilation if dilation != 1 else ((ksize - 1) // 2 if same_padding else 0)

    x = jnp.transpose(x_nchw, (0, 2, 3, 1)).astype(jnp.bfloat16)   # NCHW->NHWC
    if pad:
        x = jnp.pad(x, ((0, 0), (pad, pad), (pad, pad), (0, 0)))
    w_hwio = jnp.transpose(w, (2, 3, 1, 0))                        # OIHW->HWIO

    y = _conv_bias_act(x, w_hwio, b, dilation=dilation, nl=NL,
                       prelu_alpha=float(prelu_alpha))
    if stride > 1:
        # TODO(synk): stride>1 is realized as stride-1 conv + subsampling
        # (mathematically identical, some redundant compute).
        y = y[:, ::stride, ::stride, :]
    return jnp.transpose(y, (0, 3, 1, 2))                          # NHWC->NCHW


# ----------------------------------------------------------------------------
# Deterministic parameter construction (PyTorch-style uniform init).
# ----------------------------------------------------------------------------
def make_conv2d_params(key, cin, cout, ksize, bn=False):
    kw_key, kb_key = jax.random.split(key)
    bound = (cin * ksize * ksize) ** -0.5
    params = {
        'w': jax.random.uniform(kw_key, (cout, cin, ksize, ksize),
                                jnp.float32, -bound, bound),
        'b': jax.random.uniform(kb_key, (cout,), jnp.float32, -bound, bound),
    }
    if bn:
        params['bn'] = (jnp.ones((cout,), jnp.float32),    # gamma
                        jnp.zeros((cout,), jnp.float32),   # beta
                        jnp.zeros((cout,), jnp.float32),   # running_mean
                        jnp.ones((cout,), jnp.float32))    # running_var
    return params


if __name__ == "__main__":
    key = jax.random.PRNGKey(0)
    k1, k2, kx = jax.random.split(key, 3)

    # Conv2d(4, 32, 3, same_padding=True, NL='relu') on x: (2, 4, 16, 16)
    p1 = make_conv2d_params(k1, 4, 32, 3)
    x = jax.random.normal(kx, (2, 4, 16, 16), jnp.float32)

    fwd1 = jax.jit(functools.partial(conv2d_forward, NL='relu',
                                     same_padding=True))
    y1 = jax.block_until_ready(fwd1(p1, x))
    assert y1.shape == (2, 32, 16, 16), y1.shape

    # Reference (f32 conv); kernel uses bf16 inputs, so allow a loose tolerance.
    ref = lax.conv_general_dilated(
        x, p1['w'], window_strides=(1, 1), padding=[(1, 1), (1, 1)],
        dimension_numbers=('NCHW', 'OIHW', 'NCHW'))
    ref = jnp.maximum(ref + p1['b'][None, :, None, None], 0.0)
    rel_err = float(jnp.max(jnp.abs(y1 - ref) / jnp.maximum(jnp.abs(ref), 1.0)))
    assert rel_err < 1e-1, f"relative error too large: {rel_err}"

    # Conv2d(32, 2, 3, same_padding=False, NL='prelu', bn=True): exercises the
    # narrow-cout (lane-padded) path, BN folding, PReLU and valid padding.
    p2 = make_conv2d_params(k2, 32, 2, 3, bn=True)
    fwd2 = jax.jit(functools.partial(conv2d_forward, NL='prelu',
                                     same_padding=False, bn=True))
    y2 = jax.block_until_ready(fwd2(p2, y1))
    assert y2.shape == (2, 2, 14, 14), y2.shape

    assert bool(jnp.all(jnp.isfinite(y1))) and bool(jnp.all(jnp.isfinite(y2)))
    print("KERNEL_OK")
</pallas_src>

<mosaic_0001>
module attributes {stable_mosaic.version = 11 : i64} {
  func.func @_conv_bias_act_kernel(%arg0: i32, %arg1: memref<1x18x18x4xbf16, #tpu.memory_space<vmem>>, %arg2: memref<3x3x4x128xbf16, #tpu.memory_space<vmem>>, %arg3: memref<1x128xf32, #tpu.memory_space<vmem>>, %arg4: memref<1x16x16x128xf32, #tpu.memory_space<vmem>>, %arg5: memref<256x128xf32, #tpu.memory_space<vmem>>) attributes {dimension_semantics = [#tpu.dimension_semantics<parallel>], iteration_bounds = array<i64: 2>, scalar_prefetch = 0 : i64, scratch_operands = 1 : i64, tpu.core_type = #tpu.core_type<tc>, window_params = [{transform_indices = @transform_0, window_bounds = array<i64: 1, 18, 18, 4>}, {pipeline_mode = #tpu.pipeline_mode<synchronous>, transform_indices = @transform_1, window_bounds = array<i64: 3, 3, 4, 128>}, {pipeline_mode = #tpu.pipeline_mode<synchronous>, transform_indices = @transform_2, window_bounds = array<i64: 1, 128>}, {transform_indices = @transform_3, window_bounds = array<i64: 1, 16, 16, 128>}]} {
    %cst = arith.constant 0.000000e+00 : f32
    %0 = vector.broadcast %cst : f32 to vector<256x128xf32>
    %c0 = arith.constant 0 : index
    %c0_0 = arith.constant 0 : index
    %1 = vector.load %arg5[%c0, %c0_0] : memref<256x128xf32, #tpu.memory_space<vmem>>, vector<256x128xf32>
    tpu.vector_store %arg5[%c0, %c0_0], %0 {strides = array<i32>} : memref<256x128xf32, #tpu.memory_space<vmem>>, vector<256x128xf32>,
    %c0_1 = arith.constant 0 : index
    %c0_2 = arith.constant 0 : index
    %c0_3 = arith.constant 0 : index
    %c0_4 = arith.constant 0 : index
    %2 = vector.load %arg1[%c0_1, %c0_2, %c0_3, %c0_4] : memref<1x18x18x4xbf16, #tpu.memory_space<vmem>>, vector<1x16x16x4xbf16>
    %3 = vector.shape_cast %2 : vector<1x16x16x4xbf16> to vector<16x16x4xbf16>
    %c0_5 = arith.constant 0 : index
    %c0_6 = arith.constant 0 : index
    %4 = vector.load %arg5[%c0_5, %c0_6] : memref<256x128xf32, #tpu.memory_space<vmem>>, vector<256x128xf32>
    %5 = vector.shape_cast %3 : vector<16x16x4xbf16> to vector<256x4xbf16>
    %c0_7 = arith.constant 0 : index
    %c0_8 = arith.constant 0 : index
    %c0_9 = arith.constant 0 : index
    %c0_10 = arith.constant 0 : index
    %6 = vector.load %arg2[%c0_7, %c0_8, %c0_9, %c0_10] : memref<3x3x4x128xbf16, #tpu.memory_space<vmem>>, vector<1x1x4x128xbf16>
    %7 = vector.shape_cast %6 : vector<1x1x4x128xbf16> to vector<4x128xbf16>
    %cst_11 = arith.constant dense<0.000000e+00> : vector<256x128xf32>
    %8 = tpu.matmul %5, %7, %cst_11 {dimension_numbers = #tpu.dot_dimension_numbers<[1], [0], [0], [1], [0, 0, 1, 1], [], []>} : vector<256x4xbf16>, vector<4x128xbf16>, vector<256x128xf32> -> vector<256x128xf32>
    %9 = arith.addf %4, %8 : vector<256x128xf32>
    %c0_12 = arith.constant 0 : index
    %c0_13 = arith.constant 0 : index
    %10 = vector.load %arg5[%c0_12, %c0_13] : memref<256x128xf32, #tpu.memory_space<vmem>>, vector<256x128xf32>
    tpu.vector_store %arg5[%c0_12, %c0_13], %9 {strides = array<i32>} : memref<256x128xf32, #tpu.memory_space<vmem>>, vector<256x128xf32>,
    %c0_14 = arith.constant 0 : index
    %c0_15 = arith.constant 0 : index
    %c1 = arith.constant 1 : index
    %c0_16 = arith.constant 0 : index
    %11 = vector.load %arg1[%c0_14, %c0_15, %c1, %c0_16] : memref<1x18x18x4xbf16, #tpu.memory_space<vmem>>, vector<1x16x16x4xbf16>
    %12 = vector.shape_cast %11 : vector<1x16x16x4xbf16> to vector<16x16x4xbf16>
    %c0_17 = arith.constant 0 : index
    %c0_18 = arith.constant 0 : index
    %13 = vector.load %arg5[%c0_17, %c0_18] : memref<256x128xf32, #tpu.memory_space<vmem>>, vector<256x128xf32>
    %14 = vector.shape_cast %12 : vector<16x16x4xbf16> to vector<256x4xbf16>
    %c0_19 = arith.constant 0 : index
    %c1_20 = arith.constant 1 : index
    %c0_21 = arith.constant 0 : index
    %c0_22 = arith.constant 0 : index
    %15 = vector.load %arg2[%c0_19, %c1_20, %c0_21, %c0_22] : memref<3x3x4x128xbf16, #tpu.memory_space<vmem>>, vector<1x1x4x128xbf16>
    %16 = vector.shape_cast %15 : vector<1x1x4x128xbf16> to vector<4x128xbf16>
    %cst_23 = arith.constant dense<0.000000e+00> : vector<256x128xf32>
    %17 = tpu.matmul %14, %16, %cst_23 {dimension_numbers = #tpu.dot_dimension_numbers<[1], [0], [0], [1], [0, 0, 1, 1], [], []>} : vector<256x4xbf16>, vector<4x128xbf16>, vector<256x128xf32> -> vector<256x128xf32>
    %18 = arith.addf %13, %17 : vector<256x128xf32>
    %c0_24 = arith.constant 0 : index
    %c0_25 = arith.constant 0 : index
    %19 = vector.load %arg5[%c0_24, %c0_25] : memref<256x128xf32, #tpu.memory_space<vmem>>, vector<256x128xf32>
    tpu.vector_store %arg5[%c0_24, %c0_25], %18 {strides = array<i32>} : memref<256x128xf32, #tpu.memory_space<vmem>>, vector<256x128xf32>,
    %c0_26 = arith.constant 0 : index
    %c0_27 = arith.constant 0 : index
    %c2 = arith.constant 2 : index
    %c0_28 = arith.constant 0 : index
    %20 = vector.load %arg1[%c0_26, %c0_27, %c2, %c0_28] : memref<1x18x18x4xbf16, #tpu.memory_space<vmem>>, vector<1x16x16x4xbf16>
    %21 = vector.shape_cast %20 : vector<1x16x16x4xbf16> to vector<16x16x4xbf16>
    %c0_29 = arith.constant 0 : index
    %c0_30 = arith.constant 0 : index
    %22 = vector.load %arg5[%c0_29, %c0_30] : memref<256x128xf32, #tpu.memory_space<vmem>>, vector<256x128xf32>
    %23 = vector.shape_cast %21 : vector<16x16x4xbf16> to vector<256x4xbf16>
    %c0_31 = arith.constant 0 : index
    %c2_32 = arith.constant 2 : index
    %c0_33 = arith.constant 0 : index
    %c0_34 = arith.constant 0 : index
    %24 = vector.load %arg2[%c0_31, %c2_32, %c0_33, %c0_34] : memref<3x3x4x128xbf16, #tpu.memory_space<vmem>>, vector<1x1x4x128xbf16>
    %25 = vector.shape_cast %24 : vector<1x1x4x128xbf16> to vector<4x128xbf16>
    %cst_35 = arith.constant dense<0.000000e+00> : vector<256x128xf32>
    %26 = tpu.matmul %23, %25, %cst_35 {dimension_numbers = #tpu.dot_dimension_numbers<[1], [0], [0], [1], [0, 0, 1, 1], [], []>} : vector<256x4xbf16>, vector<4x128xbf16>, vector<256x128xf32> -> vector<256x128xf32>
    %27 = arith.addf %22, %26 : vector<256x128xf32>
    %c0_36 = arith.constant 0 : index
    %c0_37 = arith.constant 0 : index
    %28 = vector.load %arg5[%c0_36, %c0_37] : memref<256x128xf32, #tpu.memory_space<vmem>>, vector<256x128xf32>
    tpu.vector_store %arg5[%c0_36, %c0_37], %27 {strides = array<i32>} : memref<256x128xf32, #tpu.memory_space<vmem>>, vector<256x128xf32>,
    %c0_38 = arith.constant 0 : index
    %c1_39 = arith.constant 1 : index
    %c0_40 = arith.constant 0 : index
    %c0_41 = arith.constant 0 : index
    %29 = vector.load %arg1[%c0_38, %c1_39, %c0_40, %c0_41] : memref<1x18x18x4xbf16, #tpu.memory_space<vmem>>, vector<1x16x16x4xbf16>
    %30 = vector.shape_cast %29 : vector<1x16x16x4xbf16> to vector<16x16x4xbf16>
    %c0_42 = arith.constant 0 : index
    %c0_43 = arith.constant 0 : index
    %31 = vector.load %arg5[%c0_42, %c0_43] : memref<256x128xf32, #tpu.memory_space<vmem>>, vector<256x128xf32>
    %32 = vector.shape_cast %30 : vector<16x16x4xbf16> to vector<256x4xbf16>
    %c1_44 = arith.constant 1 : index
    %c0_45 = arith.constant 0 : index
    %c0_46 = arith.constant 0 : index
    %c0_47 = arith.constant 0 : index
    %33 = vector.load %arg2[%c1_44, %c0_45, %c0_46, %c0_47] : memref<3x3x4x128xbf16, #tpu.memory_space<vmem>>, vector<1x1x4x128xbf16>
    %34 = vector.shape_cast %33 : vector<1x1x4x128xbf16> to vector<4x128xbf16>
    %cst_48 = arith.constant dense<0.000000e+00> : vector<256x128xf32>
    %35 = tpu.matmul %32, %34, %cst_48 {dimension_numbers = #tpu.dot_dimension_numbers<[1], [0], [0], [1], [0, 0, 1, 1], [], []>} : vector<256x4xbf16>, vector<4x128xbf16>, vector<256x128xf32> -> vector<256x128xf32>
    %36 = arith.addf %31, %35 : vector<256x128xf32>
    %c0_49 = arith.constant 0 : index
    %c0_50 = arith.constant 0 : index
    %37 = vector.load %arg5[%c0_49, %c0_50] : memref<256x128xf32, #tpu.memory_space<vmem>>, vector<256x128xf32>
    tpu.vector_store %arg5[%c0_49, %c0_50], %36 {strides = array<i32>} : memref<256x128xf32, #tpu.memory_space<vmem>>, vector<256x128xf32>,
    %c0_51 = arith.constant 0 : index
    %c1_52 = arith.constant 1 : index
    %c1_53 = arith.constant 1 : index
    %c0_54 = arith.constant 0 : index
    %38 = vector.load %arg1[%c0_51, %c1_52, %c1_53, %c0_54] : memref<1x18x18x4xbf16, #tpu.memory_space<vmem>>, vector<1x16x16x4xbf16>
    %39 = vector.shape_cast %38 : vector<1x16x16x4xbf16> to vector<16x16x4xbf16>
    %c0_55 = arith.constant 0 : index
    %c0_56 = arith.constant 0 : index
    %40 = vector.load %arg5[%c0_55, %c0_56] : memref<256x128xf32, #tpu.memory_space<vmem>>, vector<256x128xf32>
    %41 = vector.shape_cast %39 : vector<16x16x4xbf16> to vector<256x4xbf16>
    %c1_57 = arith.constant 1 : index
    %c1_58 = arith.constant 1 : index
    %c0_59 = arith.constant 0 : index
    %c0_60 = arith.constant 0 : index
    %42 = vector.load %arg2[%c1_57, %c1_58, %c0_59, %c0_60] : memref<3x3x4x128xbf16, #tpu.memory_space<vmem>>, vector<1x1x4x128xbf16>
    %43 = vector.shape_cast %42 : vector<1x1x4x128xbf16> to vector<4x128xbf16>
    %cst_61 = arith.constant dense<0.000000e+00> : vector<256x128xf32>
    %44 = tpu.matmul %41, %43, %cst_61 {dimension_numbers = #tpu.dot_dimension_numbers<[1], [0], [0], [1], [0, 0, 1, 1], [], []>} : vector<256x4xbf16>, vector<4x128xbf16>, vector<256x128xf32> -> vector<256x128xf32>
    %45 = arith.addf %40, %44 : vector<256x128xf32>
    %c0_62 = arith.constant 0 : index
    %c0_63 = arith.constant 0 : index
    %46 = vector.load %arg5[%c0_62, %c0_63] : memref<256x128xf32, #tpu.memory_space<vmem>>, vector<256x128xf32>
    tpu.vector_store %arg5[%c0_62, %c0_63], %45 {strides = array<i32>} : memref<256x128xf32, #tpu.memory_space<vmem>>, vector<256x128xf32>,
    %c0_64 = arith.constant 0 : index
    %c1_65 = arith.constant 1 : index
    %c2_66 = arith.constant 2 : index
    %c0_67 = arith.constant 0 : index
    %47 = vector.load %arg1[%c0_64, %c1_65, %c2_66, %c0_67] : memref<1x18x18x4xbf16, #tpu.memory_space<vmem>>, vector<1x16x16x4xbf16>
    %48 = vector.shape_cast %47 : vector<1x16x16x4xbf16> to vector<16x16x4xbf16>
    %c0_68 = arith.constant 0 : index
    %c0_69 = arith.constant 0 : index
    %49 = vector.load %arg5[%c0_68, %c0_69] : memref<256x128xf32, #tpu.memory_space<vmem>>, vector<256x128xf32>
    %50 = vector.shape_cast %48 : vector<16x16x4xbf16> to vector<256x4xbf16>
    %c1_70 = arith.constant 1 : index
    %c2_71 = arith.constant 2 : index
    %c0_72 = arith.constant 0 : index
    %c0_73 = arith.constant 0 : index
    %51 = vector.load %arg2[%c1_70, %c2_71, %c0_72, %c0_73] : memref<3x3x4x128xbf16, #tpu.memory_space<vmem>>, vector<1x1x4x128xbf16>
    %52 = vector.shape_cast %51 : vector<1x1x4x128xbf16> to vector<4x128xbf16>
    %cst_74 = arith.constant dense<0.000000e+00> : vector<256x128xf32>
    %53 = tpu.matmul %50, %52, %cst_74 {dimension_numbers = #tpu.dot_dimension_numbers<[1], [0], [0], [1], [0, 0, 1, 1], [], []>} : vector<256x4xbf16>, vector<4x128xbf16>, vector<256x128xf32> -> vector<256x128xf32>
    %54 = arith.addf %49, %53 : vector<256x128xf32>
    %c0_75 = arith.constant 0 : index
    %c0_76 = arith.constant 0 : index
    %55 = vector.load %arg5[%c0_75, %c0_76] : memref<256x128xf32, #tpu.memory_space<vmem>>, vector<256x128xf32>
    tpu.vector_store %arg5[%c0_75, %c0_76], %54 {strides = array<i32>} : memref<256x128xf32, #tpu.memory_space<vmem>>, vector<256x128xf32>,
    %c0_77 = arith.constant 0 : index
    %c2_78 = arith.constant 2 : index
    %c0_79 = arith.constant 0 : index
    %c0_80 = arith.constant 0 : index
    %56 = vector.load %arg1[%c0_77, %c2_78, %c0_79, %c0_80] : memref<1x18x18x4xbf16, #tpu.memory_space<vmem>>, vector<1x16x16x4xbf16>
    %57 = vector.shape_cast %56 : vector<1x16x16x4xbf16> to vector<16x16x4xbf16>
    %c0_81 = arith.constant 0 : index
    %c0_82 = arith.constant 0 : index
    %58 = vector.load %arg5[%c0_81, %c0_82] : memref<256x128xf32, #tpu.memory_space<vmem>>, vector<256x128xf32>
    %59 = vector.shape_cast %57 : vector<16x16x4xbf16> to vector<256x4xbf16>
    %c2_83 = arith.constant 2 : index
    %c0_84 = arith.constant 0 : index
    %c0_85 = arith.constant 0 : index
    %c0_86 = arith.constant 0 : index
    %60 = vector.load %arg2[%c2_83, %c0_84, %c0_85, %c0_86] : memref<3x3x4x128xbf16, #tpu.memory_space<vmem>>, vector<1x1x4x128xbf16>
    %61 = vector.shape_cast %60 : vector<1x1x4x128xbf16> to vector<4x128xbf16>
    %cst_87 = arith.constant dense<0.000000e+00> : vector<256x128xf32>
    %62 = tpu.matmul %59, %61, %cst_87 {dimension_numbers = #tpu.dot_dimension_numbers<[1], [0], [0], [1], [0, 0, 1, 1], [], []>} : vector<256x4xbf16>, vector<4x128xbf16>, vector<256x128xf32> -> vector<256x128xf32>
    %63 = arith.addf %58, %62 : vector<256x128xf32>
    %c0_88 = arith.constant 0 : index
    %c0_89 = arith.constant 0 : index
    %64 = vector.load %arg5[%c0_88, %c0_89] : memref<256x128xf32, #tpu.memory_space<vmem>>, vector<256x128xf32>
    tpu.vector_store %arg5[%c0_88, %c0_89], %63 {strides = array<i32>} : memref<256x128xf32, #tpu.memory_space<vmem>>, vector<256x128xf32>,
    %c0_90 = arith.constant 0 : index
    %c2_91 = arith.constant 2 : index
    %c1_92 = arith.constant 1 : index
    %c0_93 = arith.constant 0 : index
    %65 = vector.load %arg1[%c0_90, %c2_91, %c1_92, %c0_93] : memref<1x18x18x4xbf16, #tpu.memory_space<vmem>>, vector<1x16x16x4xbf16>
    %66 = vector.shape_cast %65 : vector<1x16x16x4xbf16> to vector<16x16x4xbf16>
    %c0_94 = arith.constant 0 : index
    %c0_95 = arith.constant 0 : index
    %67 = vector.load %arg5[%c0_94, %c0_95] : memref<256x128xf32, #tpu.memory_space<vmem>>, vector<256x128xf32>
    %68 = vector.shape_cast %66 : vector<16x16x4xbf16> to vector<256x4xbf16>
    %c2_96 = arith.constant 2 : index
    %c1_97 = arith.constant 1 : index
    %c0_98 = arith.constant 0 : index
    %c0_99 = arith.constant 0 : index
    %69 = vector.load %arg2[%c2_96, %c1_97, %c0_98, %c0_99] : memref<3x3x4x128xbf16, #tpu.memory_space<vmem>>, vector<1x1x4x128xbf16>
    %70 = vector.shape_cast %69 : vector<1x1x4x128xbf16> to vector<4x128xbf16>
    %cst_100 = arith.constant dense<0.000000e+00> : vector<256x128xf32>
    %71 = tpu.matmul %68, %70, %cst_100 {dimension_numbers = #tpu.dot_dimension_numbers<[1], [0], [0], [1], [0, 0, 1, 1], [], []>} : vector<256x4xbf16>, vector<4x128xbf16>, vector<256x128xf32> -> vector<256x128xf32>
    %72 = arith.addf %67, %71 : vector<256x128xf32>
    %c0_101 = arith.constant 0 : index
    %c0_102 = arith.constant 0 : index
    %73 = vector.load %arg5[%c0_101, %c0_102] : memref<256x128xf32, #tpu.memory_space<vmem>>, vector<256x128xf32>
    tpu.vector_store %arg5[%c0_101, %c0_102], %72 {strides = array<i32>} : memref<256x128xf32, #tpu.memory_space<vmem>>, vector<256x128xf32>,
    %c0_103 = arith.constant 0 : index
    %c2_104 = arith.constant 2 : index
    %c2_105 = arith.constant 2 : index
    %c0_106 = arith.constant 0 : index
    %74 = vector.load %arg1[%c0_103, %c2_104, %c2_105, %c0_106] : memref<1x18x18x4xbf16, #tpu.memory_space<vmem>>, vector<1x16x16x4xbf16>
    %75 = vector.shape_cast %74 : vector<1x16x16x4xbf16> to vector<16x16x4xbf16>
    %c0_107 = arith.constant 0 : index
    %c0_108 = arith.constant 0 : index
    %76 = vector.load %arg5[%c0_107, %c0_108] : memref<256x128xf32, #tpu.memory_space<vmem>>, vector<256x128xf32>
    %77 = vector.shape_cast %75 : vector<16x16x4xbf16> to vector<256x4xbf16>
    %c2_109 = arith.constant 2 : index
    %c2_110 = arith.constant 2 : index
    %c0_111 = arith.constant 0 : index
    %c0_112 = arith.constant 0 : index
    %78 = vector.load %arg2[%c2_109, %c2_110, %c0_111, %c0_112] : memref<3x3x4x128xbf16, #tpu.memory_space<vmem>>, vector<1x1x4x128xbf16>
    %79 = vector.shape_cast %78 : vector<1x1x4x128xbf16> to vector<4x128xbf16>
    %cst_113 = arith.constant dense<0.000000e+00> : vector<256x128xf32>
    %80 = tpu.matmul %77, %79, %cst_113 {dimension_numbers = #tpu.dot_dimension_numbers<[1], [0], [0], [1], [0, 0, 1, 1], [], []>} : vector<256x4xbf16>, vector<4x128xbf16>, vector<256x128xf32> -> vector<256x128xf32>
    %81 = arith.addf %76, %80 : vector<256x128xf32>
    %c0_114 = arith.constant 0 : index
    %c0_115 = arith.constant 0 : index
    %82 = vector.load %arg5[%c0_114, %c0_115] : memref<256x128xf32, #tpu.memory_space<vmem>>, vector<256x128xf32>
    tpu.vector_store %arg5[%c0_114, %c0_115], %81 {strides = array<i32>} : memref<256x128xf32, #tpu.memory_space<vmem>>, vector<256x128xf32>,
    %c0_116 = arith.constant 0 : index
    %c0_117 = arith.constant 0 : index
    %83 = vector.load %arg5[%c0_116, %c0_117] : memref<256x128xf32, #tpu.memory_space<vmem>>, vector<256x128xf32>
    %c0_118 = arith.constant 0 : index
    %c0_119 = arith.constant 0 : index
    %84 = vector.load %arg3[%c0_118, %c0_119] : memref<1x128xf32, #tpu.memory_space<vmem>>, vector<1x128xf32>
    %85 = vector.broadcast %84 : vector<1x128xf32> to vector<256x128xf32>
    %86 = arith.addf %83, %85 : vector<256x128xf32>
    %cst_120 = arith.constant 0.000000e+00 : f32
    %87 = vector.broadcast %cst_120 : f32 to vector<256x128xf32>
    %88 = arith.maximumf %86, %87 : vector<256x128xf32>
    %89 = vector.shape_cast %88 : vector<256x128xf32> to vector<1x16x16x128xf32>
    %c0_121 = arith.constant 0 : index
    %c0_122 = arith.constant 0 : index
    %c0_123 = arith.constant 0 : index
    %c0_124 = arith.constant 0 : index
    %90 = vector.load %arg4[%c0_121, %c0_122, %c0_123, %c0_124] : memref<1x16x16x128xf32, #tpu.memory_space<vmem>>, vector<1x16x16x128xf32>
    tpu.vector_store %arg4[%c0_121, %c0_122, %c0_123, %c0_124], %89 {strides = array<i32>} : memref<1x16x16x128xf32, #tpu.memory_space<vmem>>, vector<1x16x16x128xf32>,
    return
  }
  func.func @transform_0(%arg0: i32) -> (i32, i32, i32, i32) {
    %c0_i32 = arith.constant 0 : i32
    %c0_i32_0 = arith.constant 0 : i32
    %c0_i32_1 = arith.constant 0 : i32
    %c0_i32_2 = arith.constant 0 : i32
    return %arg0, %c0_i32, %c0_i32_0, %c0_i32_1 : i32, i32, i32, i32
  }
  func.func @transform_1(%arg0: i32) -> (i32, i32, i32, i32) {
    %c0_i32 = arith.constant 0 : i32
    %c0_i32_0 = arith.constant 0 : i32
    %c0_i32_1 = arith.constant 0 : i32
    %c0_i32_2 = arith.constant 0 : i32
    %c0_i32_3 = arith.constant 0 : i32
    return %c0_i32, %c0_i32_0, %c0_i32_1, %c0_i32_2 : i32, i32, i32, i32
  }
  func.func @transform_2(%arg0: i32) -> (i32, i32) {
    %c0_i32 = arith.constant 0 : i32
    %c0_i32_0 = arith.constant 0 : i32
    %c0_i32_1 = arith.constant 0 : i32
    return %c0_i32, %c0_i32_0 : i32, i32
  }
  func.func @transform_3(%arg0: i32) -> (i32, i32, i32, i32) {
    %c0_i32 = arith.constant 0 : i32
    %c0_i32_0 = arith.constant 0 : i32
    %c0_i32_1 = arith.constant 0 : i32
    %c0_i32_2 = arith.constant 0 : i32
    return %arg0, %c0_i32, %c0_i32_0, %c0_i32_1 : i32, i32, i32, i32
  }
}

</mosaic_0001>

<bundles_post_ra>
// kernel: conv2d_forward.1
= control target key start
LH: loop header
LB: loop body
LE: loop exit
PB: predicated region body
PF: predicated region fallthrough
CT: control target
= control target key end

     0   :  { %s7162_s12 = smov 0   ;;  %s8517_s0 = inlined_call_operand.vmem [shape: bf16[2,18,18,4], index: 0, kind: input, shape index: {}]   ;;  %s8518_s1 = inlined_call_operand.vmem [shape: bf16[3,3,4,128], index: 1, kind: input, shape index: {}]   ;;  %s8519_s2 = inlined_call_operand.vmem [shape: f32[1,128], index: 2, kind: input, shape index: {}]   ;;  %s8520_s3 = inlined_call_operand.vmem [shape: f32[2,16,16,128], index: 3, kind: output, shape index: {}]  }
   0x1 LB: > { %s5737_s13 = sadd.s32 4294967295, %s7140_s12   ;;  %p5741_p0 = scmp.ge.s32.totalorder %s7140_s12, 1  ;;  %s7140_s12 = sphi %s7162_s12, %s13_s12  }
   0x2   : > { %p137_p1 = scmp.lt.s32.totalorder %s7140_s12, 3 }
   0x4   : > { %p138_p2 = pnand %p5741_p0, %p137_p1 }
   0x5   : > { %v268_v0 = vld [vmem:[%s8518_s1] sm:$0x3] (!%p138_p2)  ;;  %vm398_vm0 = vcmask (!%p138_p2), 1041408   ;;  %p161_p3 = scmp.lt.s32.totalorder (!%p138_p2), %s5737_s13, 1  ;;  %v5972_v2 = vld [vmem:[%s8518_s1 + $0x8] sm:$0x3] (!%p138_p2) }
   0x6   : > { %141 = sbr.rel (%p138_p2) target bundleno = 542 (0x21e), region = 32  ;;  %7066 = vmatprep.subr.msk.bf16.mxu1 (!%p138_p2), %vm398_vm0, %v268_v0  ;;  %v400_v1 = vsel (!%p138_p2), %vm398_vm0, %v268_v0, 0  ;;  %v5777_v3 = vld [vmem:[%s8518_s1 + $0x2] sm:$0x3] (!%p138_p2)  ;;  %7070 = vmatprep.subr.msk.bf16.mxu0 (!%p138_p2), %vm398_vm0, %v5972_v2  ;;  %v7185_v4 = vsel (!%p138_p2), %vm398_vm0, %v5972_v2, 0  ;;  %vm349_vm1 = vcmask (!%p138_p2), 31744  }
   0x7   : > { %6503 = vmatpush3.bf16.msra.mxu1 (!%p138_p2), %v400_v1  ;;  %6639 = vmatpush3.bf16.msra.mxu0 (!%p138_p2), %v7185_v4  ;;  %v6069_v5 = vld [vmem:[%s8518_s1 + $0xa] sm:$0x3] (!%p138_p2)  ;;  %vm707_vm2 = vsmask.f32 (!%p138_p2), 3328  ;;  %vm708_vm3 = vsmask.f32 (!%p138_p2), 7440 }
   0x8   : > { %7067 = vmatprep.subr.msk.bf16.mxu1 (!%p138_p2), %vm398_vm0, %v5777_v3  ;;  %7072 = vmatprep.subr.msk.bf16.mxu0 (!%p138_p2), %vm398_vm0, %v6069_v5  ;;  %v7202_v6 = vld [vmem:[%s8518_s1 + $0xc] sm:$0x3] (!%p138_p2)  ;;  %v5826_v7 = vld [vmem:[%s8518_s1 + $0x4] sm:$0x3] (!%p138_p2)  ;;  %v7210_v8 = vld [vmem:[%s8518_s1 + $0xe] sm:$0x3] (!%p138_p2) }
   0x9   : > { %v1193_v10 = vsel (!%p138_p2), %vm398_vm0, %v5777_v3, 0  ;;  %v7216_v12 = vsel (!%p138_p2), %vm398_vm0, %v6069_v5, 0  ;;  %v7222_v14 = vsel (!%p138_p2), %vm398_vm0, %v7202_v6, 0  ;;  %v7226_v15 = vsel (!%p138_p2), %vm398_vm0, %v5826_v7, 0  ;;  %vm7244_vm4 = vmor (!%p138_p2), %vm707_vm2, %vm708_vm3 }
   0xa   : > { %v7230_v16 = vsel (!%p138_p2), %vm398_vm0, %v7210_v8, 0  ;;  %vm1548_vm5 = vcmask (!%p138_p2), 1042432   ;;  %vm1549_vm6 = vcmask (!%p138_p2), 1046532  }
   0xb   : > { %vm7319_vm7 = vmor (!%p138_p2), %vm1548_vm5, %vm1549_vm6 }
   0xd   : > { %s8526_s13 = smov (!%p161_p3, %s5737_s13), 1 }
   0xe   : > { %s7076_s22 = smul.u32 216, %s8526_s13  ;;  %s6348_s15 = sshll.u32 %s8526_s13, 8 }
   0xf   : > { %s8445_s18 = scalar_lea.vmem %s8520_s3, %s6348_s15 }
  0x10   : > { %s7197_s25 = scalar_lea.vmem %s8517_s0, %s7076_s22 }
  0x11   : > { %v7085_v9 = vld [vmem:[%s7197_s25] sm:$0xff]   ;;  %v7086_v11 = vld [vmem:[%s7197_s25 + $0xc] sm:$0xff]   ;;  %v7087_v13 = vld [vmem:[%s7197_s25 + $0x18] sm:$0xff]  }
  0x12   : > { %6504 = vmatprep.mubr.msk.bf16.mxu1 %vm349_vm1, %v7085_v9  ;;  %v5924_v17 = vld [vmem:[%s7197_s25 + $0xc] sm:$0xf]  ;;  %v5925_v18 = vld [vmem:[%s7197_s25 + $0x10] sm:$0xf]  ;;  %v5926_v19 = vld [vmem:[%s7197_s25 + $0x14] sm:$0x1] }
  0x13   : > { %6505 = vmatmul.mubr.msk.bf16.vlgmr.msra.gmra.mrb[0].mxu1 %vm349_vm1, %v7086_v11  ;;  %v7088_v20 = vld [vmem:[%s7197_s25 + $0x24] sm:$0xff]   ;;  %v2493_v21 = vshrl.u32 %v5924_v17, 16  ;;  %v2496_v22 = vshll.u32 %v5924_v17, 16  ;;  %v2502_v23 = vshll.u32 %v5925_v18, 16  ;;  %v2506_v24 = vshrl.u32 %v5925_v18, 16  ;;  %v7089_v42 = vld [vmem:[%s7197_s25 + $0x30] sm:$0xff]  }
  0x14   : > { %6508 = vmatprep.mubr.msk.bf16.mxu1 %vm349_vm1, %v7087_v13  ;;  %6537 = vmatpush3.bf16.msra.mxu1 %v1193_v10  ;;  %v5927_v25 = vld [vmem:[%s7197_s25 + $0x18] sm:$0xf]  ;;  %v2512_v26 = vshll.u32 %v5926_v19, 16  ;;  %v5928_v27 = vld [vmem:[%s7197_s25 + $0x1c] sm:$0xf] }
  0x15   : > { %7068 = vmatprep.subr.msk.bf16.mxu1 %vm398_vm0, %v5826_v7  ;;  %v5929_v28 = vld [vmem:[%s7197_s25 + $0x20] sm:$0x1]  ;;  %v2517_v29 = vshrl.u32 %v5927_v25, 16  ;;  %v2495_v30 = vrot.slane %v2493_v21, 4  ;;  %v2498_v31 = vrot.slane %v2496_v22, 5  ;;  %v2504_v32 = vrot.slane %v2502_v23, 5 }
  0x16   : > { %v2508_v33 = vrot.slane %v2506_v24, 4  ;;  %v2514_v34 = vrot.slane %v2512_v26, 5  ;;  %v2520_v36 = vshll.u32 %v5927_v25, 16  ;;  %v2526_v37 = vshll.u32 %v5928_v27, 16  ;;  %v5930_v46 = vld [vmem:[%s7197_s25 + $0x24] sm:$0xf] }
  0x17   : > { %v2519_v35 = vrot.slane %v2517_v29, 4  ;;  %v2499_v38 = vor.u32 %v2498_v31, %v2495_v30  ;;  %v2530_v40 = vshrl.u32 %v5928_v27, 16  ;;  %v2536_v41 = vshll.u32 %v5929_v28, 16  ;;  %v5931_v51 = vld [vmem:[%s7197_s25 + $0x28] sm:$0xf]  ;;  %v7090_v60 = vld [vmem:[%s7197_s25 + $0x3c] sm:$0xff]  }
  0x18   : > { %v2509_v39 = vor.u32 %v2508_v33, %v2504_v32  ;;  %v2522_v44 = vrot.slane %v2520_v36, 5  ;;  %v2528_v45 = vrot.slane %v2526_v37, 5  ;;  %v5932_v53 = vld [vmem:[%s7197_s25 + $0x2c] sm:$0x1]  ;;  %v2541_v54 = vshrl.u32 %v5930_v46, 16 }
  0x19   : > { %v2500_v47 = vrot.slane %v2499_v38, 4  ;;  %v2532_v49 = vrot.slane %v2530_v40, 4  ;;  %v2538_v50 = vrot.slane %v2536_v41, 5  ;;  %v2544_v55 = vshll.u32 %v5930_v46, 16  ;;  %v5933_v62 = vld [vmem:[%s7197_s25 + $0x30] sm:$0xf] }
  0x1a   : > { %v2510_v48 = vrot.slane %v2509_v39, 4  ;;  %v2523_v52 = vor.u32 %v2522_v44, %v2519_v35  ;;  %v2550_v56 = vshll.u32 %v5931_v51, 16  ;;  %v2554_v61 = vshrl.u32 %v5931_v51, 16  ;;  %v5934_v63 = vld [vmem:[%s7197_s25 + $0x34] sm:$0xf]  ;;  %v7091_v7 = vld [vmem:[%s7197_s25 + $0x48] sm:$0xff]  }
  0x1b   : > { %6509 = vmatmul.mubr.msk.bf16.gmra.mrb[4].mxu1 %vm349_vm1, %v7088_v20  ;;  %v2505_v57 = vsel %vm7244_vm4, %v2500_v47, %v2504_v32  ;;  %v2533_v59 = vor.u32 %v2532_v49, %v2528_v45  ;;  %v2543_v2 = vrot.slane %v2541_v54, 4  ;;  %v2546_v3 = vrot.slane %v2544_v55, 5  ;;  %v5935_v5 = vld [vmem:[%s7197_s25 + $0x38] sm:$0x1]  ;;  %v5936_v25 = vld [vmem:[%s7197_s25 + $0x3c] sm:$0xf] }
  0x1c   : > { %6512 = vmatprep.mubr.msk.bf16.mxu1 %vm349_vm1, %v7089_v42  ;;  %v2515_v58 = vsel %vm7244_vm4, %v2510_v48, %v2514_v34  ;;  %v2524_v1 = vrot.slane %v2523_v52, 4  ;;  %v2552_v10 = vrot.slane %v2550_v56, 5  ;;  %v2556_v11 = vrot.slane %v2554_v61, 4  ;;  %v5937_v30 = vld [vmem:[%s7197_s25 + $0x40] sm:$0xf]  ;;  %v7092_v49 = vld [vmem:[%s7197_s25 + $0x54] sm:$0xff]  }
  0x1d   : > { %v5973_v0 = vcombine.low %v2505_v57, %v2515_v58  ;;  %v2534_v9 = vrot.slane %v2533_v59, 4  ;;  %v2560_v13 = vshll.u32 %v5932_v53, 16  ;;  %v2547_v18 = vor.u32 %v2546_v3, %v2543_v2  ;;  %v5938_v37 = vld [vmem:[%s7197_s25 + $0x44] sm:$0x1]  ;;  %v5939_v40 = vld [vmem:[%s7197_s25 + $0x48] sm:$0xf] }
  0x1e   : > { %v2529_v17 = vsel %vm7244_vm4, %v2524_v1, %v2528_v45  ;;  %v2565_v19 = vshrl.u32 %v5933_v62, 16  ;;  %v2568_v20 = vshll.u32 %v5933_v62, 16  ;;  %v2557_v22 = vor.u32 %v2556_v11, %v2552_v10  ;;  %v5940_v46 = vld [vmem:[%s7197_s25 + $0x4c] sm:$0xf]  ;;  %v5941_v52 = vld [vmem:[%s7197_s25 + $0x50] sm:$0x1] }
  0x1f   : > { %6640 = vmatprep.mubr.msk.bf16.mxu0 %vm349_vm1, %v5973_v0  ;;  %v2539_v21 = vsel %vm7244_vm4, %v2534_v9, %v2538_v50  ;;  %v2562_v23 = vrot.slane %v2560_v13, 5  ;;  %v2574_v24 = vshll.u32 %v5934_v63, 16  ;;  %v2548_v27 = vrot.slane %v2547_v18, 4  ;;  %v7093_v56 = vld [vmem:[%s7197_s25 + $0x60] sm:$0xff]   ;;  %v5943_v13 = vld [vmem:[%s7197_s25 + $0x58] sm:$0xf] }
  0x20   : > { %v5974_v26 = vcombine.low %v2529_v17, %v2539_v21  ;;  %v2567_v28 = vrot.slane %v2565_v19, 4  ;;  %v2570_v29 = vrot.slane %v2568_v20, 5  ;;  %v2558_v31 = vrot.slane %v2557_v22, 4  ;;  %v5944_v21 = vld [vmem:[%s7197_s25 + $0x5c] sm:$0x1] }
  0x21   : > { %v2576_v32 = vrot.slane %v2574_v24, 5  ;;  %v2578_v33 = vshrl.u32 %v5934_v63, 16  ;;  %v2584_v34 = vshll.u32 %v5935_v5, 16  ;;  %v2553_v35 = vsel %vm7244_vm4, %v2548_v27, %v2552_v10  ;;  %v5942_v5 = vld [vmem:[%s7197_s25 + $0x54] sm:$0xf] }
  0x22   : > { %6641 = vmatmul.mubr.msk.bf16.vlgmr.msra.gmra.mrb[0].mxu0 %vm349_vm1, %v5974_v26  ;;  %v2571_v36 = vor.u32 %v2570_v29, %v2567_v28  ;;  %v2589_v38 = vshrl.u32 %v5936_v25, 16  ;;  %v2592_v39 = vshll.u32 %v5936_v25, 16  ;;  %v2563_v41 = vsel %vm7244_vm4, %v2558_v31, %v2562_v23  ;;  %v5945_v22 = vld [vmem:[%s7197_s25 + $0x60] sm:$0xf]  ;;  %v5946_v27 = vld [vmem:[%s7197_s25 + $0x64] sm:$0xf] }
  0x23   : > { %6513 = vmatmul.mubr.msk.bf16.gmra.mrb[8].mxu1 %vm349_vm1, %v7090_v60  ;;  %6673 = vmatpush3.bf16.msra.mxu0 %v7216_v12  ;;  %v2580_v42 = vrot.slane %v2578_v33, 4  ;;  %v2586_v44 = vrot.slane %v2584_v34, 5  ;;  %v2598_v45 = vshll.u32 %v5937_v30, 16  ;;  %v5975_v47 = vcombine.low %v2553_v35, %v2563_v41 }
  0x24   : > { %6516 = vmatprep.mubr.msk.bf16.mxu1 %vm349_vm1, %v7091_v7  ;;  %v2572_v48 = vrot.slane %v2571_v36, 4  ;;  %v2591_v50 = vrot.slane %v2589_v38, 4  ;;  %v2594_v51 = vrot.slane %v2592_v39, 5  ;;  %7073 = vmatprep.subr.msk.bf16.mxu0 %vm398_vm0, %v7202_v6  ;;  %v2602_v12 = vshrl.u32 %v5937_v30, 16  ;;  %v7094_v30 = vld [vmem:[%s7197_s25 + $0x6c] sm:$0xff]   ;;  %v7095_v38 = vld [vmem:[%s7197_s25 + $0x78] sm:$0xff]  }
  0x25   : > { %v2581_v53 = vor.u32 %v2580_v42, %v2576_v32  ;;  %v2600_v54 = vrot.slane %v2598_v45, 5  ;;  %v2608_v55 = vshll.u32 %v5938_v37, 16  ;;  %6644 = vmatprep.mubr.msk.bf16.mxu0 %vm349_vm1, %v5975_v47  ;;  %v2613_v59 = vshrl.u32 %v5939_v40, 16  ;;  %v5947_v37 = vld [vmem:[%s7197_s25 + $0x68] sm:$0x1] }
  0x26   : > { %v2577_v57 = vsel %vm7244_vm4, %v2572_v48, %v2576_v32  ;;  %v2595_v58 = vor.u32 %v2594_v51, %v2591_v50  ;;  %v2616_v60 = vshll.u32 %v5939_v40, 16  ;;  %v2604_v62 = vrot.slane %v2602_v12, 4 }
  0x27   : > { %v2582_v61 = vrot.slane %v2581_v53, 4  ;;  %v2610_v63 = vrot.slane %v2608_v55, 5  ;;  %v2622_v0 = vshll.u32 %v5940_v46, 16  ;;  %v2615_v1 = vrot.slane %v2613_v59, 4  ;;  %v6009_v59 = vld [vmem:[%s7197_s25 + $0x1c] sm:$0xf] }
  0x28   : > { %v2596_v6 = vrot.slane %v2595_v58, 4  ;;  %v2618_v2 = vrot.slane %v2616_v60, 5  ;;  %v2626_v3 = vshrl.u32 %v5940_v46, 16  ;;  %v2605_v9 = vor.u32 %v2604_v62, %v2600_v54  ;;  %v6008_v58 = vld [vmem:[%s7197_s25 + $0x18] sm:$0xe] }
  0x29   : > { %v2587_v7 = vsel %vm7244_vm4, %v2582_v61, %v2586_v44  ;;  %v2624_v10 = vrot.slane %v2622_v0, 5  ;;  %v2632_v11 = vshll.u32 %v5941_v52, 16  ;;  %v2637_v25 = vshrl.u32 %v5942_v5, 16  ;;  %v6005_v44 = vld [vmem:[%s7197_s25 + $0xc] sm:$0xe] }
  0x2a   : > { %v5976_v17 = vcombine.low %v2577_v57, %v2587_v7  ;;  %v2601_v18 = vsel %vm7244_vm4, %v2596_v6, %v2600_v54  ;;  %v2619_v19 = vor.u32 %v2618_v2, %v2615_v1  ;;  %v2628_v20 = vrot.slane %v2626_v3, 4  ;;  %v6007_v54 = vld [vmem:[%s7197_s25 + $0x14] sm:$0x1]  ;;  %v6010_v6 = vld [vmem:[%s7197_s25 + $0x20] sm:$0x1]  ;;  %v7096_v3 = vld [vmem:[%s7197_s25 + $0x84] sm:$0xff]  }
  0x2b   : > { %6517 = vmatmul.mubr.msk.bf16.gmra.mrb[12].mxu1 %vm349_vm1, %v7092_v49  ;;  %v2606_v23 = vrot.slane %v2605_v9, 4  ;;  %v2634_v24 = vrot.slane %v2632_v11, 5  ;;  %v2640_v26 = vshll.u32 %v5942_v5, 16  ;;  %v2646_v31 = vshll.u32 %v5943_v13, 16  ;;  %v6006_v49 = vld [vmem:[%s7197_s25 + $0x10] sm:$0xf] }
  0x2c   : > { %6520 = vmatprep.mubr.msk.bf16.mxu1 %vm349_vm1, %v7093_v56  ;;  %6645 = vmatmul.mubr.msk.bf16.gmra.mrb[4].mxu0 %vm349_vm1, %v5976_v17  ;;  %v2620_v28 = vrot.slane %v2619_v19, 4  ;;  %v2629_v29 = vor.u32 %v2628_v20, %v2624_v10  ;;  %v2650_v32 = vshrl.u32 %v5943_v13, 16  ;;  %v2639_v34 = vrot.slane %v2637_v25, 4 }
  0x2d   : > { %v2611_v33 = vsel %vm7244_vm4, %v2606_v23, %v2610_v63  ;;  %v2642_v35 = vrot.slane %v2640_v26, 5  ;;  %v2656_v36 = vshll.u32 %v5944_v21, 16  ;;  %v2648_v42 = vrot.slane %v2646_v31, 5  ;;  %v6011_v21 = vld [vmem:[%s7197_s25 + $0x24] sm:$0xe]  ;;  %v7097_v26 = vld [vmem:[%s7197_s25 + $0x90] sm:$0xff]  }
  0x2e   : > { %v5977_v39 = vcombine.low %v2601_v18, %v2611_v33  ;;  %v2625_v40 = vsel %vm7244_vm4, %v2620_v28, %v2624_v10  ;;  %v2630_v41 = vrot.slane %v2629_v29, 4  ;;  %v2652_v46 = vrot.slane %v2650_v32, 4 }
  0x2f   : > { %v2643_v45 = vor.u32 %v2642_v35, %v2639_v34  ;;  %v2658_v47 = vrot.slane %v2656_v36, 5  ;;  %v2661_v48 = vshrl.u32 %v5945_v22, 16  ;;  %v2664_v51 = vshll.u32 %v5945_v22, 16  ;;  %v6014_v36 = vld [vmem:[%s7197_s25 + $0x30] sm:$0xe] }
  0x30   : > { %6648 = vmatprep.mubr.msk.bf16.mxu0 %vm349_vm1, %v5977_v39  ;;  %v2635_v50 = vsel %vm7244_vm4, %v2630_v41, %v2634_v24  ;;  %v2670_v52 = vshll.u32 %v5946_v27, 16  ;;  %v2674_v53 = vshrl.u32 %v5946_v27, 16  ;;  %v2653_v56 = vor.u32 %v2652_v46, %v2648_v42  ;;  %v6012_v27 = vld [vmem:[%s7197_s25 + $0x28] sm:$0xf] }
  0x31   : > { %v5978_v12 = vcombine.low %v2625_v40, %v2635_v50  ;;  %v2644_v55 = vrot.slane %v2643_v45, 4  ;;  %v2663_v57 = vrot.slane %v2661_v48, 4  ;;  %v2666_v60 = vrot.slane %v2664_v51, 5  ;;  %v6017_v50 = vld [vmem:[%s7197_s25 + $0x3c] sm:$0xe] }
  0x32   : > { %v2672_v61 = vrot.slane %v2670_v52, 5  ;;  %v2676_v62 = vrot.slane %v2674_v53, 4  ;;  %v2680_v63 = vshll.u32 %v5947_v37, 16  ;;  %v2654_v2 = vrot.slane %v2653_v56, 4  ;;  %v6015_v37 = vld [vmem:[%s7197_s25 + $0x34] sm:$0xf] }
  0x33   : > { %6521 = vmatmul.mubr.msk.bf16.gmra.mrb[16].mxu1 %vm349_vm1, %v7094_v30  ;;  %v2649_v1 = vsel %vm7244_vm4, %v2644_v55, %v2648_v42  ;;  %v6053_v5 = vrot.slane %v6005_v44, 9  ;;  %v3332_v7 = vrot.slane %v6006_v49, 5  ;;  %v2667_v9 = vor.u32 %v2666_v60, %v2663_v57  ;;  %v6013_v30 = vld [vmem:[%s7197_s25 + $0x2c] sm:$0x1]  ;;  %v6018_v51 = vld [vmem:[%s7197_s25 + $0x40] sm:$0xf] }
  0x34   : > { %6524 = vmatprep.mubr.msk.bf16.mxu1 %vm349_vm1, %v7095_v38  ;;  %6649 = vmatmul.mubr.msk.bf16.gmra.mrb[8].mxu0 %vm349_vm1, %v5978_v12  ;;  %v2677_v10 = vor.u32 %v2676_v62, %v2672_v61  ;;  %v2682_v11 = vrot.slane %v2680_v63, 5  ;;  %v3335_v13 = vrot.slane %v6007_v54, 5  ;;  %v2659_v17 = vsel %vm7244_vm4, %v2654_v2, %v2658_v47  ;;  %v6016_v38 = vld [vmem:[%s7197_s25 + $0x38] sm:$0x1]  ;;  %v7098_v52 = vld [vmem:[%s7197_s25 + $0x9c] sm:$0xff]  }
  0x35   : > { %v3333_v18 = vsel %vm7319_vm7, %v6053_v5, %v3332_v7  ;;  %v3334_v19 = vrot.slane %v3332_v7, 4  ;;  %v6054_v20 = vrot.slane %v6008_v58, 9  ;;  %v5979_v22 = vcombine.low %v2649_v1, %v2659_v17  ;;  %v6019_v55 = vld [vmem:[%s7197_s25 + $0x44] sm:$0x1]  ;;  %v6020_v56 = vld [vmem:[%s7197_s25 + $0x48] sm:$0xe] }
  0x36   : > { %v2668_v23 = vrot.slane %v2667_v9, 4  ;;  %v2678_v24 = vrot.slane %v2677_v10, 4  ;;  %v3339_v25 = vrot.slane %v6009_v59, 5  ;;  %v3342_v29 = vrot.slane %v6010_v6, 5  ;;  %v7099_v58 = vld [vmem:[%s7197_s25 + $0xa8] sm:$0xff]  }
  0x37   : > { %v3336_v28 = vsel %vm7319_vm7, %v3334_v19, %v3335_v13  ;;  %v6055_v31 = vrot.slane %v6011_v21, 9  ;;  %v3346_v32 = vrot.slane %v6012_v27, 5  ;;  %6652 = vmatprep.mubr.msk.bf16.mxu0 %vm349_vm1, %v5979_v22  ;;  %v3349_v44 = vrot.slane %v6013_v30, 5  ;;  %v6021_v62 = vld [vmem:[%s7197_s25 + $0x4c] sm:$0xf] }
  0x38   : > { %v2673_v33 = vsel %vm7244_vm4, %v2668_v23, %v2672_v61  ;;  %v2683_v34 = vsel %vm7244_vm4, %v2678_v24, %v2682_v11  ;;  %v6070_v35 = vcombine.low %v3333_v18, %v3336_v28  ;;  %v3340_v40 = vsel %vm7319_vm7, %v6054_v20, %v3339_v25  ;;  %v6022_v1 = vld [vmem:[%s7197_s25 + $0x50] sm:$0x1]  ;;  %v627_v5 = vld [vmem:[%s7197_s25] sm:$0xf]  ;;  %v628_v13 = vld [vmem:[%s7197_s25 + $0x4] sm:$0xf] }
  0x39   : > { %v5980_v39 = vcombine.low %v2673_v33, %v2683_v34  ;;  %v3341_v41 = vrot.slane %v3339_v25, 4  ;;  %v3348_v42 = vrot.slane %v3346_v32, 4  ;;  %v6056_v45 = vrot.slane %v6014_v36, 9  ;;  %v629_v17 = vld [vmem:[%s7197_s25 + $0x8] sm:$0x1] }
  0x3a   : > { %v3353_v46 = vrot.slane %v6015_v37, 5  ;;  %v3356_v47 = vrot.slane %v6016_v38, 5  ;;  %v3347_v49 = vsel %vm7319_vm7, %v6055_v31, %v3346_v32  ;;  %v6057_v59 = vrot.slane %v6017_v50, 9  ;;  %v630_v22 = vld [vmem:[%s7197_s25 + $0xc] sm:$0xf] }
  0x3b   : > { %6525 = vmatmul.mubr.msk.bf16.gmra.mrb[20].mxu1 %vm349_vm1, %v7096_v3  ;;  %v3343_v48 = vsel %vm7319_vm7, %v3341_v41, %v3342_v29  ;;  %v3350_v53 = vsel %vm7319_vm7, %v3348_v42, %v3349_v44  ;;  %v3360_v60 = vrot.slane %v6018_v51, 5  ;;  %v3363_v61 = vrot.slane %v6019_v55, 5  ;;  %v631_v27 = vld [vmem:[%s7197_s25 + $0x10] sm:$0xf]  ;;  %v632_v32 = vld [vmem:[%s7197_s25 + $0x14] sm:$0x1] }
  0x3c   : > { %6528 = vmatprep.mubr.msk.bf16.mxu1 %vm349_vm1, %v7097_v26  ;;  %6653 = vmatmul.mubr.msk.bf16.gmra.mrb[12].mxu0 %vm349_vm1, %v5980_v39  ;;  %v7362_v54 = vsel %vm7319_vm7, %v6056_v45, %v3353_v46  ;;  %v3355_v12 = vrot.slane %v3353_v46, 4  ;;  %v6071_v57 = vcombine.low %v3340_v40, %v3343_v48  ;;  %v6072_v63 = vcombine.low %v3347_v49, %v3350_v53  ;;  %v6023_v33 = vld [vmem:[%s7197_s25 + $0x54] sm:$0xe]  ;;  %v6024_v38 = vld [vmem:[%s7197_s25 + $0x58] sm:$0xf] }
  0x3d   : > { %6674 = vmatprep.mubr.msk.bf16.mxu0 %vm349_vm1, %v6070_v35  ;;  %v6058_v2 = vrot.slane %v6020_v56, 9  ;;  %v3367_v3 = vrot.slane %v6021_v62, 5  ;;  %v7379_v9 = vsel %vm7319_vm7, %v6057_v59, %v3360_v60  ;;  %v3362_v10 = vrot.slane %v3360_v60, 4  ;;  %v6025_v44 = vld [vmem:[%s7197_s25 + $0x5c] sm:$0x1]  ;;  %v7100_v45 = vld [vmem:[%s7197_s25 + $0xb4] sm:$0xff]  }
  0x3e   : > { %v7371_v6 = vsel %vm7319_vm7, %v3355_v12, %v3356_v47  ;;  %v3370_v11 = vrot.slane %v6022_v1, 5  ;;  %v711_v20 = vshrl.u32 %v627_v5, 16  ;;  %v714_v21 = vshll.u32 %v627_v5, 16  ;;  %v6026_v50 = vld [vmem:[%s7197_s25 + $0x60] sm:$0xe] }
  0x3f   : > { %v6073_v7 = vcombine.low %v7362_v54, %v7371_v6  ;;  %v7385_v18 = vsel %vm7319_vm7, %v6058_v2, %v3367_v3  ;;  %v3369_v19 = vrot.slane %v3367_v3, 4  ;;  %v7391_v23 = vsel %vm7319_vm7, %v3362_v10, %v3363_v61  ;;  %v6027_v55 = vld [vmem:[%s7197_s25 + $0x64] sm:$0xf]  ;;  %v6028_v59 = vld [vmem:[%s7197_s25 + $0x68] sm:$0x1] }
  0x40   : > { %v720_v24 = vshll.u32 %v628_v13, 16  ;;  %v724_v25 = vshrl.u32 %v628_v13, 16  ;;  %v730_v26 = vshll.u32 %v629_v17, 16  ;;  %v6074_v28 = vcombine.low %v7379_v9, %v7391_v23  ;;  %v633_v1 = vld [vmem:[%s7197_s25 + $0x18] sm:$0xf] }
  0x41   : > { %v7399_v29 = vsel %vm7319_vm7, %v3369_v19, %v3370_v11  ;;  %v713_v30 = vrot.slane %v711_v20, 4  ;;  %v716_v31 = vrot.slane %v714_v21, 5  ;;  %v735_v40 = vshrl.u32 %v630_v22, 16  ;;  %v634_v19 = vld [vmem:[%s7197_s25 + $0x1c] sm:$0xf] }
  0x42   : > { %v6075_v34 = vcombine.low %v7385_v18, %v7399_v29  ;;  %v722_v35 = vrot.slane %v720_v24, 5  ;;  %v726_v36 = vrot.slane %v724_v25, 4  ;;  %v732_v37 = vrot.slane %v730_v26, 5  ;;  %v638_v9 = vld [vmem:[%s7197_s25 + $0x2c] sm:$0x1] }
  0x43   : > { %6529 = vmatmul.mubr.msk.bf16.gmra.mrb[24].mxu1 %vm349_vm1, %v7098_v52  ;;  %v717_v39 = vor.u32 %v716_v31, %v713_v30  ;;  %v738_v41 = vshll.u32 %v630_v22, 16  ;;  %v744_v42 = vshll.u32 %v631_v27, 16  ;;  %v748_v47 = vshrl.u32 %v631_v27, 16  ;;  %v635_v22 = vld [vmem:[%s7197_s25 + $0x20] sm:$0x1] }
  0x44   : > { %6532 = vmatprep.mubr.msk.bf16.mxu1 %vm349_vm1, %v7099_v58  ;;  %6675 = vmatmul.mubr.msk.bf16.vlgmr.msra.gmra.mrb[0].mxu0 %vm349_vm1, %v6071_v57  ;;  %v727_v46 = vor.u32 %v726_v36, %v722_v35  ;;  %v754_v48 = vshll.u32 %v632_v32, 16  ;;  %v6059_v49 = vrot.slane %v6023_v33, 9  ;;  %v737_v52 = vrot.slane %v735_v40, 4  ;;  %v636_v32 = vld [vmem:[%s7197_s25 + $0x24] sm:$0xf] }
  0x45   : > { %6707 = vmatpush3.bf16.msra.mxu0 %v7222_v14  ;;  %6678 = vmatprep.mubr.msk.bf16.mxu0 %vm349_vm1, %v6072_v63  ;;  %v718_v51 = vrot.slane %v717_v39, 4  ;;  %v740_v53 = vrot.slane %v738_v41, 5  ;;  %v746_v12 = vrot.slane %v744_v42, 5  ;;  %v750_v14 = vrot.slane %v748_v47, 4  ;;  %v6029_v23 = vld [vmem:[%s7197_s25 + $0x6c] sm:$0xe] }
  0x46   : > { %7074 = vmatprep.subr.msk.bf16.mxu0 %vm398_vm0, %v7210_v8  ;;  %v728_v56 = vrot.slane %v727_v46, 4  ;;  %v756_v57 = vrot.slane %v754_v48, 5  ;;  %v3374_v58 = vrot.slane %v6024_v38, 5  ;;  %v3377_v62 = vrot.slane %v6025_v44, 5  ;;  %v6030_v44 = vld [vmem:[%s7197_s25 + $0x70] sm:$0xf] }
  0x47   : > { %v723_v60 = vsel %vm7244_vm4, %v718_v51, %v722_v35  ;;  %v741_v61 = vor.u32 %v740_v53, %v737_v52  ;;  %v6060_v63 = vrot.slane %v6026_v50, 9  ;;  %v751_v8 = vor.u32 %v750_v14, %v746_v12  ;;  %v637_v35 = vld [vmem:[%s7197_s25 + $0x28] sm:$0xf]  ;;  %v6032_v50 = vld [vmem:[%s7197_s25 + $0x78] sm:$0xe] }
  0x48   : > { %v733_v2 = vsel %vm7244_vm4, %v728_v56, %v732_v37  ;;  %v7424_v3 = vsel %vm7319_vm7, %v6059_v49, %v3374_v58  ;;  %v3376_v5 = vrot.slane %v3374_v58, 4  ;;  %v3381_v13 = vrot.slane %v6027_v55, 5  ;;  %v6033_v55 = vld [vmem:[%s7197_s25 + $0x7c] sm:$0xf] }
  0x49   : > { %v5778_v10 = vcombine.low %v723_v60, %v733_v2  ;;  %v742_v11 = vrot.slane %v741_v61, 4  ;;  %v3384_v17 = vrot.slane %v6028_v59, 5  ;;  %v752_v20 = vrot.slane %v751_v8, 4  ;;  %v6034_v59 = vld [vmem:[%s7197_s25 + $0x80] sm:$0x1] }
  0x4a   : > { %v3378_v21 = vsel %vm7319_vm7, %v3376_v5, %v3377_v62  ;;  %v759_v24 = vshrl.u32 %v633_v1, 16  ;;  %v762_v25 = vshll.u32 %v633_v1, 16  ;;  %v7440_v30 = vsel %vm7319_vm7, %v6060_v63, %v3381_v13  ;;  %v639_v1 = vld [vmem:[%s7197_s25 + $0x30] sm:$0xf] }
  0x4b   : > { %6533 = vmatmul.mubr.msk.bf16.gmra.mrb[28].mxu1 %vm349_vm1, %v7100_v45  ;;  %v747_v26 = vsel %vm7244_vm4, %v742_v11, %v746_v12  ;;  %v6076_v27 = vcombine.low %v7424_v3, %v3378_v21  ;;  %v3383_v31 = vrot.slane %v3381_v13, 4  ;;  %v757_v54 = vsel %vm7244_vm4, %v752_v20, %v756_v57  ;;  %v6031_v45 = vld [vmem:[%s7197_s25 + $0x74] sm:$0x1] }
  0x4c   : > { %6679 = vmatmul.mubr.msk.bf16.gmra.mrb[4].mxu0 %vm349_vm1, %v6073_v7  ;;  %6538 = vmatprep.mubr.msk.bf16.mxu1 %vm349_vm1, %v5778_v10  ;;  %v761_v6 = vrot.slane %v759_v24, 4  ;;  %v764_v7 = vrot.slane %v762_v25, 5  ;;  %v768_v33 = vshll.u32 %v634_v19, 16  ;;  %v5779_v36 = vcombine.low %v747_v26, %v757_v54  ;;  %v641_v25 = vld [vmem:[%s7197_s25 + $0x38] sm:$0x1] }
  0x4d   : > { %6682 = vmatprep.mubr.msk.bf16.mxu0 %vm349_vm1, %v6074_v28  ;;  %v7452_v37 = vsel %vm7319_vm7, %v3383_v31, %v3384_v17  ;;  %v772_v38 = vshrl.u32 %v634_v19, 16  ;;  %v778_v39 = vshll.u32 %v635_v22, 16  ;;  %v783_v42 = vshrl.u32 %v636_v32, 16  ;;  %v642_v26 = vld [vmem:[%s7197_s25 + $0x3c] sm:$0xf] }
  0x4e   : > { %v6077_v28 = vcombine.low %v7440_v30, %v7452_v37  ;;  %v765_v40 = vor.u32 %v764_v7, %v761_v6  ;;  %v770_v41 = vrot.slane %v768_v33, 5  ;;  %v786_v48 = vshll.u32 %v636_v32, 16 }
  0x4f   : > { %v774_v46 = vrot.slane %v772_v38, 4  ;;  %v780_v47 = vrot.slane %v778_v39, 5  ;;  %v792_v49 = vshll.u32 %v637_v35, 16  ;;  %v785_v52 = vrot.slane %v783_v42, 4 }
  0x50   : > { %v766_v51 = vrot.slane %v765_v40, 4  ;;  %v796_v53 = vshrl.u32 %v637_v35, 16  ;;  %v802_v12 = vshll.u32 %v638_v9, 16  ;;  %v788_v14 = vrot.slane %v786_v48, 5 }
  0x51   : > { %v775_v56 = vor.u32 %v774_v46, %v770_v41  ;;  %v794_v57 = vrot.slane %v792_v49, 5  ;;  %v6061_v58 = vrot.slane %v6029_v23, 9  ;;  %v3388_v63 = vrot.slane %v6030_v44, 5  ;;  %v644_v23 = vld [vmem:[%s7197_s25 + $0x44] sm:$0x1] }
  0x52   : > { %v771_v60 = vsel %vm7244_vm4, %v766_v51, %v770_v41  ;;  %v798_v61 = vrot.slane %v796_v53, 4  ;;  %v804_v62 = vrot.slane %v802_v12, 5  ;;  %v789_v8 = vor.u32 %v788_v14, %v785_v52  ;;  %v6035_v41 = vld [vmem:[%s7197_s25 + $0x84] sm:$0xe] }
  0x53   : > { %6539 = vmatmul.mubr.msk.bf16.vlgmr.msra.gmra.mrb[0].mxu1 %vm349_vm1, %v5779_v36  ;;  %v776_v2 = vrot.slane %v775_v56, 4  ;;  %v3391_v3 = vrot.slane %v6031_v45, 5  ;;  %v6062_v5 = vrot.slane %v6032_v50, 9  ;;  %v3389_v10 = vsel %vm7319_vm7, %v6061_v58, %v3388_v63  ;;  %v643_v36 = vld [vmem:[%s7197_s25 + $0x40] sm:$0xf] }
  0x54   : > { %6571 = vmatpush3.bf16.msra.mxu1 %v7226_v15  ;;  %6683 = vmatmul.mubr.msk.bf16.gmra.mrb[8].mxu0 %vm349_vm1, %v6075_v34  ;;  %v799_v15 = vor.u32 %v798_v61, %v794_v57  ;;  %v3390_v11 = vrot.slane %v3388_v63, 4  ;;  %v3395_v13 = vrot.slane %v6033_v55, 5  ;;  %v790_v18 = vrot.slane %v789_v8, 4  ;;  %v640_v34 = vld [vmem:[%s7197_s25 + $0x34] sm:$0xf] }
  0x55   : > { %6686 = vmatprep.mubr.msk.bf16.mxu0 %vm349_vm1, %v6076_v27  ;;  %v781_v17 = vsel %vm7244_vm4, %v776_v2, %v780_v47  ;;  %v3398_v29 = vrot.slane %v6034_v59, 5  ;;  %v807_v19 = vshrl.u32 %v639_v1, 16  ;;  %v810_v7 = vshll.u32 %v639_v1, 16  ;;  %v6036_v47 = vld [vmem:[%s7197_s25 + $0x88] sm:$0xf] }
  0x56   : > { %v5780_v20 = vcombine.low %v771_v60, %v781_v17  ;;  %v800_v21 = vrot.slane %v799_v15, 4  ;;  %v3392_v22 = vsel %vm7319_vm7, %v3390_v11, %v3391_v3  ;;  %v7482_v24 = vsel %vm7319_vm7, %v6062_v5, %v3395_v13  ;;  %v6037_v56 = vld [vmem:[%s7197_s25 + $0x8c] sm:$0x1]  ;;  %v6040_v3 = vld [vmem:[%s7197_s25 + $0x98] sm:$0x1] }
  0x57   : > { %v795_v27 = vsel %vm7244_vm4, %v790_v18, %v794_v57  ;;  %v6078_v31 = vcombine.low %v3389_v10, %v3392_v22  ;;  %v3397_v32 = vrot.slane %v3395_v13, 4  ;;  %v809_v54 = vrot.slane %v807_v19, 4  ;;  %v6038_v57 = vld [vmem:[%s7197_s25 + $0x90] sm:$0xe]  ;;  %v645_v5 = vld [vmem:[%s7197_s25 + $0x48] sm:$0xf] }
  0x58   : > { %6542 = vmatprep.mubr.msk.bf16.mxu1 %vm349_vm1, %v5780_v20  ;;  %v805_v6 = vsel %vm7244_vm4, %v800_v21, %v804_v62  ;;  %v816_v33 = vshll.u32 %v640_v34, 16  ;;  %v820_v35 = vshrl.u32 %v640_v34, 16  ;;  %v826_v9 = vshll.u32 %v641_v25, 16  ;;  %v6039_v62 = vld [vmem:[%s7197_s25 + $0x94] sm:$0xf] }
  0x59   : > { %v5781_v38 = vcombine.low %v795_v27, %v805_v6  ;;  %v3399_v39 = vsel %vm7319_vm7, %v3397_v32, %v3398_v29  ;;  %v831_v40 = vshrl.u32 %v642_v26, 16  ;;  %v812_v44 = vrot.slane %v810_v7, 5  ;;  %v646_v19 = vld [vmem:[%s7197_s25 + $0x4c] sm:$0xf] }
  0x5a   : > { %v6079_v42 = vcombine.low %v7482_v24, %v3399_v39  ;;  %v818_v45 = vrot.slane %v816_v33, 5  ;;  %v822_v46 = vrot.slane %v820_v35, 4  ;;  %v828_v48 = vrot.slane %v826_v9, 5  ;;  %v647_v24 = vld [vmem:[%s7197_s25 + $0x50] sm:$0x1] }
  0x5b   : > { %6543 = vmatmul.mubr.msk.bf16.gmra.mrb[4].mxu1 %vm349_vm1, %v5781_v38  ;;  %v833_v49 = vrot.slane %v831_v40, 4  ;;  %v834_v50 = vshll.u32 %v642_v26, 16  ;;  %v840_v51 = vshll.u32 %v643_v36, 16  ;;  %v813_v52 = vor.u32 %v812_v44, %v809_v54  ;;  %v648_v54 = vld [vmem:[%s7197_s25 + $0x54] sm:$0xf] }
  0x5c   : > { %6687 = vmatmul.mubr.msk.bf16.gmra.mrb[12].mxu0 %vm349_vm1, %v6077_v28  ;;  %v823_v53 = vor.u32 %v822_v46, %v818_v45  ;;  %v844_v12 = vshrl.u32 %v643_v36, 16  ;;  %v850_v55 = vshll.u32 %v644_v23, 16  ;;  %v6063_v28 = vrot.slane %v6035_v41, 9  ;;  %v649_v36 = vld [vmem:[%s7197_s25 + $0x58] sm:$0xf] }
  0x5d   : > { %6690 = vmatprep.mubr.msk.bf16.mxu0 %vm349_vm1, %v6078_v31  ;;  %v836_v30 = vrot.slane %v834_v50, 5  ;;  %v842_v37 = vrot.slane %v840_v51, 5  ;;  %v3402_v14 = vrot.slane %v6036_v47, 5  ;;  %v814_v58 = vrot.slane %v813_v52, 4  ;;  %v650_v40 = vld [vmem:[%s7197_s25 + $0x5c] sm:$0x1] }
  0x5e   : > { %v824_v59 = vrot.slane %v823_v53, 4  ;;  %v846_v60 = vrot.slane %v844_v12, 4  ;;  %v852_v61 = vrot.slane %v850_v55, 5  ;;  %v3405_v8 = vrot.slane %v6037_v56, 5  ;;  %v6041_v41 = vld [vmem:[%s7197_s25 + $0x9c] sm:$0xe] }
  0x5f   : > { %v837_v63 = vor.u32 %v836_v30, %v833_v49  ;;  %v3403_v1 = vsel %vm7319_vm7, %v6063_v28, %v3402_v14  ;;  %v3404_v2 = vrot.slane %v3402_v14, 4  ;;  %v819_v15 = vsel %vm7244_vm4, %v814_v58, %v818_v45  ;;  %v6042_v47 = vld [vmem:[%s7197_s25 + $0xa0] sm:$0xf]  ;;  %v6043_v52 = vld [vmem:[%s7197_s25 + $0xa4] sm:$0x1] }
  0x60   : > { %v829_v10 = vsel %vm7244_vm4, %v824_v59, %v828_v48  ;;  %v847_v11 = vor.u32 %v846_v60, %v842_v37  ;;  %v6064_v13 = vrot.slane %v6038_v57, 9  ;;  %v3409_v34 = vrot.slane %v6039_v62, 5  ;;  %v6044_v30 = vld [vmem:[%s7197_s25 + $0xa8] sm:$0xe]  ;;  %v6045_v58 = vld [vmem:[%s7197_s25 + $0xac] sm:$0xf] }
  0x61   : > { %v5782_v17 = vcombine.low %v819_v15, %v829_v10  ;;  %v838_v18 = vrot.slane %v837_v63, 4  ;;  %v3406_v29 = vsel %vm7319_vm7, %v3404_v2, %v3405_v8  ;;  %v3412_v22 = vrot.slane %v6040_v3, 5  ;;  %v6046_v63 = vld [vmem:[%s7197_s25 + $0xb0] sm:$0x1]  ;;  %v652_v15 = vld [vmem:[%s7197_s25 + $0x64] sm:$0xf] }
  0x62   : > { %v848_v20 = vrot.slane %v847_v11, 4  ;;  %v6080_v21 = vcombine.low %v3403_v1, %v3406_v29  ;;  %v855_v25 = vshrl.u32 %v645_v5, 16  ;;  %v3410_v27 = vsel %vm7319_vm7, %v6064_v13, %v3409_v34 }
  0x63   : > { %6546 = vmatprep.mubr.msk.bf16.mxu1 %vm349_vm1, %v5782_v17  ;;  %v843_v26 = vsel %vm7244_vm4, %v838_v18, %v842_v37  ;;  %v3411_v31 = vrot.slane %v3409_v34, 4  ;;  %v858_v32 = vshll.u32 %v645_v5, 16  ;;  %v864_v33 = vshll.u32 %v646_v19, 16  ;;  %v651_v5 = vld [vmem:[%s7197_s25 + $0x60] sm:$0xf] }
  0x64   : > { %6691 = vmatmul.mubr.msk.bf16.gmra.mrb[16].mxu0 %vm349_vm1, %v6079_v42  ;;  %v853_v6 = vsel %vm7244_vm4, %v848_v20, %v852_v61  ;;  %v857_v7 = vrot.slane %v855_v25, 4  ;;  %v868_v35 = vshrl.u32 %v646_v19, 16  ;;  %v874_v23 = vshll.u32 %v647_v24, 16  ;;  %v653_v18 = vld [vmem:[%s7197_s25 + $0x68] sm:$0x1] }
  0x65   : > { %6694 = vmatprep.mubr.msk.bf16.mxu0 %vm349_vm1, %v6080_v21  ;;  %v5783_v38 = vcombine.low %v843_v26, %v853_v6  ;;  %v3413_v39 = vsel %vm7319_vm7, %v3411_v31, %v3412_v22  ;;  %v860_v9 = vrot.slane %v858_v32, 5  ;;  %v866_v44 = vrot.slane %v864_v33, 5  ;;  %v654_v21 = vld [vmem:[%s7197_s25 + $0x6c] sm:$0xf]  ;;  %v655_v6 = vld [vmem:[%s7197_s25 + $0x70] sm:$0xf] }
  0x66   : > { %v6081_v42 = vcombine.low %v3410_v27, %v3413_v39  ;;  %v870_v45 = vrot.slane %v868_v35, 4  ;;  %v879_v46 = vshrl.u32 %v648_v54, 16  ;;  %v876_v49 = vrot.slane %v874_v23, 5 }
  0x67   : > { %6547 = vmatmul.mubr.msk.bf16.gmra.mrb[8].mxu1 %vm349_vm1, %v5783_v38  ;;  %v861_v48 = vor.u32 %v860_v9, %v857_v7  ;;  %v882_v50 = vshll.u32 %v648_v54, 16  ;;  %v888_v51 = vshll.u32 %v649_v36, 16  ;;  %v892_v55 = vshrl.u32 %v649_v36, 16  ;;  %v656_v38 = vld [vmem:[%s7197_s25 + $0x74] sm:$0x1] }
  0x68   : > { %v871_v53 = vor.u32 %v870_v45, %v866_v44  ;;  %v881_v12 = vrot.slane %v879_v46, 4  ;;  %v898_v56 = vshll.u32 %v650_v40, 16  ;;  %v6065_v57 = vrot.slane %v6041_v41, 9  ;;  %v6047_v41 = vld [vmem:[%s7197_s25 + $0xb4] sm:$0xe] }
  0x69   : > { %v862_v37 = vrot.slane %v861_v48, 4  ;;  %v884_v28 = vrot.slane %v882_v50, 5  ;;  %v890_v14 = vrot.slane %v888_v51, 5  ;;  %v894_v60 = vrot.slane %v892_v55, 4  ;;  %v6049_v48 = vld [vmem:[%s7197_s25 + $0xbc] sm:$0x1] }
  0x6a   : > { %v872_v59 = vrot.slane %v871_v53, 4  ;;  %v900_v61 = vrot.slane %v898_v56, 5  ;;  %v3416_v62 = vrot.slane %v6042_v47, 5  ;;  %v3419_v8 = vrot.slane %v6043_v52, 5 }
  0x6b   : > { %v867_v1 = vsel %vm7244_vm4, %v862_v37, %v866_v44  ;;  %v885_v2 = vor.u32 %v884_v28, %v881_v12  ;;  %v6066_v3 = vrot.slane %v6044_v30, 9  ;;  %v895_v11 = vor.u32 %v894_v60, %v890_v14  ;;  %v6051_v12 = vld [vmem:[%s7197_s25 + $0xc4] sm:$0xf]  ;;  %v6052_v28 = vld [vmem:[%s7197_s25 + $0xc8] sm:$0x1] }
  0x6c   : > { %6695 = vmatmul.mubr.msk.bf16.gmra.mrb[20].mxu0 %vm349_vm1, %v6081_v42  ;;  %v877_v10 = vsel %vm7244_vm4, %v872_v59, %v876_v49  ;;  %v3417_v13 = vsel %vm7319_vm7, %v6065_v57, %v3416_v62  ;;  %v3418_v17 = vrot.slane %v3416_v62, 4  ;;  %v3423_v19 = vrot.slane %v6045_v58, 5  ;;  %v6048_v42 = vld [vmem:[%s7197_s25 + $0xb8] sm:$0xf]  ;;  %v6050_v49 = vld [vmem:[%s7197_s25 + $0xc0] sm:$0xe] }
  0x6d   : > { %v5784_v29 = vcombine.low %v867_v1, %v877_v10  ;;  %v886_v34 = vrot.slane %v885_v2, 4  ;;  %v3426_v20 = vrot.slane %v6046_v63, 5  ;;  %v896_v22 = vrot.slane %v895_v11, 4 }
  0x6e   : > { %v3420_v24 = vsel %vm7319_vm7, %v3418_v17, %v3419_v8  ;;  %v903_v25 = vshrl.u32 %v651_v5, 16  ;;  %v906_v26 = vshll.u32 %v651_v5, 16  ;;  %v3424_v32 = vsel %vm7319_vm7, %v6066_v3, %v3423_v19  ;;  %v658_v17 = vld [vmem:[%s7197_s25 + $0x7c] sm:$0xf] }
  0x6f   : > { %6550 = vmatprep.mubr.msk.bf16.mxu1 %vm349_vm1, %v5784_v29  ;;  %v891_v27 = vsel %vm7244_vm4, %v886_v34, %v890_v14  ;;  %v6082_v31 = vcombine.low %v3417_v13, %v3420_v24  ;;  %v3425_v54 = vrot.slane %v3423_v19, 4  ;;  %v901_v7 = vsel %vm7244_vm4, %v896_v22, %v900_v61  ;;  %v657_v14 = vld [vmem:[%s7197_s25 + $0x78] sm:$0xf]  ;;  %v659_v19 = vld [vmem:[%s7197_s25 + $0x80] sm:$0x1] }
  0x70   : > { %v905_v33 = vrot.slane %v903_v25, 4  ;;  %v908_v35 = vrot.slane %v906_v26, 5  ;;  %v912_v36 = vshll.u32 %v652_v15, 16  ;;  %v5785_v39 = vcombine.low %v891_v27, %v901_v7  ;;  %v660_v26 = vld [vmem:[%s7197_s25 + $0x84] sm:$0xf] }
  0x71   : > { %6698 = vmatprep.mubr.msk.bf16.mxu0 %vm349_vm1, %v6082_v31  ;;  %v3427_v9 = vsel %vm7319_vm7, %v3425_v54, %v3426_v20  ;;  %v916_v23 = vshrl.u32 %v652_v15, 16  ;;  %v922_v40 = vshll.u32 %v653_v18, 16  ;;  %v927_v47 = vshrl.u32 %v654_v21, 16  ;;  %v661_v27 = vld [vmem:[%s7197_s25 + $0x88] sm:$0xf] }
  0x72   : > { %v6083_v44 = vcombine.low %v3424_v32, %v3427_v9  ;;  %v909_v45 = vor.u32 %v908_v35, %v905_v33  ;;  %v914_v46 = vrot.slane %v912_v36, 5  ;;  %6551 = vmatmul.mubr.msk.bf16.gmra.mrb[12].mxu1 %vm349_vm1, %v5785_v39  ;;  %v930_v52 = vshll.u32 %v654_v21, 16 }
  0x73   : > { %v918_v50 = vrot.slane %v916_v23, 4  ;;  %v924_v51 = vrot.slane %v922_v40, 5  ;;  %v936_v53 = vshll.u32 %v655_v6, 16  ;;  %v929_v56 = vrot.slane %v927_v47, 4  ;;  %v662_v40 = vld [vmem:[%s7197_s25 + $0x8c] sm:$0x1] }
  0x74   : > { %6699 = vmatmul.mubr.msk.bf16.gmra.mrb[24].mxu0 %vm349_vm1, %v6083_v44  ;;  %v910_v55 = vrot.slane %v909_v45, 4  ;;  %v940_v30 = vshrl.u32 %v655_v6, 16  ;;  %v946_v37 = vshll.u32 %v656_v38, 16  ;;  %v932_v58 = vrot.slane %v930_v52, 5  ;;  %v7101_v38 = vld [vmem:[%s7197_s25 + $0x18] sm:$0xff]  }
  0x75   : > { %v919_v57 = vor.u32 %v918_v50, %v914_v46  ;;  %v938_v59 = vrot.slane %v936_v53, 5  ;;  %v6067_v60 = vrot.slane %v6047_v41, 9  ;;  %v3430_v1 = vrot.slane %v6048_v42, 5  ;;  %v663_v47 = vld [vmem:[%s7197_s25 + $0x90] sm:$0xf] }
  0x76   : > { %v915_v61 = vsel %vm7244_vm4, %v910_v55, %v914_v46  ;;  %v942_v62 = vrot.slane %v940_v30, 4  ;;  %v948_v63 = vrot.slane %v946_v37, 5  ;;  %v933_v8 = vor.u32 %v932_v58, %v929_v56  ;;  %v664_v56 = vld [vmem:[%s7197_s25 + $0x94] sm:$0xf]  ;;  %v666_v58 = vld [vmem:[%s7197_s25 + $0x9c] sm:$0xf] }
  0x77   : > { %v920_v2 = vrot.slane %v919_v57, 4  ;;  %v3433_v3 = vrot.slane %v6049_v48, 5  ;;  %v6068_v5 = vrot.slane %v6050_v49, 9  ;;  %v3431_v10 = vsel %vm7319_vm7, %v6067_v60, %v3430_v1 }
  0x78   : > { %v943_v15 = vor.u32 %v942_v62, %v938_v59  ;;  %v3432_v11 = vrot.slane %v3430_v1, 4  ;;  %v3437_v13 = vrot.slane %v6051_v12, 5  ;;  %v934_v29 = vrot.slane %v933_v8, 4 }
  0x79   : > { %v925_v18 = vsel %vm7244_vm4, %v920_v2, %v924_v51  ;;  %v3440_v34 = vrot.slane %v6052_v28, 5  ;;  %v951_v20 = vshrl.u32 %v657_v14, 16  ;;  %v954_v33 = vshll.u32 %v657_v14, 16  ;;  %v665_v28 = vld [vmem:[%s7197_s25 + $0x98] sm:$0x1] }
  0x7a   : > { %v5786_v21 = vcombine.low %v915_v61, %v925_v18  ;;  %v944_v22 = vrot.slane %v943_v15, 4  ;;  %v3434_v24 = vsel %vm7319_vm7, %v3432_v11, %v3433_v3  ;;  %v3438_v25 = vsel %vm7319_vm7, %v6068_v5, %v3437_v13  ;;  %v7102_v11 = vld [vmem:[%s7197_s25 + $0x24] sm:$0xff]  }
  0x7b   : > { %v939_v31 = vsel %vm7244_vm4, %v934_v29, %v938_v59  ;;  %v6084_v32 = vcombine.low %v3431_v10, %v3434_v24  ;;  %v3439_v54 = vrot.slane %v3437_v13, 4  ;;  %v953_v6 = vrot.slane %v951_v20, 4  ;;  %v668_v24 = vld [vmem:[%s7197_s25 + $0xa4] sm:$0x1] }
  0x7c   : > { %6554 = vmatprep.mubr.msk.bf16.mxu1 %vm349_vm1, %v5786_v21  ;;  %v949_v7 = vsel %vm7244_vm4, %v944_v22, %v948_v63  ;;  %v960_v35 = vshll.u32 %v658_v17, 16  ;;  %v964_v36 = vshrl.u32 %v658_v17, 16  ;;  %v970_v23 = vshll.u32 %v659_v19, 16  ;;  %v667_v63 = vld [vmem:[%s7197_s25 + $0xa0] sm:$0xf]  ;;  %v7103_v19 = vld [vmem:[%s7197_s25 + $0x30] sm:$0xff]  }
  0x7d   : > { %v5787_v39 = vcombine.low %v939_v31, %v949_v7  ;;  %6702 = vmatprep.mubr.msk.bf16.mxu0 %vm349_vm1, %v6084_v32  ;;  %v3441_v9 = vsel %vm7319_vm7, %v3439_v54, %v3440_v34  ;;  %v975_v41 = vshrl.u32 %v660_v26, 16  ;;  %v956_v44 = vrot.slane %v954_v33, 5  ;;  %v669_v54 = vld [vmem:[%s7197_s25 + $0xa8] sm:$0xf] }
  0x7e   : > { %v6085_v42 = vcombine.low %v3438_v25, %v3441_v9  ;;  %v962_v45 = vrot.slane %v960_v35, 5  ;;  %v966_v46 = vrot.slane %v964_v36, 4  ;;  %v972_v48 = vrot.slane %v970_v23, 5  ;;  %v670_v36 = vld [vmem:[%s7197_s25 + $0xac] sm:$0xf] }
  0x7f   : > { %6555 = vmatmul.mubr.msk.bf16.gmra.mrb[16].mxu1 %vm349_vm1, %v5787_v39  ;;  %v977_v49 = vrot.slane %v975_v41, 4  ;;  %v978_v50 = vshll.u32 %v660_v26, 16  ;;  %v984_v51 = vshll.u32 %v661_v27, 16  ;;  %v957_v52 = vor.u32 %v956_v44, %v953_v6  ;;  %v672_v41 = vld [vmem:[%s7197_s25 + $0xb4] sm:$0xf] }
  0x80   : > { %6703 = vmatmul.mubr.msk.bf16.gmra.mrb[28].mxu0 %vm349_vm1, %v6085_v42  ;;  %v967_v53 = vor.u32 %v966_v46, %v962_v45  ;;  %v988_v12 = vshrl.u32 %v661_v27, 16  ;;  %v994_v55 = vshll.u32 %v662_v40, 16  ;;  %v999_v14 = vshrl.u32 %v663_v47, 16  ;;  %v671_v40 = vld [vmem:[%s7197_s25 + $0xb0] sm:$0x1] }
  0x81   : > { %v980_v30 = vrot.slane %v978_v50, 5  ;;  %v986_v37 = vrot.slane %v984_v51, 5  ;;  %6708 = vmatprep.mubr.msk.bf16.mxu0 %vm349_vm1, %v7101_v38  ;;  %v1002_v57 = vshll.u32 %v663_v47, 16  ;;  %v958_v59 = vrot.slane %v957_v52, 4  ;;  %v7630_v42 = vld [vmem:[%s8518_s1 + $0x6] sm:$0x3] }
  0x82   : > { %v968_v60 = vrot.slane %v967_v53, 4  ;;  %v990_v61 = vrot.slane %v988_v12, 4  ;;  %v996_v62 = vrot.slane %v994_v55, 5  ;;  %v1001_v2 = vrot.slane %v999_v14, 4  ;;  %7069 = vmatprep.subr.msk.bf16.mxu1 %vm398_vm0, %v7630_v42  ;;  %v7104_v55 = vld [vmem:[%s7197_s25 + $0x3c] sm:$0xff]  }
  0x83   : > { %v981_v1 = vor.u32 %v980_v30, %v977_v49  ;;  %v1004_v8 = vrot.slane %v1002_v57, 5  ;;  %v1008_v3 = vshll.u32 %v664_v56, 16  ;;  %v963_v5 = vsel %vm7244_vm4, %v958_v59, %v962_v45  ;;  %v674_v57 = vld [vmem:[%s7197_s25 + $0xbc] sm:$0x1] }
  0x84   : > { %v973_v15 = vsel %vm7244_vm4, %v968_v60, %v972_v48  ;;  %v991_v10 = vor.u32 %v990_v61, %v986_v37  ;;  %v1012_v13 = vshrl.u32 %v664_v56, 16  ;;  %v1018_v22 = vshll.u32 %v665_v28, 16 }
  0x85   : > { %v5788_v17 = vcombine.low %v963_v5, %v973_v15  ;;  %v982_v18 = vrot.slane %v981_v1, 4  ;;  %v1005_v29 = vor.u32 %v1004_v8, %v1001_v2  ;;  %v1010_v34 = vrot.slane %v1008_v3, 5  ;;  %v1421_v5 = vld [vmem:[%s7197_s25 + $0x4] sm:$0xf]  ;;  %v1422_v15 = vld [vmem:[%s7197_s25 + $0x8] sm:$0x1] }
  0x86   : > { %v992_v20 = vrot.slane %v991_v10, 4  ;;  %v1014_v21 = vrot.slane %v1012_v13, 4  ;;  %v1023_v25 = vshrl.u32 %v666_v58, 16  ;;  %v1026_v31 = vshll.u32 %v666_v58, 16  ;;  %v7105_v58 = vld [vmem:[%s7197_s25 + $0x48] sm:$0xff]  }
  0x87   : > { %6558 = vmatprep.mubr.msk.bf16.mxu1 %vm349_vm1, %v5788_v17  ;;  %v987_v26 = vsel %vm7244_vm4, %v982_v18, %v986_v37  ;;  %v1006_v27 = vrot.slane %v1005_v29, 4  ;;  %v1032_v32 = vshll.u32 %v667_v63, 16  ;;  %v1020_v33 = vrot.slane %v1018_v22, 5  ;;  %v1423_v18 = vld [vmem:[%s7197_s25 + $0xc] sm:$0xe] }
  0x88   : > { %v997_v6 = vsel %vm7244_vm4, %v992_v20, %v996_v62  ;;  %6709 = vmatmul.mubr.msk.bf16.vlgmr.msra.gmra.mrb[0].mxu0 %vm349_vm1, %v7102_v11  ;;  %v1015_v7 = vor.u32 %v1014_v21, %v1010_v34  ;;  %v1025_v35 = vrot.slane %v1023_v25, 4  ;;  %v1028_v9 = vrot.slane %v1026_v31, 5  ;;  %v1424_v21 = vld [vmem:[%s7197_s25 + $0x10] sm:$0xf]  ;;  %v1425_v22 = vld [vmem:[%s7197_s25 + $0x14] sm:$0x1] }
  0x89   : > { %v5789_v38 = vcombine.low %v987_v26, %v997_v6  ;;  %6741 = vmatpush3.bf16.msra.mxu0 %v7230_v16  ;;  %v1011_v39 = vsel %vm7244_vm4, %v1006_v27, %v1010_v34  ;;  %v1034_v23 = vrot.slane %v1032_v32, 5  ;;  %6712 = vmatprep.mubr.msk.bf16.mxu0 %vm349_vm1, %v7103_v19  ;;  %v1036_v45 = vshrl.u32 %v667_v63, 16  ;;  %v673_v16 = vld [vmem:[%s7197_s25 + $0xb8] sm:$0xf]  ;;  %v1420_v63 = vld [vmem:[%s7197_s25] sm:$0xe] }
  0x8a   : > { %v1016_v44 = vrot.slane %v1015_v7, 4  ;;  %v1042_v46 = vshll.u32 %v668_v24, 16  ;;  %v1047_v47 = vshrl.u32 %v669_v54, 16  ;;  %v1029_v48 = vor.u32 %v1028_v9, %v1025_v35  ;;  %v1426_v31 = vld [vmem:[%s7197_s25 + $0x18] sm:$0xe] }
  0x8b   : > { %6559 = vmatmul.mubr.msk.bf16.gmra.mrb[20].mxu1 %vm349_vm1, %v5789_v38  ;;  %v1050_v49 = vshll.u32 %v669_v54, 16  ;;  %v1056_v50 = vshll.u32 %v670_v36, 16  ;;  %v1060_v51 = vshrl.u32 %v670_v36, 16  ;;  %v1038_v53 = vrot.slane %v1036_v45, 4  ;;  %v1427_v32 = vld [vmem:[%s7197_s25 + $0x1c] sm:$0xf] }
  0x8c   : > { %v1021_v52 = vsel %vm7244_vm4, %v1016_v44, %v1020_v33  ;;  %v1044_v12 = vrot.slane %v1042_v46, 5  ;;  %v1049_v56 = vrot.slane %v1047_v47, 4  ;;  %v1030_v37 = vrot.slane %v1029_v48, 4  ;;  %v7106_v35 = vld [vmem:[%s7197_s25 + $0x54] sm:$0xff]   ;;  %v1428_v36 = vld [vmem:[%s7197_s25 + $0x20] sm:$0x1] }
  0x8d   : > { %v5790_v30 = vcombine.low %v1011_v39, %v1021_v52  ;;  %v1052_v28 = vrot.slane %v1050_v49, 5  ;;  %v1058_v14 = vrot.slane %v1056_v50, 5  ;;  %v1039_v59 = vor.u32 %v1038_v53, %v1034_v23  ;;  %v1429_v47 = vld [vmem:[%s7197_s25 + $0x24] sm:$0xe]  ;;  %v1431_v52 = vld [vmem:[%s7197_s25 + $0x2c] sm:$0x1] }
  0x8e   : > { %v1062_v60 = vrot.slane %v1060_v51, 4  ;;  %v1066_v61 = vshll.u32 %v671_v40, 16  ;;  %v1071_v62 = vshrl.u32 %v672_v41, 16  ;;  %v1035_v1 = vsel %vm7244_vm4, %v1030_v37, %v1034_v23  ;;  %v7107_v40 = vld [vmem:[%s7197_s25 + $0x60] sm:$0xff]  }
  0x8f   : > { %6562 = vmatprep.mubr.msk.bf16.mxu1 %vm349_vm1, %v5790_v30  ;;  %v1053_v2 = vor.u32 %v1052_v28, %v1049_v56  ;;  %v1074_v8 = vshll.u32 %v672_v41, 16  ;;  %v1080_v3 = vshll.u32 %v673_v16, 16  ;;  %v1040_v10 = vrot.slane %v1039_v59, 4  ;;  %v1432_v30 = vld [vmem:[%s7197_s25 + $0x30] sm:$0xe] }
  0x90   : > { %6713 = vmatmul.mubr.msk.bf16.gmra.mrb[4].mxu0 %vm349_vm1, %v7104_v55  ;;  %v1063_v11 = vor.u32 %v1062_v60, %v1058_v14  ;;  %v1068_v13 = vrot.slane %v1066_v61, 5  ;;  %v1073_v17 = vrot.slane %v1071_v62, 4  ;;  %v1084_v20 = vshrl.u32 %v673_v16, 16  ;;  %v1430_v16 = vld [vmem:[%s7197_s25 + $0x28] sm:$0xf] }
  0x91   : > { %v1054_v29 = vrot.slane %v1053_v2, 4  ;;  %v1076_v34 = vrot.slane %v1074_v8, 5  ;;  %v1082_v19 = vrot.slane %v1080_v3, 5  ;;  %6716 = vmatprep.mubr.msk.bf16.mxu0 %vm349_vm1, %v7105_v58  ;;  %v1045_v24 = vsel %vm7244_vm4, %v1040_v10, %v1044_v12  ;;  %v1433_v58 = vld [vmem:[%s7197_s25 + $0x34] sm:$0xf]  ;;  %v7108_v10 = vld [vmem:[%s7197_s25 + $0x6c] sm:$0xff]  }
  0x92   : > { %v1064_v25 = vrot.slane %v1063_v11, 4  ;;  %v1090_v26 = vshll.u32 %v674_v57, 16  ;;  %v5810_v27 = vrot.slane %v1420_v63, 9  ;;  %v5791_v54 = vcombine.low %v1035_v1, %v1045_v24  ;;  %v1434_v59 = vld [vmem:[%s7197_s25 + $0x38] sm:$0x1] }
  0x93   : > { %v1059_v6 = vsel %vm7244_vm4, %v1054_v29, %v1058_v14  ;;  %v1077_v7 = vor.u32 %v1076_v34, %v1073_v17  ;;  %v1086_v33 = vrot.slane %v1084_v20, 4  ;;  %v1553_v9 = vrot.slane %v1421_v5, 5  ;;  %v1435_v60 = vld [vmem:[%s7197_s25 + $0x3c] sm:$0xe]  ;;  %v1436_v61 = vld [vmem:[%s7197_s25 + $0x40] sm:$0xf] }
  0x94   : > { %v1069_v38 = vsel %vm7244_vm4, %v1064_v25, %v1068_v13  ;;  %v1092_v39 = vrot.slane %v1090_v26, 5  ;;  %v1556_v23 = vrot.slane %v1422_v15, 5  ;;  %6563 = vmatmul.mubr.msk.bf16.gmra.mrb[24].mxu1 %vm349_vm1, %v5791_v54  ;;  %v5811_v46 = vrot.slane %v1423_v18, 9  ;;  %v1437_v8 = vld [vmem:[%s7197_s25 + $0x44] sm:$0x1]  ;;  %v7109_v34 = vld [vmem:[%s7197_s25 + $0x78] sm:$0xff]  }
  0x95   : > { %v5792_v41 = vcombine.low %v1059_v6, %v1069_v38  ;;  %v1078_v44 = vrot.slane %v1077_v7, 4  ;;  %v1087_v45 = vor.u32 %v1086_v33, %v1082_v19  ;;  %v1554_v48 = vsel %vm7319_vm7, %v5810_v27, %v1553_v9  ;;  %v1438_v3 = vld [vmem:[%s7197_s25 + $0x48] sm:$0xe]  ;;  %v1439_v20 = vld [vmem:[%s7197_s25 + $0x4c] sm:$0xf] }
  0x96   : > { %v1555_v49 = vrot.slane %v1553_v9, 4  ;;  %v1560_v50 = vrot.slane %v1424_v21, 5  ;;  %v1563_v51 = vrot.slane %v1425_v22, 5  ;;  %v5812_v55 = vrot.slane %v1426_v31, 9  ;;  %v1440_v21 = vld [vmem:[%s7197_s25 + $0x50] sm:$0x1] }
  0x97   : > { %6566 = vmatprep.mubr.msk.bf16.mxu1 %vm349_vm1, %v5792_v41  ;;  %v1083_v53 = vsel %vm7244_vm4, %v1078_v44, %v1082_v19  ;;  %v1088_v12 = vrot.slane %v1087_v45, 4  ;;  %v1567_v56 = vrot.slane %v1427_v32, 5  ;;  %v1570_v57 = vrot.slane %v1428_v36, 5  ;;  %v1441_v27 = vld [vmem:[%s7197_s25 + $0x54] sm:$0xe] }
  0x98   : > { %6717 = vmatmul.mubr.msk.bf16.gmra.mrb[8].mxu0 %vm349_vm1, %v7106_v35  ;;  %v1557_v37 = vsel %vm7319_vm7, %v1555_v49, %v1556_v23  ;;  %v7678_v28 = vsel %vm7319_vm7, %v5811_v46, %v1560_v50  ;;  %v1562_v14 = vrot.slane %v1560_v50, 4  ;;  %v5813_v11 = vrot.slane %v1429_v47, 9  ;;  %v1442_v31 = vld [vmem:[%s7197_s25 + $0x58] sm:$0xf]  ;;  %v1443_v7 = vld [vmem:[%s7197_s25 + $0x5c] sm:$0x1] }
  0x99   : > { %v1093_v62 = vsel %vm7244_vm4, %v1088_v12, %v1092_v39  ;;  %v5827_v63 = vcombine.low %v1554_v48, %v1557_v37  ;;  %6720 = vmatprep.mubr.msk.bf16.mxu0 %vm349_vm1, %v7107_v40  ;;  %v7689_v1 = vsel %vm7319_vm7, %v5812_v55, %v1567_v56  ;;  %v1569_v2 = vrot.slane %v1567_v56, 4  ;;  %v1444_v39 = vld [vmem:[%s7197_s25 + $0x60] sm:$0xe]  ;;  %v1445_v44 = vld [vmem:[%s7197_s25 + $0x64] sm:$0xf] }
  0x9a   : > { %v5793_v5 = vcombine.low %v1083_v53, %v1093_v62  ;;  %v7695_v15 = vsel %vm7319_vm7, %v1562_v14, %v1563_v51  ;;  %v1574_v13 = vrot.slane %v1430_v16, 5  ;;  %v1577_v29 = vrot.slane %v1431_v52, 5  ;;  %v1446_v45 = vld [vmem:[%s7197_s25 + $0x68] sm:$0x1]  ;;  %v1447_v46 = vld [vmem:[%s7197_s25 + $0x6c] sm:$0xe] }
  0x9b   : > { %v5828_v17 = vcombine.low %v7678_v28, %v7695_v15  ;;  %v7702_v18 = vsel %vm7319_vm7, %v1569_v2, %v1570_v57  ;;  %v7707_v19 = vsel %vm398_vm0, %v7630_v42, 0  ;;  %v5814_v26 = vrot.slane %v1432_v30, 9  ;;  %v1448_v47 = vld [vmem:[%s7197_s25 + $0x70] sm:$0xf]  ;;  %v1449_v51 = vld [vmem:[%s7197_s25 + $0x74] sm:$0x1] }
  0x9c   : > { %v5829_v22 = vcombine.low %v7689_v1, %v7702_v18  ;;  %v7715_v24 = vsel %vm7319_vm7, %v5813_v11, %v1574_v13  ;;  %v1576_v25 = vrot.slane %v1574_v13, 4  ;;  %6567 = vmatmul.mubr.msk.bf16.gmra.mrb[28].mxu1 %vm349_vm1, %v5793_v5  ;;  %v1581_v32 = vrot.slane %v1433_v58, 5  ;;  %v1450_v14 = vld [vmem:[%s7197_s25 + $0x78] sm:$0xe]  ;;  %v1451_v57 = vld [vmem:[%s7197_s25 + $0x7c] sm:$0xf] }
  0x9d   : > { %v1584_v42 = vrot.slane %v1434_v59, 5  ;;  %v5815_v54 = vrot.slane %v1435_v60, 9  ;;  %v1588_v6 = vrot.slane %v1436_v61, 5  ;;  %6572 = vmatprep.mubr.msk.bf16.mxu1 %vm349_vm1, %v5827_v63  ;;  %v1591_v35 = vrot.slane %v1437_v8, 5  ;;  %v7110_v58 = vld [vmem:[%s7197_s25 + $0x84] sm:$0xff]  }
  0x9e   : > { %v7724_v33 = vsel %vm7319_vm7, %v1576_v25, %v1577_v29  ;;  %v5816_v36 = vrot.slane %v1438_v3, 9  ;;  %v1595_v38 = vrot.slane %v1439_v20, 5  ;;  %v7731_v23 = vsel %vm7319_vm7, %v5814_v26, %v1581_v32  ;;  %v1452_v63 = vld [vmem:[%s7197_s25 + $0x80] sm:$0x1]  ;;  %v1453_v1 = vld [vmem:[%s7197_s25 + $0x84] sm:$0xe] }
  0x9f   : > { %v5830_v9 = vcombine.low %v7715_v24, %v7724_v33  ;;  %v1583_v40 = vrot.slane %v1581_v32, 4  ;;  %v7735_v41 = vsel %vm7319_vm7, %v5815_v54, %v1588_v6  ;;  %v1590_v16 = vrot.slane %v1588_v6, 4  ;;  %v1454_v15 = vld [vmem:[%s7197_s25 + $0x88] sm:$0xf]  ;;  %v6167_v26 = vld [vmem:[%s7197_s25 + $0x18] sm:$0xf] }
  0xa0   : > { %6721 = vmatmul.mubr.msk.bf16.gmra.mrb[12].mxu0 %vm349_vm1, %v7108_v10  ;;  %v7744_v48 = vsel %vm7319_vm7, %v5816_v36, %v1595_v38  ;;  %v1597_v49 = vrot.slane %v1595_v38, 4  ;;  %v1598_v50 = vrot.slane %v1440_v21, 5  ;;  %v5817_v53 = vrot.slane %v1441_v27, 9  ;;  %v7111_v10 = vld [vmem:[%s7197_s25 + $0x90] sm:$0xff]   ;;  %v6168_v32 = vld [vmem:[%s7197_s25 + $0x1c] sm:$0xf] }
  0xa1   : > { %6724 = vmatprep.mubr.msk.bf16.mxu0 %vm349_vm1, %v7109_v34  ;;  %v7750_v52 = vsel %vm7319_vm7, %v1583_v40, %v1584_v42  ;;  %v1602_v12 = vrot.slane %v1442_v31, 5  ;;  %v1605_v55 = vrot.slane %v1443_v7, 5  ;;  %v7756_v30 = vsel %vm7319_vm7, %v1590_v16, %v1591_v35  ;;  %v1455_v34 = vld [vmem:[%s7197_s25 + $0x8c] sm:$0x1]  ;;  %v7133_v42 = vld [vmem:[%s8518_s1 + $0x8] sm:$0x3] }
  0xa2   : > { %v5831_v56 = vcombine.low %v7731_v23, %v7750_v52  ;;  %v7760_v37 = vsel %vm7319_vm7, %v1597_v49, %v1598_v50  ;;  %v5818_v28 = vrot.slane %v1444_v39, 9  ;;  %v5832_v59 = vcombine.low %v7735_v41, %v7756_v30  ;;  %v6312_v36 = vld [vmem:[%s8518_s1 + $0x10] sm:$0x3] }
  0xa3   : > { %v5833_v60 = vcombine.low %v7744_v48, %v7760_v37  ;;  %v7771_v61 = vsel %vm7319_vm7, %v5817_v53, %v1602_v12  ;;  %v1604_v62 = vrot.slane %v1602_v12, 4  ;;  %v1609_v2 = vrot.slane %v1445_v44, 5  ;;  %v6169_v44 = vld [vmem:[%s7197_s25 + $0x20] sm:$0x1]  ;;  %7075 = vmatprep.subr.msk.bf16.mxu0 %vm398_vm0, %v6312_v36 }
  0xa4   : > { %v1612_v8 = vrot.slane %v1446_v45, 5  ;;  %v5819_v3 = vrot.slane %v1447_v46, 9  ;;  %v1616_v5 = vrot.slane %v1448_v47, 5  ;;  %6573 = vmatmul.mubr.msk.bf16.vlgmr.msra.gmra.mrb[0].mxu1 %vm349_vm1, %v5828_v17  ;;  %v1619_v13 = vrot.slane %v1449_v51, 5  ;;  %v6170_v46 = vld [vmem:[%s7197_s25 + $0x24] sm:$0xf] }
  0xa5   : > { %v7780_v11 = vsel %vm7319_vm7, %v1604_v62, %v1605_v55  ;;  %v5820_v18 = vrot.slane %v1450_v14, 9  ;;  %v1623_v29 = vrot.slane %v1451_v57, 5  ;;  %6576 = vmatprep.mubr.msk.bf16.mxu1 %vm349_vm1, %v5829_v22  ;;  %6605 = vmatpush3.bf16.msra.mxu1 %v7707_v19  ;;  %v7789_v17 = vsel %vm7319_vm7, %v5818_v28, %v1609_v2  ;;  %v6171_v28 = vld [vmem:[%s7197_s25 + $0x28] sm:$0xf]  ;;  %v7112_v14 = vld [vmem:[%s7197_s25 + $0x9c] sm:$0xff]  }
  0xa6   : > { %v5834_v20 = vcombine.low %v7771_v61, %v7780_v11  ;;  %v1611_v21 = vrot.slane %v1609_v2, 4  ;;  %v7793_v25 = vsel %vm7319_vm7, %v5819_v3, %v1616_v5  ;;  %v1618_v27 = vrot.slane %v1616_v5, 4  ;;  %7071 = vmatprep.subr.msk.bf16.mxu1 %vm398_vm0, %v7133_v42  ;;  %v6172_v62 = vld [vmem:[%s7197_s25 + $0x2c] sm:$0x1] }
  0xa7   : > { %v7798_v31 = vsel %vm7319_vm7, %v5820_v18, %v1623_v29  ;;  %v1625_v19 = vrot.slane %v1623_v29, 4  ;;  %v1626_v22 = vrot.slane %v1452_v63, 5  ;;  %v5821_v6 = vrot.slane %v1453_v1, 9  ;;  %v7113_v2 = vld [vmem:[%s7197_s25 + $0xa8] sm:$0xff]   ;;  %v1457_v18 = vld [vmem:[%s7197_s25 + $0x94] sm:$0xf] }
  0xa8   : > { %6725 = vmatmul.mubr.msk.bf16.gmra.mrb[16].mxu0 %vm349_vm1, %v7110_v58  ;;  %v7808_v54 = vsel %vm7319_vm7, %v1611_v21, %v1612_v8  ;;  %v1630_v7 = vrot.slane %v1454_v15, 5  ;;  %v1633_v35 = vrot.slane %v1455_v34, 5  ;;  %v7818_v39 = vsel %vm7319_vm7, %v1618_v27, %v1619_v13  ;;  %v1458_v27 = vld [vmem:[%s7197_s25 + $0x98] sm:$0x1] }
  0xa9   : > { %6728 = vmatprep.mubr.msk.bf16.mxu0 %vm349_vm1, %v7111_v10  ;;  %v5835_v38 = vcombine.low %v7789_v17, %v7808_v54  ;;  %v7822_v40 = vsel %vm7319_vm7, %v1625_v19, %v1626_v22  ;;  %v4272_v45 = vshrl.u32 %v6167_v26, 16  ;;  %v5836_v47 = vcombine.low %v7793_v25, %v7818_v39  ;;  %v1456_v10 = vld [vmem:[%s7197_s25 + $0x90] sm:$0xe]  ;;  %v1459_v19 = vld [vmem:[%s7197_s25 + $0x9c] sm:$0xe] }
  0xaa   : > { %v5837_v16 = vcombine.low %v7798_v31, %v7822_v40  ;;  %v7833_v49 = vsel %vm7319_vm7, %v5821_v6, %v1630_v7  ;;  %v1632_v50 = vrot.slane %v1630_v7, 4  ;;  %v4275_v53 = vshll.u32 %v6167_v26, 16  ;;  %v6180_v17 = vld [vmem:[%s7197_s25 + $0x4c] sm:$0xf]  ;;  %v6186_v39 = vld [vmem:[%s7197_s25 + $0x64] sm:$0xf] }
  0xab   : > { %v4274_v51 = vrot.slane %v4272_v45, 4  ;;  %v4281_v12 = vshll.u32 %v6168_v32, 16  ;;  %v4285_v55 = vshrl.u32 %v6168_v32, 16  ;;  %v4291_v58 = vshll.u32 %v6169_v44, 16 }
  0xac   : > { %v7839_v57 = vsel %vm7319_vm7, %v1632_v50, %v1633_v35  ;;  %v4296_v63 = vshrl.u32 %v6170_v46, 16  ;;  %v4299_v1 = vshll.u32 %v6170_v46, 16  ;;  %6577 = vmatmul.mubr.msk.bf16.gmra.mrb[4].mxu1 %vm349_vm1, %v5830_v9  ;;  %v4277_v3 = vrot.slane %v4275_v53, 5  ;;  %v1461_v50 = vld [vmem:[%s7197_s25 + $0xa4] sm:$0x1] }
  0xad   : > { %v5838_v8 = vcombine.low %v7833_v49, %v7839_v57  ;;  %v4283_v5 = vrot.slane %v4281_v12, 5  ;;  %v4287_v15 = vrot.slane %v4285_v55, 4  ;;  %6580 = vmatprep.mubr.msk.bf16.mxu1 %vm349_vm1, %v5831_v56  ;;  %v4293_v13 = vrot.slane %v4291_v58, 5  ;;  %v1460_v56 = vld [vmem:[%s7197_s25 + $0xa0] sm:$0xf]  ;;  %v7114_v58 = vld [vmem:[%s7197_s25 + $0xb4] sm:$0xff]  }
  0xae   : > { %v4298_v24 = vrot.slane %v4296_v63, 4  ;;  %v4301_v33 = vrot.slane %v4299_v1, 5  ;;  %v4305_v9 = vshll.u32 %v6171_v28, 16  ;;  %v4278_v29 = vor.u32 %v4277_v3, %v4274_v51  ;;  %v7115_v3 = vld [vmem:[%s7197_s25 + $0xc0] sm:$0xff]  }
  0xaf   : > { %v4288_v34 = vor.u32 %v4287_v15, %v4283_v5  ;;  %v4309_v21 = vshrl.u32 %v6171_v28, 16  ;;  %v4315_v26 = vshll.u32 %v6172_v62, 16  ;;  %v7859_v23 = vsel %vm398_vm0, %v6312_v36, 0  ;;  %v6173_v28 = vld [vmem:[%s7197_s25 + $0x30] sm:$0xf] }
  0xb0   : > { %6729 = vmatmul.mubr.msk.bf16.gmra.mrb[20].mxu0 %vm349_vm1, %v7112_v14  ;;  %v4302_v22 = vor.u32 %v4301_v33, %v4298_v24  ;;  %v4307_v32 = vrot.slane %v4305_v9, 5  ;;  %v5822_v52 = vrot.slane %v1456_v10, 9  ;;  %v4279_v42 = vrot.slane %v4278_v29, 4  ;;  %v6174_v14 = vld [vmem:[%s7197_s25 + $0x34] sm:$0xf] }
  0xb1   : > { %6732 = vmatprep.mubr.msk.bf16.mxu0 %vm349_vm1, %v7113_v2  ;;  %v4289_v6 = vrot.slane %v4288_v34, 4  ;;  %v4311_v7 = vrot.slane %v4309_v21, 4  ;;  %v4317_v35 = vrot.slane %v4315_v26, 5  ;;  %v1637_v45 = vrot.slane %v1457_v18, 5  ;;  %v6175_v24 = vld [vmem:[%s7197_s25 + $0x38] sm:$0x1] }
  0xb2   : > { %v4303_v44 = vrot.slane %v4302_v22, 4  ;;  %v1640_v46 = vrot.slane %v1458_v27, 5  ;;  %v5823_v51 = vrot.slane %v1459_v19, 9  ;;  %v4284_v36 = vsel %vm7244_vm4, %v4279_v42, %v4283_v5  ;;  %v6176_v9 = vld [vmem:[%s7197_s25 + $0x3c] sm:$0xf] }
  0xb3   : > { %v4294_v53 = vsel %vm7244_vm4, %v4289_v6, %v4293_v13  ;;  %v4312_v12 = vor.u32 %v4311_v7, %v4307_v32  ;;  %v1644_v55 = vrot.slane %v1460_v56, 5  ;;  %v7877_v1 = vsel %vm7319_vm7, %v5822_v52, %v1637_v45  ;;  %v6178_v34 = vld [vmem:[%s7197_s25 + $0x44] sm:$0x1]  ;;  %v1462_v22 = vld [vmem:[%s7197_s25 + $0xa8] sm:$0xe] }
  0xb4   : > { %v7871_v62 = vcombine.low %v4284_v36, %v4294_v53  ;;  %v4308_v63 = vsel %vm7244_vm4, %v4303_v44, %v4307_v32  ;;  %v1639_v2 = vrot.slane %v1637_v45, 4  ;;  %6581 = vmatmul.mubr.msk.bf16.gmra.mrb[8].mxu1 %vm349_vm1, %v5832_v59  ;;  %v1647_v13 = vrot.slane %v1461_v50, 5  ;;  %v1463_v32 = vld [vmem:[%s7197_s25 + $0xac] sm:$0xf]  ;;  %v1464_v7 = vld [vmem:[%s7197_s25 + $0xb0] sm:$0x1] }
  0xb5   : > { %v4313_v5 = vrot.slane %v4312_v12, 4  ;;  %v7886_v15 = vsel %vm7319_vm7, %v5823_v51, %v1644_v55  ;;  %v1646_v10 = vrot.slane %v1644_v55, 4  ;;  %6584 = vmatprep.mubr.msk.bf16.mxu1 %vm349_vm1, %v5833_v60  ;;  %v4320_v30 = vshrl.u32 %v6173_v28, 16  ;;  %v6177_v60 = vld [vmem:[%s7197_s25 + $0x40] sm:$0xf]  ;;  %v7116_v51 = vld [vmem:[%s7197_s25 + $0xcc] sm:$0xff]  }
  0xb6   : > { %v7895_v41 = vsel %vm7319_vm7, %v1639_v2, %v1640_v46  ;;  %v4323_v59 = vshll.u32 %v6173_v28, 16  ;;  %v4329_v33 = vshll.u32 %v6174_v14, 16  ;;  %v4333_v37 = vshrl.u32 %v6174_v14, 16  ;;  %v1465_v50 = vld [vmem:[%s7197_s25 + $0xb4] sm:$0xe] }
  0xb7   : > { %v4318_v18 = vsel %vm7244_vm4, %v4313_v5, %v4317_v35  ;;  %v5839_v29 = vcombine.low %v7877_v1, %v7895_v41  ;;  %v7904_v48 = vsel %vm7319_vm7, %v1646_v10, %v1647_v13  ;;  %v4322_v27 = vrot.slane %v4320_v30, 4  ;;  %v1466_v28 = vld [vmem:[%s7197_s25 + $0xb8] sm:$0xf]  ;;  %v6179_v5 = vld [vmem:[%s7197_s25 + $0x48] sm:$0xf] }
  0xb8   : > { %6733 = vmatmul.mubr.msk.bf16.gmra.mrb[24].mxu0 %vm349_vm1, %v7114_v58  ;;  %v7909_v21 = vcombine.low %v4308_v63, %v4318_v18  ;;  %v5840_v26 = vcombine.low %v7886_v15, %v7904_v48  ;;  %v4325_v19 = vrot.slane %v4323_v59, 5  ;;  %v4331_v52 = vrot.slane %v4329_v33, 5 }
  0xb9   : > { %6736 = vmatprep.mubr.msk.bf16.mxu0 %vm349_vm1, %v7115_v3  ;;  %v4335_v56 = vrot.slane %v4333_v37, 4  ;;  %v4339_v42 = vshll.u32 %v6175_v24, 16  ;;  %v4344_v6 = vshrl.u32 %v6176_v9, 16  ;;  %v4347_v44 = vshll.u32 %v6176_v9, 16  ;;  %v1467_v3 = vld [vmem:[%s7197_s25 + $0xbc] sm:$0x1] }
  0xba   : > { %v4326_v35 = vor.u32 %v4325_v19, %v4322_v27  ;;  %v4353_v45 = vshll.u32 %v6177_v60, 16  ;;  %v4357_v46 = vshrl.u32 %v6177_v60, 16  ;;  %v4363_v55 = vshll.u32 %v6178_v34, 16  ;;  %v6181_v27 = vld [vmem:[%s7197_s25 + $0x50] sm:$0x1] }
  0xbb   : > { %v4336_v36 = vor.u32 %v4335_v56, %v4331_v52  ;;  %v4341_v53 = vrot.slane %v4339_v42, 5  ;;  %v4346_v12 = vrot.slane %v4344_v6, 4  ;;  %v4349_v58 = vrot.slane %v4347_v44, 5  ;;  %v6182_v56 = vld [vmem:[%s7197_s25 + $0x54] sm:$0xf] }
  0xbc   : > { %v4327_v14 = vrot.slane %v4326_v35, 4  ;;  %v4355_v63 = vrot.slane %v4353_v45, 5  ;;  %v4359_v2 = vrot.slane %v4357_v46, 4  ;;  %6585 = vmatmul.mubr.msk.bf16.gmra.mrb[12].mxu1 %vm349_vm1, %v5834_v20  ;;  %v4365_v13 = vrot.slane %v4363_v55, 5  ;;  %v6183_v35 = vld [vmem:[%s7197_s25 + $0x58] sm:$0xf] }
  0xbd   : > { %v4337_v10 = vrot.slane %v4336_v36, 4  ;;  %v5824_v24 = vrot.slane %v1462_v22, 9  ;;  %v1651_v30 = vrot.slane %v1463_v32, 5  ;;  %6588 = vmatprep.mubr.msk.bf16.mxu1 %vm349_vm1, %v5835_v38  ;;  %v4350_v33 = vor.u32 %v4349_v58, %v4346_v12  ;;  %v6185_v36 = vld [vmem:[%s7197_s25 + $0x60] sm:$0xf] }
  0xbe   : > { %v4332_v59 = vsel %vm7244_vm4, %v4327_v14, %v4331_v52  ;;  %v4360_v9 = vor.u32 %v4359_v2, %v4355_v63  ;;  %v1654_v18 = vrot.slane %v1464_v7, 5  ;;  %v5825_v37 = vrot.slane %v1465_v50, 9 }
  0xbf   : > { %v4342_v61 = vsel %vm7244_vm4, %v4337_v10, %v4341_v53  ;;  %v7936_v11 = vsel %vm7319_vm7, %v5824_v24, %v1651_v30  ;;  %v1653_v20 = vrot.slane %v1651_v30, 4  ;;  %v4351_v38 = vrot.slane %v4350_v33, 4 }
  0xc0   : > { %6737 = vmatmul.mubr.msk.bf16.gmra.mrb[28].mxu0 %vm349_vm1, %v7116_v51  ;;  %v6218_v54 = vcombine.low %v4332_v59, %v4342_v61  ;;  %v4361_v60 = vrot.slane %v4360_v9, 4  ;;  %v1658_v34 = vrot.slane %v1466_v28, 5  ;;  %v1661_v22 = vrot.slane %v1467_v3, 5  ;;  %v6184_v51 = vld [vmem:[%s7197_s25 + $0x5c] sm:$0x1] }
  0xc1   : > { %6742 = vmatprep.mubr.msk.bf16.mxu0 %vm349_vm1, %v7871_v62  ;;  %v7945_v19 = vsel %vm7319_vm7, %v1653_v20, %v1654_v18  ;;  %v4368_v32 = vshrl.u32 %v6179_v5, 16  ;;  %v4371_v52 = vshll.u32 %v6179_v5, 16  ;;  %v4356_v42 = vsel %vm7244_vm4, %v4351_v38, %v4355_v63  ;;  %v6187_v18 = vld [vmem:[%s7197_s25 + $0x68] sm:$0x1] }
  0xc2   : > { %v4366_v6 = vsel %vm7244_vm4, %v4361_v60, %v4365_v13  ;;  %v5841_v7 = vcombine.low %v7936_v11, %v7945_v19  ;;  %v7956_v62 = vsel %vm7319_vm7, %v5825_v37, %v1658_v34  ;;  %v1660_v45 = vrot.slane %v1658_v34, 4  ;;  %v6188_v37 = vld [vmem:[%s7197_s25 + $0x6c] sm:$0xf]  ;;  %v6189_v34 = vld [vmem:[%s7197_s25 + $0x70] sm:$0xf] }
  0xc3   : > { %v7959_v44 = vcombine.low %v4356_v42, %v4366_v6  ;;  %v4370_v46 = vrot.slane %v4368_v32, 4  ;;  %v4373_v50 = vrot.slane %v4371_v52, 5  ;;  %v4377_v53 = vshll.u32 %v6180_v17, 16 }
  0xc4   : > { %v4381_v12 = vshrl.u32 %v6180_v17, 16  ;;  %v4387_v55 = vshll.u32 %v6181_v27, 16  ;;  %v4392_v28 = vshrl.u32 %v6182_v56, 16  ;;  %6589 = vmatmul.mubr.msk.bf16.gmra.mrb[16].mxu1 %vm349_vm1, %v5836_v47  ;;  %v7969_v14 = vsel %vm7319_vm7, %v1660_v45, %v1661_v22 }
  0xc5   : > { %v4374_v58 = vor.u32 %v4373_v50, %v4370_v46  ;;  %v4395_v63 = vshll.u32 %v6182_v56, 16  ;;  %v4401_v2 = vshll.u32 %v6183_v35, 16  ;;  %6592 = vmatprep.mubr.msk.bf16.mxu1 %vm349_vm1, %v5837_v16  ;;  %v5842_v3 = vcombine.low %v7956_v62, %v7969_v14 }
  0xc6   : > { %v4379_v5 = vrot.slane %v4377_v53, 5  ;;  %v4383_v10 = vrot.slane %v4381_v12, 4  ;;  %v4389_v25 = vrot.slane %v4387_v55, 5  ;;  %v4394_v13 = vrot.slane %v4392_v28, 4 }
  0xc7   : > { %v4375_v47 = vrot.slane %v4374_v58, 4  ;;  %v4397_v24 = vrot.slane %v4395_v63, 5  ;;  %v4403_v30 = vrot.slane %v4401_v2, 5  ;;  %v4405_v31 = vshrl.u32 %v6183_v35, 16 }
  0xc8   : > { %6743 = vmatmul.mubr.msk.bf16.vlgmr.msra.gmra.mrb[0].mxu0 %vm349_vm1, %v7909_v21  ;;  %v4384_v59 = vor.u32 %v4383_v10, %v4379_v5  ;;  %v4411_v40 = vshll.u32 %v6184_v51, 16  ;;  %v4416_v16 = vshrl.u32 %v6185_v36, 16  ;;  %v4419_v61 = vshll.u32 %v6185_v36, 16  ;;  %v6191_v51 = vld [vmem:[%s7197_s25 + $0x78] sm:$0xf] }
  0xc9   : > { %6775 = vmatpush3.bf16.msra.mxu0 %v7859_v23  ;;  %6746 = vmatprep.mubr.msk.bf16.mxu0 %vm349_vm1, %v6218_v54  ;;  %v4380_v33 = vsel %vm7244_vm4, %v4375_v47, %v4379_v5  ;;  %v4398_v9 = vor.u32 %v4397_v24, %v4394_v13  ;;  %v4425_v20 = vshll.u32 %v6186_v39, 16  ;;  %v4407_v21 = vrot.slane %v4405_v31, 4  ;;  %v6190_v54 = vld [vmem:[%s7197_s25 + $0x74] sm:$0x1]  ;;  %v6194_v47 = vld [vmem:[%s7197_s25 + $0x84] sm:$0xf] }
  0xca   : > { %v4385_v17 = vrot.slane %v4384_v59, 4  ;;  %v4413_v38 = vrot.slane %v4411_v40, 5  ;;  %v4418_v60 = vrot.slane %v4416_v16, 4  ;;  %v4421_v22 = vrot.slane %v4419_v61, 5  ;;  %v6195_v59 = vld [vmem:[%s7197_s25 + $0x88] sm:$0xf] }
  0xcb   : > { %v4399_v27 = vrot.slane %v4398_v9, 4  ;;  %v4427_v23 = vrot.slane %v4425_v20, 5  ;;  %v4429_v32 = vshrl.u32 %v6186_v39, 16  ;;  %v4408_v56 = vor.u32 %v4407_v21, %v4403_v30  ;;  %v6193_v39 = vld [vmem:[%s7197_s25 + $0x80] sm:$0x1] }
  0xcc   : > { %v4390_v52 = vsel %vm7244_vm4, %v4385_v17, %v4389_v25  ;;  %v4435_v42 = vshll.u32 %v6187_v18, 16  ;;  %v4440_v6 = vshrl.u32 %v6188_v37, 16  ;;  %6593 = vmatmul.mubr.msk.bf16.gmra.mrb[20].mxu1 %vm349_vm1, %v5838_v8  ;;  %v4422_v46 = vor.u32 %v4421_v22, %v4418_v60 }
  0xcd   : > { %v6220_v35 = vcombine.low %v4380_v33, %v4390_v52  ;;  %v4404_v45 = vsel %vm7244_vm4, %v4399_v27, %v4403_v30  ;;  %v4431_v50 = vrot.slane %v4429_v32, 4  ;;  %6596 = vmatprep.mubr.msk.bf16.mxu1 %vm349_vm1, %v5839_v29  ;;  %v4409_v36 = vrot.slane %v4408_v56, 4  ;;  %v6192_v29 = vld [vmem:[%s7197_s25 + $0x7c] sm:$0xf]  ;;  %v6198_v52 = vld [vmem:[%s7197_s25 + $0x94] sm:$0xf] }
  0xce   : > { %v4437_v53 = vrot.slane %v4435_v42, 5  ;;  %v4442_v12 = vrot.slane %v4440_v6, 4  ;;  %v4443_v55 = vshll.u32 %v6188_v37, 16  ;;  %v4423_v49 = vrot.slane %v4422_v46, 4  ;;  %v6199_v42 = vld [vmem:[%s7197_s25 + $0x98] sm:$0x1] }
  0xcf   : > { %v4432_v57 = vor.u32 %v4431_v50, %v4427_v23  ;;  %v4449_v8 = vshll.u32 %v6189_v34, 16  ;;  %v4453_v28 = vshrl.u32 %v6189_v34, 16  ;;  %v4414_v58 = vsel %vm7244_vm4, %v4409_v36, %v4413_v38  ;;  %v6196_v38 = vld [vmem:[%s7197_s25 + $0x8c] sm:$0x1]  ;;  %v6200_v50 = vld [vmem:[%s7197_s25 + $0x9c] sm:$0xf] }
  0xd0   : > { %6747 = vmatmul.mubr.msk.bf16.gmra.mrb[4].mxu0 %vm349_vm1, %v7959_v44  ;;  %v4445_v1 = vrot.slane %v4443_v55, 5  ;;  %v4459_v41 = vshll.u32 %v6190_v54, 16  ;;  %v4464_v63 = vshrl.u32 %v6191_v51, 16  ;;  %v6221_v2 = vcombine.low %v4404_v45, %v4414_v58  ;;  %v6197_v54 = vld [vmem:[%s7197_s25 + $0x90] sm:$0xf] }
  0xd1   : > { %6750 = vmatprep.mubr.msk.bf16.mxu0 %vm349_vm1, %v6220_v35  ;;  %v4428_v5 = vsel %vm7244_vm4, %v4423_v49, %v4427_v23  ;;  %v4433_v10 = vrot.slane %v4432_v57, 4  ;;  %v4451_v25 = vrot.slane %v4449_v8, 5  ;;  %v4455_v44 = vrot.slane %v4453_v28, 4 }
  0xd2   : > { %v4446_v13 = vor.u32 %v4445_v1, %v4442_v12  ;;  %v4461_v24 = vrot.slane %v4459_v41, 5  ;;  %v4466_v30 = vrot.slane %v4464_v63, 4  ;;  %v4467_v40 = vshll.u32 %v6191_v51, 16  ;;  %v7117_v51 = vld [vmem:[%s7197_s25 + $0xc] sm:$0xff]   ;;  %v6201_v63 = vld [vmem:[%s7197_s25 + $0xa0] sm:$0xf] }
  0xd3   : > { %v4438_v31 = vsel %vm7244_vm4, %v4433_v10, %v4437_v53  ;;  %v4473_v16 = vshll.u32 %v6192_v29, 16  ;;  %v4477_v33 = vshrl.u32 %v6192_v29, 16  ;;  %v4456_v61 = vor.u32 %v4455_v44, %v4451_v25 }
  0xd4   : > { %v6222_v9 = vcombine.low %v4428_v5, %v4438_v31  ;;  %v4447_v18 = vrot.slane %v4446_v13, 4  ;;  %v4483_v20 = vshll.u32 %v6193_v39, 16  ;;  %6597 = vmatmul.mubr.msk.bf16.gmra.mrb[24].mxu1 %vm349_vm1, %v5840_v26  ;;  %v4469_v37 = vrot.slane %v4467_v40, 5  ;;  %v6202_v13 = vld [vmem:[%s7197_s25 + $0xa4] sm:$0x1]  ;;  %v7118_v31 = vld [vmem:[%s7197_s25 + $0x18] sm:$0xff]  }
  0xd5   : > { %v4475_v17 = vrot.slane %v4473_v16, 5  ;;  %v4479_v21 = vrot.slane %v4477_v33, 4  ;;  %v4488_v60 = vshrl.u32 %v6194_v47, 16  ;;  %6600 = vmatprep.mubr.msk.bf16.mxu1 %vm349_vm1, %v5841_v7  ;;  %v4457_v27 = vrot.slane %v4456_v61, 4 }
  0xd6   : > { %v4452_v34 = vsel %vm7244_vm4, %v4447_v18, %v4451_v25  ;;  %v4485_v15 = vrot.slane %v4483_v20, 5  ;;  %v4491_v48 = vshll.u32 %v6194_v47, 16  ;;  %v4470_v22 = vor.u32 %v4469_v37, %v4466_v30  ;;  %v6204_v18 = vld [vmem:[%s7197_s25 + $0xac] sm:$0xf] }
  0xd7   : > { %v4480_v26 = vor.u32 %v4479_v21, %v4475_v17  ;;  %v4490_v23 = vrot.slane %v4488_v60, 4  ;;  %v4497_v32 = vshll.u32 %v6195_v59, 16  ;;  %v4462_v11 = vsel %vm7244_vm4, %v4457_v27, %v4461_v24  ;;  %v6205_v21 = vld [vmem:[%s7197_s25 + $0xb0] sm:$0x1] }
  0xd8   : > { %6751 = vmatmul.mubr.msk.bf16.gmra.mrb[8].mxu0 %vm349_vm1, %v6221_v2  ;;  %v4493_v19 = vrot.slane %v4491_v48, 5  ;;  %v4501_v7 = vshrl.u32 %v6195_v59, 16  ;;  %v4507_v56 = vshll.u32 %v6196_v38, 16  ;;  %v6223_v6 = vcombine.low %v4452_v34, %v4462_v11  ;;  %v6203_v59 = vld [vmem:[%s7197_s25 + $0xa8] sm:$0xf] }
  0xd9   : > { %6754 = vmatprep.mubr.msk.bf16.mxu0 %vm349_vm1, %v6222_v9  ;;  %v4471_v35 = vrot.slane %v4470_v22, 4  ;;  %v4481_v45 = vrot.slane %v4480_v26, 4  ;;  %v4499_v46 = vrot.slane %v4497_v32, 5  ;;  %v4512_v55 = vshrl.u32 %v6197_v54, 16  ;;  %v7119_v38 = vld [vmem:[%s7197_s25 + $0x24] sm:$0xff]  }
  0xda   : > { %v4494_v36 = vor.u32 %v4493_v19, %v4490_v23  ;;  %v4503_v53 = vrot.slane %v4501_v7, 4  ;;  %v4509_v12 = vrot.slane %v4507_v56, 5  ;;  %v4515_v8 = vshll.u32 %v6197_v54, 16  ;;  %v6206_v48 = vld [vmem:[%s7197_s25 + $0xb4] sm:$0xf] }
  0xdb   : > { %v4476_v49 = vsel %vm7244_vm4, %v4471_v35, %v4475_v17  ;;  %v4486_v57 = vsel %vm7244_vm4, %v4481_v45, %v4485_v15  ;;  %v4521_v28 = vshll.u32 %v6198_v52, 16  ;;  %v4514_v29 = vrot.slane %v4512_v55, 4  ;;  %v6207_v35 = vld [vmem:[%s7197_s25 + $0xb8] sm:$0xf]  ;;  %v6208_v55 = vld [vmem:[%s7197_s25 + $0xbc] sm:$0x1] }
  0xdc   : > { %v6224_v58 = vcombine.low %v4476_v49, %v4486_v57  ;;  %v4495_v1 = vrot.slane %v4494_v36, 4  ;;  %v4504_v41 = vor.u32 %v4503_v53, %v4499_v46  ;;  %6601 = vmatmul.mubr.msk.bf16.gmra.mrb[28].mxu1 %vm349_vm1, %v5842_v3  ;;  %v4517_v2 = vrot.slane %v4515_v8, 5  ;;  %v7120_v36 = vld [vmem:[%s7197_s25 + $0x30] sm:$0xff]   ;;  %v7121_v8 = vld [vmem:[%s7197_s25 + $0x3c] sm:$0xff]  }
  0xdd   : > { %v4523_v5 = vrot.slane %v4521_v28, 5  ;;  %v4525_v10 = vshrl.u32 %v6198_v52, 16  ;;  %v4531_v25 = vshll.u32 %v6199_v42, 16  ;;  %6606 = vmatprep.mubr.msk.bf16.mxu1 %vm349_vm1, %v7117_v51  ;;  %v4536_v44 = vshrl.u32 %v6200_v50, 16 }
  0xde   : > { %v4500_v39 = vsel %vm7244_vm4, %v4495_v1, %v4499_v46  ;;  %v4505_v47 = vrot.slane %v4504_v41, 4  ;;  %v4539_v24 = vshll.u32 %v6200_v50, 16  ;;  %v4518_v30 = vor.u32 %v4517_v2, %v4514_v29  ;;  %v6209_v41 = vld [vmem:[%s7197_s25 + $0xc0] sm:$0xf] }
  0xdf   : > { %v4527_v62 = vrot.slane %v4525_v10, 4  ;;  %v4533_v14 = vrot.slane %v4531_v25, 5  ;;  %v4545_v3 = vshll.u32 %v6201_v63, 16  ;;  %v4538_v16 = vrot.slane %v4536_v44, 4  ;;  %v6210_v10 = vld [vmem:[%s7197_s25 + $0xc4] sm:$0xf] }
  0xe0   : > { %6755 = vmatmul.mubr.msk.bf16.gmra.mrb[12].mxu0 %vm349_vm1, %v6223_v6  ;;  %v4510_v40 = vsel %vm7244_vm4, %v4505_v47, %v4509_v12  ;;  %v4541_v33 = vrot.slane %v4539_v24, 5  ;;  %v4549_v9 = vshrl.u32 %v6201_v63, 16  ;;  %v4519_v20 = vrot.slane %v4518_v30, 4  ;;  %v6211_v44 = vld [vmem:[%s7197_s25 + $0xc8] sm:$0x1] }
  0xe1   : > { %6758 = vmatprep.mubr.msk.bf16.mxu0 %vm349_vm1, %v6224_v58  ;;  %v6225_v61 = vcombine.low %v4500_v39, %v4510_v40  ;;  %v4528_v37 = vor.u32 %v4527_v62, %v4523_v5  ;;  %v4547_v17 = vrot.slane %v4545_v3, 5  ;;  %v4555_v27 = vshll.u32 %v6202_v13, 16 }
  0xe2   : > { %v4542_v60 = vor.u32 %v4541_v33, %v4538_v16  ;;  %v4551_v34 = vrot.slane %v4549_v9, 4  ;;  %v4560_v15 = vshrl.u32 %v6203_v59, 16  ;;  %v4524_v22 = vsel %vm7244_vm4, %v4519_v20, %v4523_v5  ;;  %v6212_v16 = vld [vmem:[%s7197_s25 + $0xcc] sm:$0xf]  ;;  %v6213_v20 = vld [vmem:[%s7197_s25 + $0xd0] sm:$0xf] }
  0xe3   : > { %v4529_v26 = vrot.slane %v4528_v37, 4  ;;  %v4563_v23 = vshll.u32 %v6203_v59, 16  ;;  %v4569_v32 = vshll.u32 %v6204_v18, 16  ;;  %v4557_v11 = vrot.slane %v4555_v27, 5 }
  0xe4   : > { %v4543_v54 = vrot.slane %v4542_v60, 4  ;;  %v4552_v52 = vor.u32 %v4551_v34, %v4547_v17  ;;  %v4562_v19 = vrot.slane %v4560_v15, 4  ;;  %6607 = vmatmul.mubr.msk.bf16.vlgmr.msra.gmra.mrb[0].mxu1 %vm349_vm1, %v7118_v31  ;;  %v4573_v6 = vshrl.u32 %v6204_v18, 16  ;;  %v6214_v60 = vld [vmem:[%s7197_s25 + $0xd4] sm:$0x1]  ;;  %v7122_v34 = vld [vmem:[%s7197_s25 + $0x48] sm:$0xff]  }
  0xe5   : > { %v4534_v7 = vsel %vm7244_vm4, %v4529_v26, %v4533_v14  ;;  %v4565_v56 = vrot.slane %v4563_v23, 5  ;;  %v4571_v42 = vrot.slane %v4569_v32, 5  ;;  %6610 = vmatprep.mubr.msk.bf16.mxu1 %vm349_vm1, %v7119_v38  ;;  %6809 = vmatpush3.bf16.msra.mxu1 %v7185_v4  ;;  %v4579_v51 = vshll.u32 %v6205_v21, 16  ;;  %v6248_v26 = vld [vmem:[%s7197_s25 + $0x18] sm:$0xe] }
  0xe6   : > { %v6226_v45 = vcombine.low %v4524_v22, %v4534_v7  ;;  %v4548_v46 = vsel %vm7244_vm4, %v4543_v54, %v4547_v17  ;;  %v4553_v50 = vrot.slane %v4552_v52, 4  ;;  %v4575_v12 = vrot.slane %v4573_v6, 4  ;;  %v6249_v23 = vld [vmem:[%s7197_s25 + $0x1c] sm:$0xf]  ;;  %v7123_v32 = vld [vmem:[%s7197_s25 + $0x54] sm:$0xff]  }
  0xe7   : > { %v4566_v53 = vor.u32 %v4565_v56, %v4562_v19  ;;  %v4584_v49 = vshrl.u32 %v6206_v48, 16  ;;  %v4587_v57 = vshll.u32 %v6206_v48, 16  ;;  %v4581_v28 = vrot.slane %v4579_v51, 5  ;;  %v6250_v7 = vld [vmem:[%s7197_s25 + $0x20] sm:$0x1] }
  0xe8   : > { %6759 = vmatmul.mubr.msk.bf16.gmra.mrb[16].mxu0 %vm349_vm1, %v6225_v61  ;;  %v4558_v4 = vsel %vm7244_vm4, %v4553_v50, %v4557_v11  ;;  %v4593_v58 = vshll.u32 %v6207_v35, 16  ;;  %v4597_v1 = vshrl.u32 %v6207_v35, 16  ;;  %v4576_v2 = vor.u32 %v4575_v12, %v4571_v42  ;;  %v6252_v56 = vld [vmem:[%s7197_s25 + $0x28] sm:$0xf] }
  0xe9   : > { %6762 = vmatprep.mubr.msk.bf16.mxu0 %vm349_vm1, %v6226_v45  ;;  %v6227_v29 = vcombine.low %v4548_v46, %v4558_v4  ;;  %v4567_v63 = vrot.slane %v4566_v53, 4  ;;  %v4586_v5 = vrot.slane %v4584_v49, 4  ;;  %v4589_v25 = vrot.slane %v4587_v57, 5  ;;  %v6251_v45 = vld [vmem:[%s7197_s25 + $0x24] sm:$0xe] }
  0xea   : > { %v4595_v39 = vrot.slane %v4593_v58, 5  ;;  %v4599_v47 = vrot.slane %v4597_v1, 4  ;;  %v4603_v13 = vshll.u32 %v6208_v55, 16  ;;  %v4577_v30 = vrot.slane %v4576_v2, 4  ;;  %v6253_v57 = vld [vmem:[%s7197_s25 + $0x2c] sm:$0x1] }
  0xeb   : > { %v4572_v24 = vsel %vm7244_vm4, %v4567_v63, %v4571_v42  ;;  %v4608_v62 = vshrl.u32 %v6209_v41, 16  ;;  %v4611_v14 = vshll.u32 %v6209_v41, 16  ;;  %v4590_v3 = vor.u32 %v4589_v25, %v4586_v5  ;;  %v6254_v1 = vld [vmem:[%s7197_s25 + $0x30] sm:$0xe]  ;;  %v6255_v5 = vld [vmem:[%s7197_s25 + $0x34] sm:$0xf] }
  0xec   : > { %v4600_v59 = vor.u32 %v4599_v47, %v4595_v39  ;;  %v4605_v31 = vrot.slane %v4603_v13, 5  ;;  %v4617_v40 = vshll.u32 %v6210_v10, 16  ;;  %6611 = vmatmul.mubr.msk.bf16.gmra.mrb[4].mxu1 %vm349_vm1, %v7120_v36  ;;  %v4582_v33 = vsel %vm7244_vm4, %v4577_v30, %v4581_v28  ;;  %v6256_v13 = vld [vmem:[%s7197_s25 + $0x38] sm:$0x1] }
  0xed   : > { %v4610_v9 = vrot.slane %v4608_v62, 4  ;;  %v4613_v18 = vrot.slane %v4611_v14, 5  ;;  %v4621_v61 = vshrl.u32 %v6210_v10, 16  ;;  %6614 = vmatprep.mubr.msk.bf16.mxu1 %vm349_vm1, %v7121_v8  ;;  %v6228_v37 = vcombine.low %v4572_v24, %v4582_v33  ;;  %v6257_v62 = vld [vmem:[%s7197_s25 + $0x3c] sm:$0xe]  ;;  %v7124_v14 = vld [vmem:[%s7197_s25 + $0x60] sm:$0xff]  }
  0xee   : > { %v4591_v17 = vrot.slane %v4590_v3, 4  ;;  %v4601_v21 = vrot.slane %v4600_v59, 4  ;;  %v4619_v38 = vrot.slane %v4617_v40, 5  ;;  %v4627_v48 = vshll.u32 %v6211_v44, 16  ;;  %v7125_v33 = vld [vmem:[%s7197_s25 + $0x6c] sm:$0xff]  }
  0xef   : > { %v4614_v27 = vor.u32 %v4613_v18, %v4610_v9  ;;  %v4623_v15 = vrot.slane %v4621_v61, 4  ;;  %v4632_v22 = vshrl.u32 %v6212_v16, 16  ;;  %v4635_v11 = vshll.u32 %v6212_v16, 16  ;;  %v6258_v16 = vld [vmem:[%s7197_s25 + $0x40] sm:$0xf] }
  0xf0   : > { %6763 = vmatmul.mubr.msk.bf16.gmra.mrb[20].mxu0 %vm349_vm1, %v6227_v29  ;;  %v4596_v54 = vsel %vm7244_vm4, %v4591_v17, %v4595_v39  ;;  %v4606_v52 = vsel %vm7244_vm4, %v4601_v21, %v4605_v31  ;;  %v4641_v19 = vshll.u32 %v6213_v20, 16  ;;  %v4629_v35 = vrot.slane %v4627_v48, 5 }
  0xf1   : > { %6766 = vmatprep.mubr.msk.bf16.mxu0 %vm349_vm1, %v6228_v37  ;;  %v4615_v42 = vrot.slane %v4614_v27, 4  ;;  %v4624_v6 = vor.u32 %v4623_v15, %v4619_v38  ;;  %v4634_v46 = vrot.slane %v4632_v22, 4  ;;  %v4637_v50 = vrot.slane %v4635_v11, 5  ;;  %v6261_v37 = vld [vmem:[%s7197_s25 + $0x4c] sm:$0xf] }
  0xf2   : > { %v4643_v51 = vrot.slane %v4641_v19, 5  ;;  %v4645_v36 = vshrl.u32 %v6213_v20, 16  ;;  %v6229_v53 = vcombine.low %v4596_v54, %v4606_v52  ;;  %v4651_v49 = vshll.u32 %v6214_v60, 16  ;;  %v6260_v20 = vld [vmem:[%s7197_s25 + $0x48] sm:$0xe] }
  0xf3   : > { %v4620_v12 = vsel %vm7244_vm4, %v4615_v42, %v4619_v38  ;;  %v4625_v55 = vrot.slane %v4624_v6, 4  ;;  %v4638_v8 = vor.u32 %v4637_v50, %v4634_v46  ;;  %v6296_v28 = vrot.slane %v6248_v26, 9  ;;  %v6259_v60 = vld [vmem:[%s7197_s25 + $0x44] sm:$0x1]  ;;  %v6263_v27 = vld [vmem:[%s7197_s25 + $0x54] sm:$0xe] }
  0xf4   : > { %v4647_v4 = vrot.slane %v4645_v36, 4  ;;  %v5111_v58 = vrot.slane %v6249_v23, 5  ;;  %6615 = vmatmul.mubr.msk.bf16.gmra.mrb[8].mxu1 %vm349_vm1, %v7122_v34  ;;  %v4653_v29 = vrot.slane %v4651_v49, 5  ;;  %v5114_v63 = vrot.slane %v6250_v7, 5  ;;  %v6262_v34 = vld [vmem:[%s7197_s25 + $0x50] sm:$0x1] }
  0xf5   : > { %v4630_v41 = vsel %vm7244_vm4, %v4625_v55, %v4629_v35  ;;  %v5118_v2 = vrot.slane %v6252_v56, 5  ;;  %6618 = vmatprep.mubr.msk.bf16.mxu1 %vm349_vm1, %v7123_v32  ;;  %v4639_v25 = vrot.slane %v4638_v8, 4  ;;  %v6297_v47 = vrot.slane %v6251_v45, 9  ;;  %v6264_v23 = vld [vmem:[%s7197_s25 + $0x58] sm:$0xf] }
  0xf6   : > { %v6230_v10 = vcombine.low %v4620_v12, %v4630_v41  ;;  %v4648_v39 = vor.u32 %v4647_v4, %v4643_v51  ;;  %v5113_v44 = vrot.slane %v5111_v58, 4  ;;  %v5121_v30 = vrot.slane %v6253_v57, 5  ;;  %v6265_v19 = vld [vmem:[%s7197_s25 + $0x5c] sm:$0x1]  ;;  %v5948_v7 = vld [vmem:[%s7197_s25 + $0x6c] sm:$0xf] }
  0xf7   : > { %v5120_v24 = vrot.slane %v5118_v2, 4  ;;  %v5112_v59 = vsel %vm7319_vm7, %v6296_v28, %v5111_v58  ;;  %v6298_v31 = vrot.slane %v6254_v1, 9  ;;  %v5125_v40 = vrot.slane %v6255_v5, 5  ;;  %v5949_v45 = vld [vmem:[%s7197_s25 + $0x70] sm:$0xf]  ;;  %v7126_v41 = vld [vmem:[%s7197_s25 + $0x78] sm:$0xff]  }
  0xf8   : > { %6767 = vmatmul.mubr.msk.bf16.gmra.mrb[24].mxu0 %vm349_vm1, %v6229_v53  ;;  %v4649_v3 = vrot.slane %v4648_v39, 4  ;;  %v4644_v9 = vsel %vm7244_vm4, %v4639_v25, %v4643_v51  ;;  %v5115_v18 = vsel %vm7319_vm7, %v5113_v44, %v5114_v63  ;;  %v5128_v61 = vrot.slane %v6256_v13, 5  ;;  %v5950_v55 = vld [vmem:[%s7197_s25 + $0x74] sm:$0x1]  ;;  %v5951_v57 = vld [vmem:[%s7197_s25 + $0x78] sm:$0xf] }
  0xf9   : > { %6770 = vmatprep.mubr.msk.bf16.mxu0 %vm349_vm1, %v6230_v10  ;;  %v8127_v21 = vsel %vm7319_vm7, %v6297_v47, %v5118_v2  ;;  %v8131_v38 = vsel %vm7319_vm7, %v5120_v24, %v5121_v30  ;;  %v6313_v15 = vcombine.low %v5112_v59, %v5115_v18  ;;  %v5127_v48 = vrot.slane %v5125_v40, 4  ;;  %v5952_v1 = vld [vmem:[%s7197_s25 + $0x7c] sm:$0xf]  ;;  %v7127_v10 = vld [vmem:[%s7197_s25 + $0x84] sm:$0xff]   ;;  %v5953_v24 = vld [vmem:[%s7197_s25 + $0x80] sm:$0x1] }
  0xfa   : > { %v4654_v17 = vsel %vm7244_vm4, %v4649_v3, %v4653_v29  ;;  %v6299_v22 = vrot.slane %v6257_v62, 9  ;;  %v5132_v26 = vrot.slane %v6258_v16, 5  ;;  %v8139_v54 = vsel %vm7319_vm7, %v6298_v31, %v5125_v40  ;;  %v6266_v16 = vld [vmem:[%s7197_s25 + $0x60] sm:$0xe] }
  0xfb   : > { %v6231_v32 = vcombine.low %v4644_v9, %v4654_v17  ;;  %v6300_v52 = vrot.slane %v6260_v20, 9  ;;  %v5139_v11 = vrot.slane %v6261_v37, 5  ;;  %v8146_v56 = vsel %vm7319_vm7, %v5127_v48, %v5128_v61  ;;  %v6270_v37 = vld [vmem:[%s7197_s25 + $0x70] sm:$0xf]  ;;  %v6268_v48 = vld [vmem:[%s7197_s25 + $0x68] sm:$0x1] }
  0xfc   : > { %6619 = vmatmul.mubr.msk.bf16.gmra.mrb[12].mxu1 %vm349_vm1, %v7124_v14  ;;  %v5134_v42 = vrot.slane %v5132_v26, 4  ;;  %v5135_v6 = vrot.slane %v6259_v60, 5  ;;  %v6301_v35 = vrot.slane %v6263_v27, 9  ;;  %v6314_v46 = vcombine.low %v8127_v21, %v8131_v38 }
  0xfd   : > { %6622 = vmatprep.mubr.msk.bf16.mxu1 %vm349_vm1, %v7125_v33  ;;  %v5142_v50 = vrot.slane %v6262_v34, 5  ;;  %v5146_v51 = vrot.slane %v6264_v23, 5  ;;  %v6315_v36 = vcombine.low %v8139_v54, %v8146_v56  ;;  %v8156_v53 = vsel %vm7319_vm7, %v6299_v22, %v5132_v26  ;;  %v6267_v33 = vld [vmem:[%s7197_s25 + $0x64] sm:$0xf]  ;;  %v6269_v34 = vld [vmem:[%s7197_s25 + $0x6c] sm:$0xe] }
  0xfe   : > { %v8160_v12 = vsel %vm7319_vm7, %v6300_v52, %v5139_v11  ;;  %v2685_v49 = vshrl.u32 %v5948_v7, 16  ;;  %v5141_v8 = vrot.slane %v5139_v11, 4  ;;  %v5149_v4 = vrot.slane %v6265_v19, 5  ;;  %v7128_v23 = vld [vmem:[%s7197_s25 + $0x90] sm:$0xff]   ;;  %v5954_v19 = vld [vmem:[%s7197_s25 + $0x84] sm:$0xf] }
  0xff   : > { %v2688_v28 = vshll.u32 %v5948_v7, 16  ;;  %v2694_v58 = vshll.u32 %v5949_v45, 16  ;;  %v8170_v29 = vsel %vm7319_vm7, %v5134_v42, %v5135_v6  ;;  %v8174_v63 = vsel %vm7319_vm7, %v6301_v35, %v5146_v51  ;;  %v6271_v6 = vld [vmem:[%s7197_s25 + $0x74] sm:$0x1] }
 0x100   : > { %6771 = vmatmul.mubr.msk.bf16.gmra.mrb[28].mxu0 %vm349_vm1, %v6231_v32  ;;  %v2687_v2 = vrot.slane %v2685_v49, 4  ;;  %v2698_v5 = vshrl.u32 %v5949_v45, 16  ;;  %v5148_v25 = vrot.slane %v5146_v51, 4  ;;  %v2704_v13 = vshll.u32 %v5950_v55, 16  ;;  %v5955_v45 = vld [vmem:[%s7197_s25 + $0x88] sm:$0xf] }
 0x101   : > { %6776 = vmatprep.mubr.msk.bf16.mxu0 %vm349_vm1, %v6313_v15  ;;  %v2690_v39 = vrot.slane %v2688_v28, 5  ;;  %v2696_v47 = vrot.slane %v2694_v58, 5  ;;  %v2709_v30 = vshrl.u32 %v5951_v57, 16  ;;  %v2712_v62 = vshll.u32 %v5951_v57, 16  ;;  %v5956_v57 = vld [vmem:[%s7197_s25 + $0x8c] sm:$0x1] }
 0x102   : > { %v2700_v44 = vrot.slane %v2698_v5, 4  ;;  %v2718_v14 = vshll.u32 %v5952_v1, 16  ;;  %v8180_v3 = vsel %vm7319_vm7, %v5141_v8, %v5142_v50  ;;  %v2706_v31 = vrot.slane %v2704_v13, 5 }
 0x103   : > { %v2691_v59 = vor.u32 %v2690_v39, %v2687_v2  ;;  %v2722_v40 = vshrl.u32 %v5952_v1, 16  ;;  %v2711_v18 = vrot.slane %v2709_v30, 4  ;;  %v2714_v61 = vrot.slane %v2712_v62, 5  ;;  %v5959_v39 = vld [vmem:[%s7197_s25 + $0x98] sm:$0x1] }
 0x104   : > { %6623 = vmatmul.mubr.msk.bf16.gmra.mrb[16].mxu1 %vm349_vm1, %v7126_v41  ;;  %v2701_v9 = vor.u32 %v2700_v44, %v2696_v47  ;;  %v8185_v20 = vrot.slane %v2718_v14, 5  ;;  %v8191_v17 = vsel %vm7319_vm7, %v5148_v25, %v5149_v4  ;;  %v2728_v60 = vshll.u32 %v5953_v24, 16  ;;  %v5957_v4 = vld [vmem:[%s7197_s25 + $0x90] sm:$0xf]  ;;  %v6272_v30 = vld [vmem:[%s7197_s25 + $0x78] sm:$0xe] }
 0x105   : > { %6626 = vmatprep.mubr.msk.bf16.mxu1 %vm349_vm1, %v7127_v10  ;;  %v2692_v21 = vrot.slane %v2691_v59, 4  ;;  %v2724_v38 = vrot.slane %v2722_v40, 4  ;;  %v2715_v15 = vor.u32 %v2714_v61, %v2711_v18  ;;  %v6302_v22 = vrot.slane %v6266_v16, 9  ;;  %v6274_v18 = vld [vmem:[%s7197_s25 + $0x80] sm:$0x1] }
 0x106   : > { %v2702_v27 = vrot.slane %v2701_v9, 4  ;;  %v5153_v26 = vrot.slane %v6267_v33, 5  ;;  %v6316_v32 = vcombine.low %v8156_v53, %v8170_v29  ;;  %v5160_v11 = vrot.slane %v6270_v37, 5  ;;  %v5958_v29 = vld [vmem:[%s7197_s25 + $0x94] sm:$0xf]  ;;  %v7130_v37 = vld [vmem:[%s7197_s25 + $0xa8] sm:$0xff]  }
 0x107   : > { %v2697_v54 = vsel %vm7244_vm4, %v2692_v21, %v2696_v47  ;;  %v2725_v52 = vor.u32 %v2724_v38, %v8185_v20  ;;  %v6317_v7 = vcombine.low %v8160_v12, %v8180_v3  ;;  %v8208_v42 = vrot.slane %v2715_v15, 4  ;;  %v6275_v61 = vld [vmem:[%s7197_s25 + $0x84] sm:$0xe]  ;;  %v7131_v15 = vld [vmem:[%s7197_s25 + $0xb4] sm:$0xff]  }
 0x108   : > { %6777 = vmatmul.mubr.msk.bf16.vlgmr.msra.gmra.mrb[0].mxu0 %vm349_vm1, %v6314_v46  ;;  %v2707_v56 = vsel %vm7244_vm4, %v2702_v27, %v2706_v31  ;;  %v6303_v35 = vrot.slane %v6269_v34, 9  ;;  %v7129_v46 = vld [vmem:[%s7197_s25 + $0x9c] sm:$0xff]   ;;  %v6318_v50 = vcombine.low %v8174_v63, %v8191_v17  ;;  %v8215_v51 = vrot.slane %v2728_v60, 5  ;;  %v6276_v27 = vld [vmem:[%s7197_s25 + $0x88] sm:$0xf] }
 0x109   : > { %6780 = vmatprep.mubr.msk.bf16.mxu0 %vm349_vm1, %v6315_v36  ;;  %v5155_v36 = vrot.slane %v5153_v26, 4  ;;  %v5156_v53 = vrot.slane %v6268_v48, 5  ;;  %v8217_v55 = vcombine.low %v2697_v54, %v2707_v56  ;;  %v8219_v12 = vrot.slane %v2725_v52, 4  ;;  %v6273_v31 = vld [vmem:[%s7197_s25 + $0x7c] sm:$0xf] }
 0x10a   : > { %v8223_v49 = vsel %vm7319_vm7, %v6302_v22, %v5153_v26  ;;  %v2733_v8 = vshrl.u32 %v5954_v19, 16  ;;  %v5162_v28 = vrot.slane %v5160_v11, 4  ;;  %v5163_v58 = vrot.slane %v6271_v6, 5  ;;  %v6277_v56 = vld [vmem:[%s7197_s25 + $0x8c] sm:$0x1] }
 0x10b   : > { %v2736_v1 = vshll.u32 %v5954_v19, 16  ;;  %v2742_v41 = vshll.u32 %v5955_v45, 16  ;;  %v2721_v2 = vsel %vm7244_vm4, %v8208_v42, %v8185_v20  ;;  %v8235_v5 = vsel %vm7319_vm7, %v6303_v35, %v5160_v11 }
 0x10c   : > { %6627 = vmatmul.mubr.msk.bf16.gmra.mrb[20].mxu1 %vm349_vm1, %v7128_v23  ;;  %v2735_v10 = vrot.slane %v2733_v8, 4  ;;  %v2746_v25 = vshrl.u32 %v5955_v45, 16  ;;  %v8241_v47 = vsel %vm7319_vm7, %v5155_v36, %v5156_v53  ;;  %v2752_v24 = vshll.u32 %v5956_v57, 16  ;;  %v5960_v45 = vld [vmem:[%s7197_s25 + $0x9c] sm:$0xf] }
 0x10d   : > { %6630 = vmatprep.mubr.msk.bf16.mxu1 %vm349_vm1, %v7129_v46  ;;  %v2738_v13 = vrot.slane %v2736_v1, 5  ;;  %v8243_v44 = vrot.slane %v2742_v41, 5  ;;  %v2757_v14 = vshrl.u32 %v5957_v4, 16  ;;  %v2760_v3 = vshll.u32 %v5957_v4, 16  ;;  %v5961_v8 = vld [vmem:[%s7197_s25 + $0xa0] sm:$0xf] }
 0x10e   : > { %v2748_v62 = vrot.slane %v2746_v25, 4  ;;  %v2766_v59 = vshll.u32 %v5958_v29, 16  ;;  %v8250_v40 = vsel %vm7319_vm7, %v5162_v28, %v5163_v58  ;;  %v2770_v33 = vshrl.u32 %v5958_v29, 16  ;;  %v5963_v25 = vld [vmem:[%s7197_s25 + $0xa8] sm:$0xf] }
 0x10f   : > { %v2739_v16 = vor.u32 %v2738_v13, %v2735_v10  ;;  %v2776_v9 = vshll.u32 %v5959_v39, 16  ;;  %v2759_v38 = vrot.slane %v2757_v14, 4  ;;  %v2762_v60 = vrot.slane %v2760_v3, 5 }
 0x110   : > { %6781 = vmatmul.mubr.msk.bf16.gmra.mrb[4].mxu0 %vm349_vm1, %v6316_v32  ;;  %v2749_v21 = vor.u32 %v2748_v62, %v8243_v44  ;;  %v8257_v34 = vrot.slane %v2766_v59, 5  ;;  %v8263_v22 = vrot.slane %v2752_v24, 5  ;;  %v2772_v26 = vrot.slane %v2770_v33, 4  ;;  %v5964_v24 = vld [vmem:[%s7197_s25 + $0xac] sm:$0xf] }
 0x111   : > { %6784 = vmatprep.mubr.msk.bf16.mxu0 %vm349_vm1, %v6317_v7  ;;  %v8261_v48 = vrot.slane %v2739_v16, 4  ;;  %v6304_v23 = vrot.slane %v6272_v30, 9  ;;  %v2763_v54 = vor.u32 %v2762_v60, %v2759_v38  ;;  %v5167_v52 = vrot.slane %v6273_v31, 5  ;;  %v7132_v30 = vld [vmem:[%s7197_s25 + $0xc0] sm:$0xff]  }
 0x112   : > { %v8265_v32 = vrot.slane %v2749_v21, 4  ;;  %v5170_v11 = vrot.slane %v6274_v18, 5  ;;  %v2731_v19 = vsel %vm7244_vm4, %v8219_v12, %v8215_v51  ;;  %v2773_v7 = vor.u32 %v2772_v26, %v8257_v34  ;;  %v5967_v12 = vld [vmem:[%s7197_s25 + $0xb8] sm:$0xf] }
 0x113   : > { %v6305_v6 = vrot.slane %v6275_v61, 9  ;;  %v5174_v35 = vrot.slane %v6276_v27, 5  ;;  %v6319_v46 = vcombine.low %v8223_v49, %v8241_v47  ;;  %v8277_v36 = vrot.slane %v2763_v54, 4  ;;  %v6278_v61 = vld [vmem:[%s7197_s25 + $0x90] sm:$0xe] }
 0x114   : > { %6631 = vmatmul.mubr.msk.bf16.gmra.mrb[24].mxu1 %vm349_vm1, %v7130_v37  ;;  %v8279_v53 = vrot.slane %v2776_v9, 5  ;;  %v5169_v57 = vrot.slane %v5167_v52, 4  ;;  %v6320_v4 = vcombine.low %v8235_v5, %v8250_v40  ;;  %v2745_v28 = vsel %vm7244_vm4, %v8261_v48, %v8243_v44  ;;  %v5962_v5 = vld [vmem:[%s7197_s25 + $0xa4] sm:$0x1]  ;;  %v5965_v40 = vld [vmem:[%s7197_s25 + $0xb0] sm:$0x1] }
 0x115   : > { %6634 = vmatprep.mubr.msk.bf16.mxu1 %vm349_vm1, %v7131_v15  ;;  %v2755_v49 = vsel %vm7244_vm4, %v8265_v32, %v8263_v22  ;;  %v2774_v58 = vrot.slane %v2773_v7, 4  ;;  %v5168_v1 = vsel %vm7319_vm7, %v6304_v23, %v5167_v52  ;;  %v8299_v29 = vsel %vm7319_vm7, %v6305_v6, %v5174_v35  ;;  %v6280_v27 = vld [vmem:[%s7197_s25 + $0x98] sm:$0x1]  ;;  %v6282_v23 = vld [vmem:[%s7197_s25 + $0xa0] sm:$0xf] }
 0x116   : > { %v5171_v41 = vsel %vm7319_vm7, %v5169_v57, %v5170_v11  ;;  %v2781_v10 = vshrl.u32 %v5960_v45, 16  ;;  %v5176_v39 = vrot.slane %v5174_v35, 4  ;;  %v5177_v47 = vrot.slane %v6277_v56, 5  ;;  %v5966_v57 = vld [vmem:[%s7197_s25 + $0xb4] sm:$0xf] }
 0x117   : > { %v2784_v13 = vshll.u32 %v5960_v45, 16  ;;  %v2790_v44 = vshll.u32 %v5961_v8, 16  ;;  %v2769_v62 = vsel %vm7244_vm4, %v8277_v36, %v8257_v34  ;;  %v2779_v63 = vsel %vm7244_vm4, %v2774_v58, %v8279_v53  ;;  %v6279_v34 = vld [vmem:[%s7197_s25 + $0x94] sm:$0xf]  ;;  %v6281_v45 = vld [vmem:[%s7197_s25 + $0x9c] sm:$0xe] }
 0x118   : > { %6785 = vmatmul.mubr.msk.bf16.gmra.mrb[8].mxu0 %vm349_vm1, %v6318_v50  ;;  %v2783_v17 = vrot.slane %v2781_v10, 4  ;;  %v2794_v50 = vshrl.u32 %v5961_v8, 16  ;;  %v6321_v14 = vcombine.low %v5168_v1, %v5171_v41  ;;  %v2800_v31 = vshll.u32 %v5962_v5, 16  ;;  %v5968_v5 = vld [vmem:[%s7197_s25 + $0xbc] sm:$0x1] }
 0x119   : > { %6788 = vmatprep.mubr.msk.bf16.mxu0 %vm349_vm1, %v6319_v46  ;;  %v2786_v3 = vrot.slane %v2784_v13, 5  ;;  %v2792_v59 = vrot.slane %v2790_v44, 5  ;;  %v2805_v33 = vshrl.u32 %v5963_v25, 16  ;;  %v2808_v9 = vshll.u32 %v5963_v25, 16  ;;  %v5969_v25 = vld [vmem:[%s7197_s25 + $0xc0] sm:$0xf] }
 0x11a   : > { %v2796_v16 = vrot.slane %v2794_v50, 4  ;;  %v2814_v18 = vshll.u32 %v5964_v24, 16  ;;  %v8321_v37 = vsel %vm7319_vm7, %v5176_v39, %v5177_v47  ;;  %v2802_v38 = vrot.slane %v2800_v31, 5 }
 0x11b   : > { %v2787_v21 = vor.u32 %v2786_v3, %v2783_v17  ;;  %v2818_v60 = vshrl.u32 %v5964_v24, 16  ;;  %v2807_v48 = vrot.slane %v2805_v33, 4  ;;  %v2810_v22 = vrot.slane %v2808_v9, 5  ;;  %v6284_v33 = vld [vmem:[%s7197_s25 + $0xa8] sm:$0xe] }
 0x11c   : > { %6635 = vmatmul.mubr.msk.bf16.gmra.mrb[28].mxu1 %vm349_vm1, %v7132_v30  ;;  %v2797_v15 = vor.u32 %v2796_v16, %v2792_v59  ;;  %v8326_v26 = vrot.slane %v2814_v18, 5  ;;  %v2824_v52 = vshll.u32 %v5965_v40, 16  ;;  %v6306_v11 = vrot.slane %v6278_v61, 9 }
 0x11d   : > { %6656 = vmatprep.mubr.msk.bf16.mxu1 %vm349_vm1, %v8217_v55  ;;  %v2788_v32 = vrot.slane %v2787_v21, 4  ;;  %v2820_v54 = vrot.slane %v2818_v60, 4  ;;  %v2811_v56 = vor.u32 %v2810_v22, %v2807_v48  ;;  %v5181_v6 = vrot.slane %v6279_v34, 5  ;;  %v6285_v21 = vld [vmem:[%s7197_s25 + $0xac] sm:$0xf] }
 0x11e   : > { %v2798_v7 = vrot.slane %v2797_v15, 4  ;;  %v5184_v35 = vrot.slane %v6280_v27, 5  ;;  %v5982_v55 = vcombine.low %v2721_v2, %v2731_v19  ;;  %v5188_v53 = vrot.slane %v6282_v23, 5  ;;  %v5971_v27 = vld [vmem:[%s7197_s25 + $0xc8] sm:$0x1] }
 0x11f   : > { %v2793_v46 = vsel %vm7244_vm4, %v2788_v32, %v2792_v59  ;;  %v2821_v36 = vor.u32 %v2820_v54, %v8326_v26  ;;  %v5983_v8 = vcombine.low %v2745_v28, %v2755_v49  ;;  %v8347_v51 = vcombine.low %v2769_v62, %v2779_v63  ;;  %v6283_v28 = vld [vmem:[%s7197_s25 + $0xa4] sm:$0x1]  ;;  %v6288_v22 = vld [vmem:[%s7197_s25 + $0xb8] sm:$0xf] }
 0x120   : > { %6789 = vmatmul.mubr.msk.bf16.gmra.mrb[12].mxu0 %vm349_vm1, %v6320_v4  ;;  %v2803_v20 = vsel %vm7244_vm4, %v2798_v7, %v2802_v38  ;;  %v5183_v42 = vrot.slane %v5181_v6, 4  ;;  %v6322_v2 = vcombine.low %v8299_v29, %v8321_v37  ;;  %v8355_v19 = vrot.slane %v2824_v52, 5  ;;  %v5970_v29 = vld [vmem:[%s7197_s25 + $0xc4] sm:$0xf]  ;;  %v6286_v38 = vld [vmem:[%s7197_s25 + $0xb0] sm:$0x1] }
 0x121   : > { %6792 = vmatprep.mubr.msk.bf16.mxu0 %vm349_vm1, %v6321_v14  ;;  %v5182_v4 = vsel %vm7319_vm7, %v6306_v11, %v5181_v6  ;;  %v6307_v49 = vrot.slane %v6281_v45, 9  ;;  %v5985_v58 = vcombine.low %v2793_v46, %v2803_v20  ;;  %v2812_v1 = vrot.slane %v2811_v56, 4  ;;  %v6287_v52 = vld [vmem:[%s7197_s25 + $0xb4] sm:$0xe] }
 0x122   : > { %v5185_v41 = vsel %vm7319_vm7, %v5183_v42, %v5184_v35  ;;  %v2829_v10 = vshrl.u32 %v5966_v57, 16  ;;  %v2822_v39 = vrot.slane %v2821_v36, 4  ;;  %v5190_v47 = vrot.slane %v5188_v53, 4  ;;  %v6290_v36 = vld [vmem:[%s7197_s25 + $0xc0] sm:$0xe] }
 0x123   : > { %v2832_v13 = vshll.u32 %v5966_v57, 16  ;;  %v2838_v44 = vshll.u32 %v5967_v12, 16  ;;  %v6323_v24 = vcombine.low %v5182_v4, %v5185_v41  ;;  %v5191_v30 = vrot.slane %v6283_v28, 5  ;;  %v6291_v42 = vld [vmem:[%s7197_s25 + $0xc4] sm:$0xf] }
 0x124   : > { %6657 = vmatmul.mubr.msk.bf16.vlgmr.msra.gmra.mrb[16].mxu1 %vm349_vm1, %v5982_v55  ;;  %v2831_v62 = vrot.slane %v2829_v10, 4  ;;  %v2842_v63 = vshrl.u32 %v5967_v12, 16  ;;  %v5189_v17 = vsel %vm7319_vm7, %v6307_v49, %v5188_v53  ;;  %v2848_v3 = vshll.u32 %v5968_v5, 16  ;;  %v6289_v55 = vld [vmem:[%s7197_s25 + $0xbc] sm:$0x1] }
 0x125   : > { %6660 = vmatprep.mubr.msk.bf16.mxu1 %vm349_vm1, %v5983_v8  ;;  %v2834_v50 = vrot.slane %v2832_v13, 5  ;;  %v2840_v14 = vrot.slane %v2838_v44, 5  ;;  %v2853_v31 = vshrl.u32 %v5969_v25, 16  ;;  %v2856_v40 = vshll.u32 %v5969_v25, 16  ;;  %v6292_v12 = vld [vmem:[%s7197_s25 + $0xc8] sm:$0x1] }
 0x126   : > { %v2844_v59 = vrot.slane %v2842_v63, 4  ;;  %v2862_v16 = vshll.u32 %v5970_v29, 16  ;;  %v2817_v9 = vsel %vm7244_vm4, %v2812_v1, %v8326_v26  ;;  %v2827_v18 = vsel %vm7244_vm4, %v2822_v39, %v8355_v19  ;;  %v6294_v49 = vld [vmem:[%s7197_s25 + $0xd0] sm:$0xf] }
 0x127   : > { %v2835_v61 = vor.u32 %v2834_v50, %v2831_v62  ;;  %v2866_v37 = vshrl.u32 %v5970_v29, 16  ;;  %v5192_v60 = vsel %vm7319_vm7, %v5190_v47, %v5191_v30  ;;  %v2855_v15 = vrot.slane %v2853_v31, 4  ;;  %v6295_v50 = vld [vmem:[%s7197_s25 + $0xd4] sm:$0x1] }
 0x128   : > { %6793 = vmatmul.mubr.msk.bf16.gmra.mrb[16].mxu0 %vm349_vm1, %v6322_v2  ;;  %v2845_v34 = vor.u32 %v2844_v59, %v2840_v14  ;;  %v2858_v48 = vrot.slane %v2856_v40, 5  ;;  %v2864_v23 = vrot.slane %v2862_v16, 5  ;;  %v6308_v54 = vrot.slane %v6284_v33, 9 }
 0x129   : > { %6796 = vmatprep.mubr.msk.bf16.mxu0 %vm349_vm1, %v6323_v24  ;;  %v2836_v26 = vrot.slane %v2835_v61, 4  ;;  %v2868_v32 = vrot.slane %v2866_v37, 4  ;;  %v2850_v7 = vrot.slane %v2848_v3, 5  ;;  %v5195_v56 = vrot.slane %v6285_v21, 5 }
 0x12a   : > { %v2846_v11 = vrot.slane %v2845_v34, 4  ;;  %v5198_v6 = vrot.slane %v6286_v38, 5  ;;  %v6324_v35 = vcombine.low %v5189_v17, %v5192_v60  ;;  %v2872_v45 = vshll.u32 %v5971_v27, 16  ;;  %v6293_v17 = vld [vmem:[%s7197_s25 + $0xcc] sm:$0xe] }
 0x12b   : > { %v5202_v46 = vrot.slane %v6288_v22, 5  ;;  %v2859_v53 = vor.u32 %v2858_v48, %v2855_v15  ;;  %v5196_v57 = vsel %vm7319_vm7, %v6308_v54, %v5195_v56  ;;  %v5197_v8 = vrot.slane %v5195_v56, 4 }
 0x12c   : > { %6661 = vmatmul.mubr.msk.bf16.gmra.mrb[20].mxu1 %vm349_vm1, %v8347_v51  ;;  %v6309_v20 = vrot.slane %v6287_v52, 9  ;;  %v5986_v2 = vcombine.low %v2817_v9, %v2827_v18  ;;  %v2841_v19 = vsel %vm7244_vm4, %v2836_v26, %v2840_v14  ;;  %v2869_v4 = vor.u32 %v2868_v32, %v2864_v23 }
 0x12d   : > { %6664 = vmatprep.mubr.msk.bf16.mxu1 %vm349_vm1, %v5985_v58  ;;  %v5204_v28 = vrot.slane %v5202_v46, 4  ;;  %v2851_v51 = vsel %vm7244_vm4, %v2846_v11, %v2850_v7  ;;  %v5199_v1 = vsel %vm7319_vm7, %v5197_v8, %v5198_v6  ;;  %v5205_v41 = vrot.slane %v6289_v55, 5  ;;  %v8438_v6 = vld [vmem:[%s8519_s2] ss:$0 sm:$0xff] }
 0x12e   : > { %v6310_v5 = vrot.slane %v6290_v36, 9  ;;  %v2874_v58 = vrot.slane %v2872_v45, 5  ;;  %v6325_v10 = vcombine.low %v5196_v57, %v5199_v1  ;;  %v5209_v25 = vrot.slane %v6291_v42, 5 }
 0x12f   : > { %v5212_v39 = vrot.slane %v6292_v12, 5  ;;  %v2860_v47 = vrot.slane %v2859_v53, 4  ;;  %v5203_v13 = vsel %vm7319_vm7, %v6309_v20, %v5202_v46  ;;  %v5206_v44 = vsel %vm7319_vm7, %v5204_v28, %v5205_v41 }
 0x130   : > { %6797 = vmatmul.mubr.msk.bf16.gmra.mrb[20].mxu0 %vm349_vm1, %v6324_v35  ;;  %v5216_v29 = vrot.slane %v6294_v49, 5  ;;  %v5987_v24 = vcombine.low %v2841_v19, %v2851_v51  ;;  %v2870_v30 = vrot.slane %v2869_v4, 4  ;;  %v5210_v62 = vsel %vm7319_vm7, %v6310_v5, %v5209_v25 }
 0x131   : > { %6800 = vmatprep.mubr.msk.bf16.mxu0 %vm349_vm1, %v6325_v10  ;;  %v5211_v63 = vrot.slane %v5209_v25, 4  ;;  %v6326_v14 = vcombine.low %v5203_v13, %v5206_v44  ;;  %v6311_v31 = vrot.slane %v6293_v17, 9  ;;  %v5219_v16 = vrot.slane %v6295_v50, 5 }
 0x132   : > { %v5218_v40 = vrot.slane %v5216_v29, 4  ;;  %v2865_v33 = vsel %vm7244_vm4, %v2860_v47, %v2864_v23  ;;  %v2875_v9 = vsel %vm7244_vm4, %v2870_v30, %v2874_v58 }
 0x133   : > { %v5213_v3 = vsel %vm7319_vm7, %v5211_v63, %v5212_v39  ;;  %v5988_v18 = vcombine.low %v2865_v33, %v2875_v9  ;;  %v5217_v61 = vsel %vm7319_vm7, %v6311_v31, %v5216_v29 }
 0x134   : > { %6665 = vmatmul.mubr.msk.bf16.gmra.mrb[24].mxu1 %vm349_vm1, %v5986_v2  ;;  %v6327_v59 = vcombine.low %v5210_v62, %v5213_v3  ;;  %v5220_v37 = vsel %vm7319_vm7, %v5218_v40, %v5219_v16 }
 0x135   : > { %6668 = vmatprep.mubr.msk.bf16.mxu1 %vm349_vm1, %v5987_v24  ;;  %v6328_v21 = vcombine.low %v5217_v61, %v5220_v37 }
 0x138   : > { %6801 = vmatmul.mubr.msk.bf16.gmra.mrb[24].mxu0 %vm349_vm1, %v6326_v14 }
 0x139   : > { %6804 = vmatprep.mubr.msk.bf16.mxu0 %vm349_vm1, %v6327_v59 }
 0x13c   : > { %6669 = vmatmul.mubr.msk.bf16.gmra.mrb[28].mxu1 %vm349_vm1, %v5988_v18 }
 0x140   : > { %6805 = vmatmul.mubr.msk.bf16.gmra.mrb[28].mxu0 %vm349_vm1, %v6328_v21 }
 0x1b7   : > { %v6608_v38 = vpop.f32.mrb[0].mxu1 }
 0x1b8   : > { %v2221_v60 = vpop.f32.mrb[1].mxu1 }
 0x1b9   : > { %v6609_v43 = vpop.f32.mrb[2].mxu1 }
 0x1ba   : > { %v2224_v34 = vpop.f32.mrb[3].mxu1 }
 0x1bf   : > { %v6612_v27 = vpop.f32.mrb[4].mxu1 }
 0x1c0   : > { %v2237_v15 = vpop.f32.mrb[5].mxu1 }
 0x1c1   : > { %v6613_v48 = vpop.f32.mrb[6].mxu1 }
 0x1c2   : > { %v2240_v22 = vpop.f32.mrb[7].mxu1 }
 0x1c7   : > { %v6616_v26 = vpop.f32.mrb[8].mxu1 }
 0x1c8   : > { %v2253_v23 = vpop.f32.mrb[9].mxu1 }
 0x1c9   : > { %v6617_v32 = vpop.f32.mrb[10].mxu1 }
 0x1ca   : > { %v2256_v54 = vpop.f32.mrb[11].mxu1 }
 0x1cf   : > { %v8427_v0 = vpop.f32.mrb[12].mxu1 }
 0x1d0   : > { %v8429_v52 = vpop.f32.mrb[13].mxu1 }
 0x1d1   : > { %v8431_v11 = vpop.f32.mrb[14].mxu1 }
 0x1d2   : > { %v8433_v7 = vpop.f32.mrb[15].mxu1 }
 0x1db   : > { %v6778_v56 = vpop.f32.mrb[0].mxu0 }
 0x1dc   : > { %v6810_v35 = vadd.f32 %v6778_v56, %v6608_v38  ;;  %v5356_v45 = vpop.f32.mrb[1].mxu0 }
 0x1dd   : > { %v6811_v55 = vadd.f32 %v5356_v45, %v2221_v60  ;;  %v6779_v46 = vpop.f32.mrb[2].mxu0 }
 0x1de   : > { %v5588_v36 = vadd.f32 %v6810_v35, %v8438_v6  ;;  %v6812_v53 = vadd.f32 %v6779_v46, %v6609_v43  ;;  %v5359_v57 = vpop.f32.mrb[3].mxu0 }
 0x1df   : > { %v5586_v8 = vadd.f32 %v6811_v55, %v8438_v6  ;;  %v6813_v20 = vadd.f32 %v5359_v57, %v2224_v34 }
 0x1e0   : > { %v5620_v42 = vmax.f32 %v5588_v36, 0.0  ;;  %v5589_v12 = vadd.f32 %v6812_v53, %v8438_v6 }
 0x1e1   : > { %v5618_v2 = vmax.f32 %v5586_v8, 0.0  ;;  %v5587_v19 = vadd.f32 %v6813_v20, %v8438_v6 }
 0x1e2   : > { %5652 = vst [vmem:[%s8445_s18 + $0x10] sm:$0xff] %v5620_v42  ;;  %v5621_v4 = vmax.f32 %v5589_v12, 0.0 }
 0x1e3   : > { %5650 = vst [vmem:[%s8445_s18] sm:$0xff] %v5618_v2  ;;  %v5619_v28 = vmax.f32 %v5587_v19, 0.0  ;;  %v6782_v49 = vpop.f32.mrb[4].mxu0 }
 0x1e4   : > { %5653 = vst [vmem:[%s8445_s18 + $0x18] sm:$0xff] %v5621_v4  ;;  %v6814_v51 = vadd.f32 %v6782_v49, %v6612_v27  ;;  %v5372_v1 = vpop.f32.mrb[5].mxu0 }
 0x1e5   : > { %5651 = vst [vmem:[%s8445_s18 + $0x8] sm:$0xff] %v5619_v28  ;;  %v6815_v41 = vadd.f32 %v5372_v1, %v2237_v15  ;;  %v6783_v5 = vpop.f32.mrb[6].mxu0 }
 0x1e6   : > { %v5592_v58 = vadd.f32 %v6814_v51, %v8438_v6  ;;  %v6816_v10 = vadd.f32 %v6783_v5, %v6613_v48  ;;  %v5375_v25 = vpop.f32.mrb[7].mxu0 }
 0x1e7   : > { %v5590_v39 = vadd.f32 %v6815_v41, %v8438_v6  ;;  %v6817_v47 = vadd.f32 %v5375_v25, %v2240_v22 }
 0x1e8   : > { %v5624_v13 = vmax.f32 %v5592_v58, 0.0  ;;  %v5593_v44 = vadd.f32 %v6816_v10, %v8438_v6 }
 0x1e9   : > { %v5622_v29 = vmax.f32 %v5590_v39, 0.0  ;;  %v5591_v24 = vadd.f32 %v6817_v47, %v8438_v6 }
 0x1ea   : > { %5656 = vst [vmem:[%s8445_s18 + $0x30] sm:$0xff] %v5624_v13  ;;  %v5625_v30 = vmax.f32 %v5593_v44, 0.0 }
 0x1eb   : > { %5654 = vst [vmem:[%s8445_s18 + $0x20] sm:$0xff] %v5622_v29  ;;  %v5623_v62 = vmax.f32 %v5591_v24, 0.0  ;;  %v6786_v63 = vpop.f32.mrb[8].mxu0 }
 0x1ec   : > { %5657 = vst [vmem:[%s8445_s18 + $0x38] sm:$0xff] %v5625_v30  ;;  %v6818_v17 = vadd.f32 %v6786_v63, %v6616_v26  ;;  %v5388_v50 = vpop.f32.mrb[9].mxu0 }
 0x1ed   : > { %5655 = vst [vmem:[%s8445_s18 + $0x28] sm:$0xff] %v5623_v62  ;;  %v6819_v14 = vadd.f32 %v5388_v50, %v2253_v23  ;;  %v6787_v3 = vpop.f32.mrb[10].mxu0 }
 0x1ee   : > { %v5596_v59 = vadd.f32 %v6818_v17, %v8438_v6  ;;  %v6820_v31 = vadd.f32 %v6787_v3, %v6617_v32  ;;  %v5391_v40 = vpop.f32.mrb[11].mxu0 }
 0x1ef   : > { %v5594_v16 = vadd.f32 %v6819_v14, %v8438_v6  ;;  %v6821_v33 = vadd.f32 %v5391_v40, %v2256_v54 }
 0x1f0   : > { %v5628_v9 = vmax.f32 %v5596_v59, 0.0  ;;  %v5597_v18 = vadd.f32 %v6820_v31, %v8438_v6 }
 0x1f1   : > { %v5626_v61 = vmax.f32 %v5594_v16, 0.0  ;;  %v5595_v37 = vadd.f32 %v6821_v33, %v8438_v6 }
 0x1f2   : > { %5660 = vst [vmem:[%s8445_s18 + $0x50] sm:$0xff] %v5628_v9  ;;  %v5629_v21 = vmax.f32 %v5597_v18, 0.0 }
 0x1f3   : > { %5658 = vst [vmem:[%s8445_s18 + $0x40] sm:$0xff] %v5626_v61  ;;  %v5627_v38 = vmax.f32 %v5595_v37, 0.0  ;;  %v6790_v60 = vpop.f32.mrb[12].mxu0 }
 0x1f4   : > { %5661 = vst [vmem:[%s8445_s18 + $0x58] sm:$0xff] %v5629_v21  ;;  %v6822_v43 = vadd.f32 %v6790_v60, %v8427_v0  ;;  %v5404_v34 = vpop.f32.mrb[13].mxu0 }
 0x1f5   : > { %5659 = vst [vmem:[%s8445_s18 + $0x48] sm:$0xff] %v5627_v38  ;;  %v6823_v27 = vadd.f32 %v5404_v34, %v8429_v52  ;;  %v6791_v15 = vpop.f32.mrb[14].mxu0 }
 0x1f6   : > { %v5600_v48 = vadd.f32 %v6822_v43, %v8438_v6  ;;  %v6824_v22 = vadd.f32 %v6791_v15, %v8431_v11  ;;  %v5407_v26 = vpop.f32.mrb[15].mxu0 }
 0x1f7   : > { %v5598_v23 = vadd.f32 %v6823_v27, %v8438_v6  ;;  %v6825_v32 = vadd.f32 %v5407_v26, %v8433_v7  ;;  %v6658_v54 = vpop.f32.mrb[16].mxu1 }
 0x1f8   : > { %v5632_v0 = vmax.f32 %v5600_v48, 0.0  ;;  %v5601_v56 = vadd.f32 %v6824_v22, %v8438_v6  ;;  %v3075_v35 = vpop.f32.mrb[17].mxu1 }
 0x1f9   : > { %v5630_v45 = vmax.f32 %v5598_v23, 0.0  ;;  %v5599_v52 = vadd.f32 %v6825_v32, %v8438_v6  ;;  %v6659_v55 = vpop.f32.mrb[18].mxu1 }
 0x1fa   : > { %5664 = vst [vmem:[%s8445_s18 + $0x70] sm:$0xff] %v5632_v0  ;;  %v5633_v46 = vmax.f32 %v5601_v56, 0.0  ;;  %v3078_v11 = vpop.f32.mrb[19].mxu1 }
 0x1fb   : > { %5662 = vst [vmem:[%s8445_s18 + $0x60] sm:$0xff] %v5630_v45  ;;  %v5631_v36 = vmax.f32 %v5599_v52, 0.0  ;;  %v6794_v53 = vpop.f32.mrb[16].mxu0 }
 0x1fc   : > { %5665 = vst [vmem:[%s8445_s18 + $0x78] sm:$0xff] %v5633_v46  ;;  %v6826_v57 = vadd.f32 %v6794_v53, %v6658_v54  ;;  %v5420_v7 = vpop.f32.mrb[17].mxu0 }
 0x1fd   : > { %5663 = vst [vmem:[%s8445_s18 + $0x68] sm:$0xff] %v5631_v36  ;;  %v6827_v8 = vadd.f32 %v5420_v7, %v3075_v35  ;;  %v6795_v20 = vpop.f32.mrb[18].mxu0 }
 0x1fe   : > { %v5604_v42 = vadd.f32 %v6826_v57, %v8438_v6  ;;  %v6828_v12 = vadd.f32 %v6795_v20, %v6659_v55  ;;  %v5423_v2 = vpop.f32.mrb[19].mxu0 }
 0x1ff   : > { %v5602_v19 = vadd.f32 %v6827_v8, %v8438_v6  ;;  %v6829_v4 = vadd.f32 %v5423_v2, %v3078_v11  ;;  %v6662_v28 = vpop.f32.mrb[20].mxu1 }
 0x200   : > { %v5636_v49 = vmax.f32 %v5604_v42, 0.0  ;;  %v5605_v51 = vadd.f32 %v6828_v12, %v8438_v6  ;;  %v3091_v1 = vpop.f32.mrb[21].mxu1 }
 0x201   : > { %v5634_v41 = vmax.f32 %v5602_v19, 0.0  ;;  %v5603_v5 = vadd.f32 %v6829_v4, %v8438_v6  ;;  %v6663_v58 = vpop.f32.mrb[22].mxu1 }
 0x202   : > { %5668 = vst [vmem:[%s8445_s18 + $0x90] sm:$0xff] %v5636_v49  ;;  %v5637_v10 = vmax.f32 %v5605_v51, 0.0  ;;  %v3094_v25 = vpop.f32.mrb[23].mxu1 }
 0x203   : > { %5666 = vst [vmem:[%s8445_s18 + $0x80] sm:$0xff] %v5634_v41  ;;  %v5635_v39 = vmax.f32 %v5603_v5, 0.0  ;;  %v6798_v47 = vpop.f32.mrb[20].mxu0 }
 0x204   : > { %5669 = vst [vmem:[%s8445_s18 + $0x98] sm:$0xff] %v5637_v10  ;;  %v6830_v13 = vadd.f32 %v6798_v47, %v6662_v28  ;;  %v5436_v44 = vpop.f32.mrb[21].mxu0 }
 0x205   : > { %5667 = vst [vmem:[%s8445_s18 + $0x88] sm:$0xff] %v5635_v39  ;;  %v6831_v29 = vadd.f32 %v5436_v44, %v3091_v1  ;;  %v6799_v24 = vpop.f32.mrb[22].mxu0 }
 0x206   : > { %v5608_v30 = vadd.f32 %v6830_v13, %v8438_v6  ;;  %v6832_v62 = vadd.f32 %v6799_v24, %v6663_v58  ;;  %v5439_v63 = vpop.f32.mrb[23].mxu0 }
 0x207   : > { %v5606_v17 = vadd.f32 %v6831_v29, %v8438_v6  ;;  %v6833_v50 = vadd.f32 %v5439_v63, %v3094_v25  ;;  %v6666_v14 = vpop.f32.mrb[24].mxu1 }
 0x208   : > { %v5640_v3 = vmax.f32 %v5608_v30, 0.0  ;;  %v5609_v59 = vadd.f32 %v6832_v62, %v8438_v6  ;;  %v3107_v31 = vpop.f32.mrb[25].mxu1 }
 0x209   : > { %v5638_v40 = vmax.f32 %v5606_v17, 0.0  ;;  %v5607_v16 = vadd.f32 %v6833_v50, %v8438_v6  ;;  %v6667_v33 = vpop.f32.mrb[26].mxu1 }
 0x20a   : > { %5672 = vst [vmem:[%s8445_s18 + $0xb0] sm:$0xff] %v5640_v3  ;;  %v5641_v9 = vmax.f32 %v5609_v59, 0.0  ;;  %v3110_v18 = vpop.f32.mrb[27].mxu1 }
 0x20b   : > { %5670 = vst [vmem:[%s8445_s18 + $0xa0] sm:$0xff] %v5638_v40  ;;  %v5639_v61 = vmax.f32 %v5607_v16, 0.0  ;;  %v6802_v37 = vpop.f32.mrb[24].mxu0 }
 0x20c   : > { %5673 = vst [vmem:[%s8445_s18 + $0xb8] sm:$0xff] %v5641_v9  ;;  %v6834_v21 = vadd.f32 %v6802_v37, %v6666_v14  ;;  %v5452_v38 = vpop.f32.mrb[25].mxu0 }
 0x20d   : > { %5671 = vst [vmem:[%s8445_s18 + $0xa8] sm:$0xff] %v5639_v61  ;;  %v6835_v60 = vadd.f32 %v5452_v38, %v3107_v31  ;;  %v6803_v43 = vpop.f32.mrb[26].mxu0 }
 0x20e   : > { %v5612_v34 = vadd.f32 %v6834_v21, %v8438_v6  ;;  %v6836_v27 = vadd.f32 %v6803_v43, %v6667_v33  ;;  %v5455_v15 = vpop.f32.mrb[27].mxu0 }
 0x20f   : > { %v5610_v48 = vadd.f32 %v6835_v60, %v8438_v6  ;;  %v6837_v22 = vadd.f32 %v5455_v15, %v3110_v18  ;;  %v6670_v26 = vpop.f32.mrb[28].mxu1 }
 0x210   : > { %v5644_v23 = vmax.f32 %v5612_v34, 0.0  ;;  %v5613_v32 = vadd.f32 %v6836_v27, %v8438_v6  ;;  %v3123_v54 = vpop.f32.mrb[29].mxu1 }
 0x211   : > { %v5642_v0 = vmax.f32 %v5610_v48, 0.0  ;;  %v5611_v56 = vadd.f32 %v6837_v22, %v8438_v6  ;;  %v6671_v35 = vpop.f32.mrb[30].mxu1 }
 0x212   : > { %5676 = vst [vmem:[%s8445_s18 + $0xd0] sm:$0xff] %v5644_v23  ;;  %v5645_v45 = vmax.f32 %v5613_v32, 0.0  ;;  %v3126_v52 = vpop.f32.mrb[31].mxu1 }
 0x213   : > { %5674 = vst [vmem:[%s8445_s18 + $0xc0] sm:$0xff] %v5642_v0  ;;  %v5643_v55 = vmax.f32 %v5611_v56, 0.0  ;;  %v6806_v46 = vpop.f32.mrb[28].mxu0 }
 0x214   : > { %5677 = vst [vmem:[%s8445_s18 + $0xd8] sm:$0xff] %v5645_v45  ;;  %v6838_v11 = vadd.f32 %v6806_v46, %v6670_v26  ;;  %v5468_v36 = vpop.f32.mrb[29].mxu0 }
 0x215   : > { %5675 = vst [vmem:[%s8445_s18 + $0xc8] sm:$0xff] %v5643_v55  ;;  %v6839_v53 = vadd.f32 %v5468_v36, %v3123_v54  ;;  %v6807_v57 = vpop.f32.mrb[30].mxu0 }
 0x216   : > { %v5616_v7 = vadd.f32 %v6838_v11, %v8438_v6  ;;  %v6840_v8 = vadd.f32 %v6807_v57, %v6671_v35  ;;  %v5471_v20 = vpop.f32.mrb[31].mxu0 }
 0x217   : > { %v5614_v42 = vadd.f32 %v6839_v53, %v8438_v6  ;;  %v6841_v12 = vadd.f32 %v5471_v20, %v3126_v52 }
 0x218   : > { %v5648_v2 = vmax.f32 %v5616_v7, 0.0  ;;  %v5617_v19 = vadd.f32 %v6840_v8, %v8438_v6 }
 0x219   : > { %v5646_v4 = vmax.f32 %v5614_v42, 0.0  ;;  %v5615_v28 = vadd.f32 %v6841_v12, %v8438_v6 }
 0x21a   : > { %5680 = vst [vmem:[%s8445_s18 + $0xf0] sm:$0xff] %v5648_v2  ;;  %v5649_v49 = vmax.f32 %v5617_v19, 0.0 }
 0x21b   : > { %5678 = vst [vmem:[%s8445_s18 + $0xe0] sm:$0xff] %v5646_v4  ;;  %v5647_v51 = vmax.f32 %v5615_v28, 0.0 }
 0x21c   : > { %5681 = vst [vmem:[%s8445_s18 + $0xf8] sm:$0xff] %v5649_v49 }
 0x21d   : > { %5679 = vst [vmem:[%s8445_s18 + $0xe8] sm:$0xff] %v5647_v51 }
 0x21e PF: > { %s13_s12 = sadd.s32 1, %s7140_s12  }
 0x21f   : > { %p10_p4 = scmp.ge.s32.totalorder %s13_s12, 4  }
 0x221   :  { %12 = sbr.rel (!%p10_p4) target bundleno = 1 (0x1), region = 72 }

</bundles_post_ra>
